<compile_context>
chip_gen: v7x
topology: tpu7x:2x2x1
jax: 0.10.0
libtpu: 0.0.40
codegen_flags: <defaults>
</compile_context>

<pallas_src>
import functools

import jax
import jax.numpy as jnp
from jax import lax
from jax.experimental import pallas as pl
from jax.experimental.pallas import tpu as pltpu

_LN_EPS = 1e-5
# Fold batch into the row dimension (single grid step) when B*T is this small.
_FOLD_ROWS_MAX = 256


def _block_kernel(x_ref, wqkv_ref, wp_ref, w1_ref, w2_ref, vec_ref, b1_ref,
                  mask_ref, o_ref, *, n_head: int, compute_dtype):
    f32 = jnp.float32
    dt = compute_dtype

    x = x_ref[...]                              # (R, C), original precision
    R, C = x.shape
    xc = x.astype(dt)                           # matmul-operand precision
    mask = mask_ref[...]                        # (R, R) additive causal bias

    # ---- multi-head self-attention; output projection accumulated per head ---
    # All activation operands are full lane-dense slabs (no 32-lane column
    # slices, no scratch writes).  Scale is folded into the Q weights.
    y = jnp.zeros((R, C), f32)
    for h in range(n_head):
        q = jnp.dot(xc, wqkv_ref[3 * h + 0], preferred_element_type=f32).astype(dt)
        k = jnp.dot(xc, wqkv_ref[3 * h + 1], preferred_element_type=f32).astype(dt)
        v = jnp.dot(xc, wqkv_ref[3 * h + 2], preferred_element_type=f32).astype(dt)

        # q @ k^T (last-dim/last-dim contraction -> no in-kernel transpose)
        s = lax.dot_general(q, k, (((1,), (1,)), ((), ())),
                            preferred_element_type=f32) + mask

        # softmax over last axis (f32 vector math; EUP reciprocal)
        m = jnp.max(s, axis=-1, keepdims=True)
        p = jnp.exp(s - m)
        p = p * pl.reciprocal(jnp.sum(p, axis=-1, keepdims=True), approx=True)

        o = jnp.dot(p.astype(dt), v, preferred_element_type=f32)      # (R, hs)
        y = y + jnp.dot(o.astype(dt), wp_ref[h], preferred_element_type=f32)

    y = y + vec_ref[0:1, :]                     # projection bias

    # ---- residual + LayerNorm1 (f32) ----
    r1 = y + x.astype(f32)
    mu1 = jnp.mean(r1, axis=-1, keepdims=True)
    var1 = jnp.mean((r1 - mu1) ** 2, axis=-1, keepdims=True)
    r1n = (r1 - mu1) * lax.rsqrt(var1 + _LN_EPS) * vec_ref[1:2, :] + vec_ref[2:3, :]

    # ---- FeedForward: Linear(C,4C) -> ReLU -> Linear(4C,C) (pre-T weights) ---
    h1 = jnp.dot(r1n.astype(dt), w1_ref[...],
                 preferred_element_type=f32) + b1_ref[...]
    h1 = jnp.maximum(h1, 0.0)
    h2 = jnp.dot(h1.astype(dt), w2_ref[...],
                 preferred_element_type=f32) + vec_ref[3:4, :]

    # ---- residual + LayerNorm2 (f32) ----
    r2 = h2 + r1n
    mu2 = jnp.mean(r2, axis=-1, keepdims=True)
    var2 = jnp.mean((r2 - mu2) ** 2, axis=-1, keepdims=True)
    out = (r2 - mu2) * lax.rsqrt(var2 + _LN_EPS) * vec_ref[4:5, :] + vec_ref[5:6, :]

    o_ref[...] = out.astype(o_ref.dtype)


def prepare_block_params(params, *, n_head: int, compute_dtype=jnp.bfloat16):
    """One-time weight layout plumbing.  Call once at init, not per forward.

    `params` follow PyTorch Linear (out, in) layout:
      wq/wk/wv: (H, hs, C), wp: (C, C), bp: (C,), w1: (4C, C), b1: (4C,),
      w2: (C, 4C), b2: (C,), g1/be1/g2/be2: (C,) LayerNorm weights.
    """
    C = params["wp"].shape[0]
    H = n_head
    hs = C // H
    Cff = params["w1"].shape[0]
    f32 = jnp.float32
    dt = compute_dtype
    scale = jnp.asarray(hs, f32) ** -0.5

    # (3H, C, hs): index 3h+{0,1,2} = Q/K/V of head h, pre-transposed to (C, hs).
    # The 1/sqrt(hs) attention scale is folded into the Q weights.
    qkv = jnp.stack([params["wq"] * scale, params["wk"], params["wv"]],
                    axis=1)                                     # (H, 3, hs, C)
    wqkv3 = jnp.transpose(qkv.reshape(3 * H, hs, C), (0, 2, 1))  # (3H, C, hs)

    # Output projection: wp^T rows grouped per head -> (H, hs, C)
    wp3 = params["wp"].T.reshape(H, hs, C)
    w1T = params["w1"].T                                         # (C, 4C)
    w2T = params["w2"].T                                         # (4C, C)

    # Pack the six C-wide f32 bias / LayerNorm vectors into one slab.
    vecs = jnp.stack([params["bp"], params["g1"], params["be1"],
                      params["b2"], params["g2"], params["be2"]],
                     axis=0).astype(f32)                         # (6, C)
    b1 = params["b1"].reshape(1, Cff).astype(f32)

    return dict(
        wqkv3=wqkv3.astype(dt), wp3=wp3.astype(dt),
        w1T=w1T.astype(dt), w2T=w2T.astype(dt),
        vecs=vecs, b1=b1,
        n_head=H, head_size=hs, compute_dtype=dt)


@functools.lru_cache(maxsize=None)
def _attn_mask_bias(batch_block: int, seq_len: int):
    """Additive attention bias (built once per shape): 0 where attention is
    allowed, -1e30 otherwise.  Block-diagonal over the folded batch dimension,
    causal within each sequence."""
    R = batch_block * seq_len
    r = jnp.arange(R)
    same_seq = (r[:, None] // seq_len) == (r[None, :] // seq_len)
    causal = (r[:, None] % seq_len) >= (r[None, :] % seq_len)
    return jnp.where(same_seq & causal, 0.0, -1e30).astype(jnp.float32)


def block_forward(x, prep, *, batch_block=None):
    """x: (B, T, C).  `prep` is the output of `prepare_block_params`."""
    B, T, C = x.shape
    assert T % 8 == 0, "sequence length must be a multiple of 8"
    H = prep["n_head"]
    dt = prep["compute_dtype"]
    Cff = prep["w1T"].shape[1]

    if batch_block is None:
        # Tiny shapes: fold the whole batch into one grid step (B*T-row
        # matmuls, one step of fixed overhead).  Larger shapes: one batch per
        # grid step, marked "parallel" (keeps both v7x TensorCores busy).
        batch_block = B if B * T <= _FOLD_ROWS_MAX else 1
    bt = batch_block
    assert B % bt == 0, "batch_block must divide B"
    R = bt * T

    mask = _attn_mask_bias(bt, T)               # cached; no per-call rebuild
    x2d = x.reshape(B * T, C)                   # free relayout

    kernel = functools.partial(_block_kernel, n_head=H, compute_dtype=dt)
    rep2 = lambda i: (0, 0)                     # resident across the grid
    rep3 = lambda i: (0, 0, 0)

    out2d = pl.pallas_call(
        kernel,
        out_shape=jax.ShapeDtypeStruct((B * T, C), x.dtype),
        grid_spec=pltpu.PrefetchScalarGridSpec(
            num_scalar_prefetch=0,
            grid=(B // bt,),
            in_specs=[
                pl.BlockSpec((R, C), lambda i: (i, 0)),          # x rows
                pl.BlockSpec(prep["wqkv3"].shape, rep3),         # QKV weights
                pl.BlockSpec(prep["wp3"].shape, rep3),           # proj weight
                pl.BlockSpec(prep["w1T"].shape, rep2),           # FFN W1
                pl.BlockSpec(prep["w2T"].shape, rep2),           # FFN W2
                pl.BlockSpec(prep["vecs"].shape, rep2),          # packed biases/LN
                pl.BlockSpec(prep["b1"].shape, rep2),            # FFN b1
                pl.BlockSpec((R, R), rep2),                      # additive mask
            ],
            out_specs=pl.BlockSpec((R, C), lambda i: (i, 0)),
        ),
        compiler_params=pltpu.CompilerParams(
            dimension_semantics=("parallel",),
            vmem_limit_bytes=64 * 1024 * 1024),
    )(x2d, prep["wqkv3"], prep["wp3"], prep["w1T"], prep["w2T"],
      prep["vecs"], prep["b1"], mask)
    return out2d.reshape(B, T, C)


# ----------------------------- pure-JAX reference -----------------------------
def _layer_norm(x, gamma, beta, eps=_LN_EPS):
    mu = jnp.mean(x, axis=-1, keepdims=True)
    var = jnp.mean((x - mu) ** 2, axis=-1, keepdims=True)
    return (x - mu) * lax.rsqrt(var + eps) * gamma + beta


def reference_block(x, p, *, n_head: int):
    B, T, C = x.shape
    hs = C // n_head
    causal = jnp.tril(jnp.ones((T, T), dtype=bool))
    outs = []
    for h in range(n_head):
        q = x @ p["wq"][h].T
        k = x @ p["wk"][h].T
        v = x @ p["wv"][h].T
        s = (q @ jnp.swapaxes(k, -1, -2)) * (hs ** -0.5)
        s = jnp.where(causal, s, -jnp.inf)
        w = jax.nn.softmax(s, axis=-1)
        outs.append(w @ v)
    att = jnp.concatenate(outs, axis=-1)
    y = att @ p["wp"].T + p["bp"]
    r1 = _layer_norm(y + x, p["g1"], p["be1"])
    h1 = jax.nn.relu(r1 @ p["w1"].T + p["b1"])
    h2 = h1 @ p["w2"].T + p["b2"]
    return _layer_norm(h2 + r1, p["g2"], p["be2"])


if __name__ == "__main__":
    # GPTConfig-consistent small shapes: n_embd=128, n_head=4 (hs=32), B=2, T=16.
    B, T, C, H = 2, 16, 128, 4
    hs = C // H

    key = jax.random.PRNGKey(0)
    keys = jax.random.split(key, 14)
    s = 0.05
    x = jax.random.normal(keys[0], (B, T, C), dtype=jnp.float32)
    params = dict(
        wq=jax.random.normal(keys[1], (H, hs, C), dtype=jnp.float32) * s,
        wk=jax.random.normal(keys[2], (H, hs, C), dtype=jnp.float32) * s,
        wv=jax.random.normal(keys[3], (H, hs, C), dtype=jnp.float32) * s,
        wp=jax.random.normal(keys[4], (C, C), dtype=jnp.float32) * s,
        bp=jax.random.normal(keys[5], (C,), dtype=jnp.float32) * s,
        g1=1.0 + 0.1 * jax.random.normal(keys[6], (C,), dtype=jnp.float32),
        be1=0.1 * jax.random.normal(keys[7], (C,), dtype=jnp.float32),
        w1=jax.random.normal(keys[8], (4 * C, C), dtype=jnp.float32) * s,
        b1=jax.random.normal(keys[9], (4 * C,), dtype=jnp.float32) * s,
        w2=jax.random.normal(keys[10], (C, 4 * C), dtype=jnp.float32) * s,
        b2=jax.random.normal(keys[11], (C,), dtype=jnp.float32) * s,
        g2=1.0 + 0.1 * jax.random.normal(keys[12], (C,), dtype=jnp.float32),
        be2=0.1 * jax.random.normal(keys[13], (C,), dtype=jnp.float32),
    )

    ref = reference_block(x, params, n_head=H)

    # f32 matmul-operand path
    prep_f32 = prepare_block_params(params, n_head=H, compute_dtype=jnp.float32)
    out = jax.block_until_ready(block_forward(x, prep_f32))
    assert out.shape == (B, T, C)
    assert jnp.allclose(out, ref, atol=1e-2, rtol=1e-2), "f32 mismatch vs reference"

    # bf16 matmul-operand path (f32 accumulation, f32 softmax/LayerNorm)
    prep_bf16 = prepare_block_params(params, n_head=H, compute_dtype=jnp.bfloat16)
    out_bf16 = jax.block_until_ready(block_forward(x, prep_bf16))
    assert jnp.allclose(out_bf16.astype(jnp.float32), ref,
                        atol=1e-1, rtol=1e-1), "bf16 mismatch vs reference"

    print("KERNEL_OK")
</pallas_src>

<mosaic_0001>
module attributes {stable_mosaic.version = 11 : i64} {
  func.func @_block_kernel(%arg0: i32, %arg1: memref<32x128xf32, #tpu.memory_space<vmem>>, %arg2: memref<12x128x32xf32, #tpu.memory_space<vmem>>, %arg3: memref<4x32x128xf32, #tpu.memory_space<vmem>>, %arg4: memref<128x512xf32, #tpu.memory_space<vmem>>, %arg5: memref<512x128xf32, #tpu.memory_space<vmem>>, %arg6: memref<6x128xf32, #tpu.memory_space<vmem>>, %arg7: memref<1x512xf32, #tpu.memory_space<vmem>>, %arg8: memref<32x32xf32, #tpu.memory_space<vmem>>, %arg9: memref<32x128xf32, #tpu.memory_space<vmem>>) attributes {dimension_semantics = [#tpu.dimension_semantics<parallel>], iteration_bounds = array<i64: 1>, scalar_prefetch = 0 : i64, scratch_operands = 0 : i64, tpu.core_type = #tpu.core_type<tc>, window_params = [{transform_indices = @transform_0, window_bounds = array<i64: 32, 128>}, {pipeline_mode = #tpu.pipeline_mode<synchronous>, transform_indices = @transform_1, window_bounds = array<i64: 12, 128, 32>}, {pipeline_mode = #tpu.pipeline_mode<synchronous>, transform_indices = @transform_2, window_bounds = array<i64: 4, 32, 128>}, {pipeline_mode = #tpu.pipeline_mode<synchronous>, transform_indices = @transform_3, window_bounds = array<i64: 128, 512>}, {pipeline_mode = #tpu.pipeline_mode<synchronous>, transform_indices = @transform_4, window_bounds = array<i64: 512, 128>}, {pipeline_mode = #tpu.pipeline_mode<synchronous>, transform_indices = @transform_5, window_bounds = array<i64: 6, 128>}, {pipeline_mode = #tpu.pipeline_mode<synchronous>, transform_indices = @transform_6, window_bounds = array<i64: 1, 512>}, {pipeline_mode = #tpu.pipeline_mode<synchronous>, transform_indices = @transform_7, window_bounds = array<i64: 32, 32>}, {transform_indices = @transform_8, window_bounds = array<i64: 32, 128>}]} {
    %c0 = arith.constant 0 : index
    %c0_0 = arith.constant 0 : index
    %0 = vector.load %arg1[%c0, %c0_0] : memref<32x128xf32, #tpu.memory_space<vmem>>, vector<32x128xf32>
    %c0_1 = arith.constant 0 : index
    %c0_2 = arith.constant 0 : index
    %1 = vector.load %arg8[%c0_1, %c0_2] : memref<32x32xf32, #tpu.memory_space<vmem>>, vector<32x32xf32>
    %cst = arith.constant 0.000000e+00 : f32
    %2 = vector.broadcast %cst : f32 to vector<32x128xf32>
    %c0_3 = arith.constant 0 : index
    %c0_4 = arith.constant 0 : index
    %c0_5 = arith.constant 0 : index
    %3 = vector.load %arg2[%c0_3, %c0_4, %c0_5] : memref<12x128x32xf32, #tpu.memory_space<vmem>>, vector<1x128x32xf32>
    %4 = vector.shape_cast %3 : vector<1x128x32xf32> to vector<128x32xf32>
    %cst_6 = arith.constant dense<0.000000e+00> : vector<32x32xf32>
    %5 = tpu.matmul %0, %4, %cst_6 {dimension_numbers = #tpu.dot_dimension_numbers<[1], [0], [0], [1], [0, 0, 1, 1], [], []>} : vector<32x128xf32>, vector<128x32xf32>, vector<32x32xf32> -> vector<32x32xf32>
    %c1 = arith.constant 1 : index
    %c0_7 = arith.constant 0 : index
    %c0_8 = arith.constant 0 : index
    %6 = vector.load %arg2[%c1, %c0_7, %c0_8] : memref<12x128x32xf32, #tpu.memory_space<vmem>>, vector<1x128x32xf32>
    %7 = vector.shape_cast %6 : vector<1x128x32xf32> to vector<128x32xf32>
    %cst_9 = arith.constant dense<0.000000e+00> : vector<32x32xf32>
    %8 = tpu.matmul %0, %7, %cst_9 {dimension_numbers = #tpu.dot_dimension_numbers<[1], [0], [0], [1], [0, 0, 1, 1], [], []>} : vector<32x128xf32>, vector<128x32xf32>, vector<32x32xf32> -> vector<32x32xf32>
    %c2 = arith.constant 2 : index
    %c0_10 = arith.constant 0 : index
    %c0_11 = arith.constant 0 : index
    %9 = vector.load %arg2[%c2, %c0_10, %c0_11] : memref<12x128x32xf32, #tpu.memory_space<vmem>>, vector<1x128x32xf32>
    %10 = vector.shape_cast %9 : vector<1x128x32xf32> to vector<128x32xf32>
    %cst_12 = arith.constant dense<0.000000e+00> : vector<32x32xf32>
    %11 = tpu.matmul %0, %10, %cst_12 {dimension_numbers = #tpu.dot_dimension_numbers<[1], [0], [0], [1], [0, 0, 1, 1], [], []>} : vector<32x128xf32>, vector<128x32xf32>, vector<32x32xf32> -> vector<32x32xf32>
    %cst_13 = arith.constant dense<0.000000e+00> : vector<32x32xf32>
    %12 = tpu.matmul %5, %8, %cst_13 {dimension_numbers = #tpu.dot_dimension_numbers<[1], [1], [0], [0], [0, 0, 1, 0], [], []>} : vector<32x32xf32>, vector<32x32xf32>, vector<32x32xf32> -> vector<32x32xf32>
    %13 = arith.addf %12, %1 : vector<32x32xf32>
    %cst_14 = arith.constant dense<0xFF800000> : vector<32xf32>
    %14 = vector.multi_reduction <maximumf>, %13, %cst_14 [1] : vector<32x32xf32> to vector<32xf32>
    %15 = vector.shape_cast %14 : vector<32xf32> to vector<32x1xf32>
    %16 = vector.broadcast %15 : vector<32x1xf32> to vector<32x32xf32>
    %17 = arith.subf %13, %16 : vector<32x32xf32>
    %18 = math.exp %17 : vector<32x32xf32>
    %cst_15 = arith.constant dense<0.000000e+00> : vector<32xf32>
    %19 = vector.multi_reduction <add>, %18, %cst_15 [1] : vector<32x32xf32> to vector<32xf32>
    %20 = vector.shape_cast %19 : vector<32xf32> to vector<32x1xf32>
    %21 = tpu.reciprocal %20 {approx = true} : vector<32x1xf32> -> vector<32x1xf32>
    %22 = vector.broadcast %21 : vector<32x1xf32> to vector<32x32xf32>
    %23 = arith.mulf %18, %22 : vector<32x32xf32>
    %cst_16 = arith.constant dense<0.000000e+00> : vector<32x32xf32>
    %24 = tpu.matmul %23, %11, %cst_16 {dimension_numbers = #tpu.dot_dimension_numbers<[1], [0], [0], [1], [0, 0, 1, 1], [], []>} : vector<32x32xf32>, vector<32x32xf32>, vector<32x32xf32> -> vector<32x32xf32>
    %c0_17 = arith.constant 0 : index
    %c0_18 = arith.constant 0 : index
    %c0_19 = arith.constant 0 : index
    %25 = vector.load %arg3[%c0_17, %c0_18, %c0_19] : memref<4x32x128xf32, #tpu.memory_space<vmem>>, vector<1x32x128xf32>
    %26 = vector.shape_cast %25 : vector<1x32x128xf32> to vector<32x128xf32>
    %cst_20 = arith.constant dense<0.000000e+00> : vector<32x128xf32>
    %27 = tpu.matmul %24, %26, %cst_20 {dimension_numbers = #tpu.dot_dimension_numbers<[1], [0], [0], [1], [0, 0, 1, 1], [], []>} : vector<32x32xf32>, vector<32x128xf32>, vector<32x128xf32> -> vector<32x128xf32>
    %28 = arith.addf %2, %27 : vector<32x128xf32>
    %c3 = arith.constant 3 : index
    %c0_21 = arith.constant 0 : index
    %c0_22 = arith.constant 0 : index
    %29 = vector.load %arg2[%c3, %c0_21, %c0_22] : memref<12x128x32xf32, #tpu.memory_space<vmem>>, vector<1x128x32xf32>
    %30 = vector.shape_cast %29 : vector<1x128x32xf32> to vector<128x32xf32>
    %cst_23 = arith.constant dense<0.000000e+00> : vector<32x32xf32>
    %31 = tpu.matmul %0, %30, %cst_23 {dimension_numbers = #tpu.dot_dimension_numbers<[1], [0], [0], [1], [0, 0, 1, 1], [], []>} : vector<32x128xf32>, vector<128x32xf32>, vector<32x32xf32> -> vector<32x32xf32>
    %c4 = arith.constant 4 : index
    %c0_24 = arith.constant 0 : index
    %c0_25 = arith.constant 0 : index
    %32 = vector.load %arg2[%c4, %c0_24, %c0_25] : memref<12x128x32xf32, #tpu.memory_space<vmem>>, vector<1x128x32xf32>
    %33 = vector.shape_cast %32 : vector<1x128x32xf32> to vector<128x32xf32>
    %cst_26 = arith.constant dense<0.000000e+00> : vector<32x32xf32>
    %34 = tpu.matmul %0, %33, %cst_26 {dimension_numbers = #tpu.dot_dimension_numbers<[1], [0], [0], [1], [0, 0, 1, 1], [], []>} : vector<32x128xf32>, vector<128x32xf32>, vector<32x32xf32> -> vector<32x32xf32>
    %c5 = arith.constant 5 : index
    %c0_27 = arith.constant 0 : index
    %c0_28 = arith.constant 0 : index
    %35 = vector.load %arg2[%c5, %c0_27, %c0_28] : memref<12x128x32xf32, #tpu.memory_space<vmem>>, vector<1x128x32xf32>
    %36 = vector.shape_cast %35 : vector<1x128x32xf32> to vector<128x32xf32>
    %cst_29 = arith.constant dense<0.000000e+00> : vector<32x32xf32>
    %37 = tpu.matmul %0, %36, %cst_29 {dimension_numbers = #tpu.dot_dimension_numbers<[1], [0], [0], [1], [0, 0, 1, 1], [], []>} : vector<32x128xf32>, vector<128x32xf32>, vector<32x32xf32> -> vector<32x32xf32>
    %cst_30 = arith.constant dense<0.000000e+00> : vector<32x32xf32>
    %38 = tpu.matmul %31, %34, %cst_30 {dimension_numbers = #tpu.dot_dimension_numbers<[1], [1], [0], [0], [0, 0, 1, 0], [], []>} : vector<32x32xf32>, vector<32x32xf32>, vector<32x32xf32> -> vector<32x32xf32>
    %39 = arith.addf %38, %1 : vector<32x32xf32>
    %cst_31 = arith.constant dense<0xFF800000> : vector<32xf32>
    %40 = vector.multi_reduction <maximumf>, %39, %cst_31 [1] : vector<32x32xf32> to vector<32xf32>
    %41 = vector.shape_cast %40 : vector<32xf32> to vector<32x1xf32>
    %42 = vector.broadcast %41 : vector<32x1xf32> to vector<32x32xf32>
    %43 = arith.subf %39, %42 : vector<32x32xf32>
    %44 = math.exp %43 : vector<32x32xf32>
    %cst_32 = arith.constant dense<0.000000e+00> : vector<32xf32>
    %45 = vector.multi_reduction <add>, %44, %cst_32 [1] : vector<32x32xf32> to vector<32xf32>
    %46 = vector.shape_cast %45 : vector<32xf32> to vector<32x1xf32>
    %47 = tpu.reciprocal %46 {approx = true} : vector<32x1xf32> -> vector<32x1xf32>
    %48 = vector.broadcast %47 : vector<32x1xf32> to vector<32x32xf32>
    %49 = arith.mulf %44, %48 : vector<32x32xf32>
    %cst_33 = arith.constant dense<0.000000e+00> : vector<32x32xf32>
    %50 = tpu.matmul %49, %37, %cst_33 {dimension_numbers = #tpu.dot_dimension_numbers<[1], [0], [0], [1], [0, 0, 1, 1], [], []>} : vector<32x32xf32>, vector<32x32xf32>, vector<32x32xf32> -> vector<32x32xf32>
    %c1_34 = arith.constant 1 : index
    %c0_35 = arith.constant 0 : index
    %c0_36 = arith.constant 0 : index
    %51 = vector.load %arg3[%c1_34, %c0_35, %c0_36] : memref<4x32x128xf32, #tpu.memory_space<vmem>>, vector<1x32x128xf32>
    %52 = vector.shape_cast %51 : vector<1x32x128xf32> to vector<32x128xf32>
    %cst_37 = arith.constant dense<0.000000e+00> : vector<32x128xf32>
    %53 = tpu.matmul %50, %52, %cst_37 {dimension_numbers = #tpu.dot_dimension_numbers<[1], [0], [0], [1], [0, 0, 1, 1], [], []>} : vector<32x32xf32>, vector<32x128xf32>, vector<32x128xf32> -> vector<32x128xf32>
    %54 = arith.addf %28, %53 : vector<32x128xf32>
    %c6 = arith.constant 6 : index
    %c0_38 = arith.constant 0 : index
    %c0_39 = arith.constant 0 : index
    %55 = vector.load %arg2[%c6, %c0_38, %c0_39] : memref<12x128x32xf32, #tpu.memory_space<vmem>>, vector<1x128x32xf32>
    %56 = vector.shape_cast %55 : vector<1x128x32xf32> to vector<128x32xf32>
    %cst_40 = arith.constant dense<0.000000e+00> : vector<32x32xf32>
    %57 = tpu.matmul %0, %56, %cst_40 {dimension_numbers = #tpu.dot_dimension_numbers<[1], [0], [0], [1], [0, 0, 1, 1], [], []>} : vector<32x128xf32>, vector<128x32xf32>, vector<32x32xf32> -> vector<32x32xf32>
    %c7 = arith.constant 7 : index
    %c0_41 = arith.constant 0 : index
    %c0_42 = arith.constant 0 : index
    %58 = vector.load %arg2[%c7, %c0_41, %c0_42] : memref<12x128x32xf32, #tpu.memory_space<vmem>>, vector<1x128x32xf32>
    %59 = vector.shape_cast %58 : vector<1x128x32xf32> to vector<128x32xf32>
    %cst_43 = arith.constant dense<0.000000e+00> : vector<32x32xf32>
    %60 = tpu.matmul %0, %59, %cst_43 {dimension_numbers = #tpu.dot_dimension_numbers<[1], [0], [0], [1], [0, 0, 1, 1], [], []>} : vector<32x128xf32>, vector<128x32xf32>, vector<32x32xf32> -> vector<32x32xf32>
    %c8 = arith.constant 8 : index
    %c0_44 = arith.constant 0 : index
    %c0_45 = arith.constant 0 : index
    %61 = vector.load %arg2[%c8, %c0_44, %c0_45] : memref<12x128x32xf32, #tpu.memory_space<vmem>>, vector<1x128x32xf32>
    %62 = vector.shape_cast %61 : vector<1x128x32xf32> to vector<128x32xf32>
    %cst_46 = arith.constant dense<0.000000e+00> : vector<32x32xf32>
    %63 = tpu.matmul %0, %62, %cst_46 {dimension_numbers = #tpu.dot_dimension_numbers<[1], [0], [0], [1], [0, 0, 1, 1], [], []>} : vector<32x128xf32>, vector<128x32xf32>, vector<32x32xf32> -> vector<32x32xf32>
    %cst_47 = arith.constant dense<0.000000e+00> : vector<32x32xf32>
    %64 = tpu.matmul %57, %60, %cst_47 {dimension_numbers = #tpu.dot_dimension_numbers<[1], [1], [0], [0], [0, 0, 1, 0], [], []>} : vector<32x32xf32>, vector<32x32xf32>, vector<32x32xf32> -> vector<32x32xf32>
    %65 = arith.addf %64, %1 : vector<32x32xf32>
    %cst_48 = arith.constant dense<0xFF800000> : vector<32xf32>
    %66 = vector.multi_reduction <maximumf>, %65, %cst_48 [1] : vector<32x32xf32> to vector<32xf32>
    %67 = vector.shape_cast %66 : vector<32xf32> to vector<32x1xf32>
    %68 = vector.broadcast %67 : vector<32x1xf32> to vector<32x32xf32>
    %69 = arith.subf %65, %68 : vector<32x32xf32>
    %70 = math.exp %69 : vector<32x32xf32>
    %cst_49 = arith.constant dense<0.000000e+00> : vector<32xf32>
    %71 = vector.multi_reduction <add>, %70, %cst_49 [1] : vector<32x32xf32> to vector<32xf32>
    %72 = vector.shape_cast %71 : vector<32xf32> to vector<32x1xf32>
    %73 = tpu.reciprocal %72 {approx = true} : vector<32x1xf32> -> vector<32x1xf32>
    %74 = vector.broadcast %73 : vector<32x1xf32> to vector<32x32xf32>
    %75 = arith.mulf %70, %74 : vector<32x32xf32>
    %cst_50 = arith.constant dense<0.000000e+00> : vector<32x32xf32>
    %76 = tpu.matmul %75, %63, %cst_50 {dimension_numbers = #tpu.dot_dimension_numbers<[1], [0], [0], [1], [0, 0, 1, 1], [], []>} : vector<32x32xf32>, vector<32x32xf32>, vector<32x32xf32> -> vector<32x32xf32>
    %c2_51 = arith.constant 2 : index
    %c0_52 = arith.constant 0 : index
    %c0_53 = arith.constant 0 : index
    %77 = vector.load %arg3[%c2_51, %c0_52, %c0_53] : memref<4x32x128xf32, #tpu.memory_space<vmem>>, vector<1x32x128xf32>
    %78 = vector.shape_cast %77 : vector<1x32x128xf32> to vector<32x128xf32>
    %cst_54 = arith.constant dense<0.000000e+00> : vector<32x128xf32>
    %79 = tpu.matmul %76, %78, %cst_54 {dimension_numbers = #tpu.dot_dimension_numbers<[1], [0], [0], [1], [0, 0, 1, 1], [], []>} : vector<32x32xf32>, vector<32x128xf32>, vector<32x128xf32> -> vector<32x128xf32>
    %80 = arith.addf %54, %79 : vector<32x128xf32>
    %c9 = arith.constant 9 : index
    %c0_55 = arith.constant 0 : index
    %c0_56 = arith.constant 0 : index
    %81 = vector.load %arg2[%c9, %c0_55, %c0_56] : memref<12x128x32xf32, #tpu.memory_space<vmem>>, vector<1x128x32xf32>
    %82 = vector.shape_cast %81 : vector<1x128x32xf32> to vector<128x32xf32>
    %cst_57 = arith.constant dense<0.000000e+00> : vector<32x32xf32>
    %83 = tpu.matmul %0, %82, %cst_57 {dimension_numbers = #tpu.dot_dimension_numbers<[1], [0], [0], [1], [0, 0, 1, 1], [], []>} : vector<32x128xf32>, vector<128x32xf32>, vector<32x32xf32> -> vector<32x32xf32>
    %c10 = arith.constant 10 : index
    %c0_58 = arith.constant 0 : index
    %c0_59 = arith.constant 0 : index
    %84 = vector.load %arg2[%c10, %c0_58, %c0_59] : memref<12x128x32xf32, #tpu.memory_space<vmem>>, vector<1x128x32xf32>
    %85 = vector.shape_cast %84 : vector<1x128x32xf32> to vector<128x32xf32>
    %cst_60 = arith.constant dense<0.000000e+00> : vector<32x32xf32>
    %86 = tpu.matmul %0, %85, %cst_60 {dimension_numbers = #tpu.dot_dimension_numbers<[1], [0], [0], [1], [0, 0, 1, 1], [], []>} : vector<32x128xf32>, vector<128x32xf32>, vector<32x32xf32> -> vector<32x32xf32>
    %c11 = arith.constant 11 : index
    %c0_61 = arith.constant 0 : index
    %c0_62 = arith.constant 0 : index
    %87 = vector.load %arg2[%c11, %c0_61, %c0_62] : memref<12x128x32xf32, #tpu.memory_space<vmem>>, vector<1x128x32xf32>
    %88 = vector.shape_cast %87 : vector<1x128x32xf32> to vector<128x32xf32>
    %cst_63 = arith.constant dense<0.000000e+00> : vector<32x32xf32>
    %89 = tpu.matmul %0, %88, %cst_63 {dimension_numbers = #tpu.dot_dimension_numbers<[1], [0], [0], [1], [0, 0, 1, 1], [], []>} : vector<32x128xf32>, vector<128x32xf32>, vector<32x32xf32> -> vector<32x32xf32>
    %cst_64 = arith.constant dense<0.000000e+00> : vector<32x32xf32>
    %90 = tpu.matmul %83, %86, %cst_64 {dimension_numbers = #tpu.dot_dimension_numbers<[1], [1], [0], [0], [0, 0, 1, 0], [], []>} : vector<32x32xf32>, vector<32x32xf32>, vector<32x32xf32> -> vector<32x32xf32>
    %91 = arith.addf %90, %1 : vector<32x32xf32>
    %cst_65 = arith.constant dense<0xFF800000> : vector<32xf32>
    %92 = vector.multi_reduction <maximumf>, %91, %cst_65 [1] : vector<32x32xf32> to vector<32xf32>
    %93 = vector.shape_cast %92 : vector<32xf32> to vector<32x1xf32>
    %94 = vector.broadcast %93 : vector<32x1xf32> to vector<32x32xf32>
    %95 = arith.subf %91, %94 : vector<32x32xf32>
    %96 = math.exp %95 : vector<32x32xf32>
    %cst_66 = arith.constant dense<0.000000e+00> : vector<32xf32>
    %97 = vector.multi_reduction <add>, %96, %cst_66 [1] : vector<32x32xf32> to vector<32xf32>
    %98 = vector.shape_cast %97 : vector<32xf32> to vector<32x1xf32>
    %99 = tpu.reciprocal %98 {approx = true} : vector<32x1xf32> -> vector<32x1xf32>
    %100 = vector.broadcast %99 : vector<32x1xf32> to vector<32x32xf32>
    %101 = arith.mulf %96, %100 : vector<32x32xf32>
    %cst_67 = arith.constant dense<0.000000e+00> : vector<32x32xf32>
    %102 = tpu.matmul %101, %89, %cst_67 {dimension_numbers = #tpu.dot_dimension_numbers<[1], [0], [0], [1], [0, 0, 1, 1], [], []>} : vector<32x32xf32>, vector<32x32xf32>, vector<32x32xf32> -> vector<32x32xf32>
    %c3_68 = arith.constant 3 : index
    %c0_69 = arith.constant 0 : index
    %c0_70 = arith.constant 0 : index
    %103 = vector.load %arg3[%c3_68, %c0_69, %c0_70] : memref<4x32x128xf32, #tpu.memory_space<vmem>>, vector<1x32x128xf32>
    %104 = vector.shape_cast %103 : vector<1x32x128xf32> to vector<32x128xf32>
    %cst_71 = arith.constant dense<0.000000e+00> : vector<32x128xf32>
    %105 = tpu.matmul %102, %104, %cst_71 {dimension_numbers = #tpu.dot_dimension_numbers<[1], [0], [0], [1], [0, 0, 1, 1], [], []>} : vector<32x32xf32>, vector<32x128xf32>, vector<32x128xf32> -> vector<32x128xf32>
    %106 = arith.addf %80, %105 : vector<32x128xf32>
    %c0_72 = arith.constant 0 : index
    %c0_73 = arith.constant 0 : index
    %107 = vector.load %arg6[%c0_72, %c0_73] : memref<6x128xf32, #tpu.memory_space<vmem>>, vector<1x128xf32>
    %108 = vector.broadcast %107 : vector<1x128xf32> to vector<32x128xf32>
    %109 = arith.addf %106, %108 : vector<32x128xf32>
    %110 = arith.addf %109, %0 : vector<32x128xf32>
    %cst_74 = arith.constant dense<0.000000e+00> : vector<32xf32>
    %111 = vector.multi_reduction <add>, %110, %cst_74 [1] : vector<32x128xf32> to vector<32xf32>
    %112 = vector.shape_cast %111 : vector<32xf32> to vector<32x1xf32>
    %cst_75 = arith.constant 1.280000e+02 : f32
    %113 = vector.broadcast %cst_75 : f32 to vector<32x1xf32>
    %114 = arith.divf %112, %113 : vector<32x1xf32>
    %115 = vector.broadcast %114 : vector<32x1xf32> to vector<32x128xf32>
    %116 = arith.subf %110, %115 : vector<32x128xf32>
    %117 = arith.mulf %116, %116 : vector<32x128xf32>
    %cst_76 = arith.constant dense<0.000000e+00> : vector<32xf32>
    %118 = vector.multi_reduction <add>, %117, %cst_76 [1] : vector<32x128xf32> to vector<32xf32>
    %119 = vector.shape_cast %118 : vector<32xf32> to vector<32x1xf32>
    %cst_77 = arith.constant 1.280000e+02 : f32
    %120 = vector.broadcast %cst_77 : f32 to vector<32x1xf32>
    %121 = arith.divf %119, %120 : vector<32x1xf32>
    %122 = vector.broadcast %114 : vector<32x1xf32> to vector<32x128xf32>
    %123 = arith.subf %110, %122 : vector<32x128xf32>
    %cst_78 = arith.constant 9.99999974E-6 : f32
    %124 = vector.broadcast %cst_78 : f32 to vector<32x1xf32>
    %125 = arith.addf %121, %124 : vector<32x1xf32>
    %126 = math.rsqrt %125 : vector<32x1xf32>
    %127 = vector.broadcast %126 : vector<32x1xf32> to vector<32x128xf32>
    %128 = arith.mulf %123, %127 : vector<32x128xf32>
    %c1_79 = arith.constant 1 : index
    %c0_80 = arith.constant 0 : index
    %129 = vector.load %arg6[%c1_79, %c0_80] : memref<6x128xf32, #tpu.memory_space<vmem>>, vector<1x128xf32>
    %130 = vector.broadcast %129 : vector<1x128xf32> to vector<32x128xf32>
    %131 = arith.mulf %128, %130 : vector<32x128xf32>
    %c2_81 = arith.constant 2 : index
    %c0_82 = arith.constant 0 : index
    %132 = vector.load %arg6[%c2_81, %c0_82] : memref<6x128xf32, #tpu.memory_space<vmem>>, vector<1x128xf32>
    %133 = vector.broadcast %132 : vector<1x128xf32> to vector<32x128xf32>
    %134 = arith.addf %131, %133 : vector<32x128xf32>
    %c0_83 = arith.constant 0 : index
    %c0_84 = arith.constant 0 : index
    %135 = vector.load %arg4[%c0_83, %c0_84] : memref<128x512xf32, #tpu.memory_space<vmem>>, vector<128x512xf32>
    %cst_85 = arith.constant dense<0.000000e+00> : vector<32x512xf32>
    %136 = tpu.matmul %134, %135, %cst_85 {dimension_numbers = #tpu.dot_dimension_numbers<[1], [0], [0], [1], [0, 0, 1, 1], [], []>} : vector<32x128xf32>, vector<128x512xf32>, vector<32x512xf32> -> vector<32x512xf32>
    %c0_86 = arith.constant 0 : index
    %c0_87 = arith.constant 0 : index
    %137 = vector.load %arg7[%c0_86, %c0_87] : memref<1x512xf32, #tpu.memory_space<vmem>>, vector<1x512xf32>
    %138 = vector.broadcast %137 : vector<1x512xf32> to vector<32x512xf32>
    %139 = arith.addf %136, %138 : vector<32x512xf32>
    %cst_88 = arith.constant 0.000000e+00 : f32
    %140 = vector.broadcast %cst_88 : f32 to vector<32x512xf32>
    %141 = arith.maximumf %139, %140 : vector<32x512xf32>
    %c0_89 = arith.constant 0 : index
    %c0_90 = arith.constant 0 : index
    %142 = vector.load %arg5[%c0_89, %c0_90] : memref<512x128xf32, #tpu.memory_space<vmem>>, vector<512x128xf32>
    %cst_91 = arith.constant dense<0.000000e+00> : vector<32x128xf32>
    %143 = tpu.matmul %141, %142, %cst_91 {dimension_numbers = #tpu.dot_dimension_numbers<[1], [0], [0], [1], [0, 0, 1, 1], [], []>} : vector<32x512xf32>, vector<512x128xf32>, vector<32x128xf32> -> vector<32x128xf32>
    %c3_92 = arith.constant 3 : index
    %c0_93 = arith.constant 0 : index
    %144 = vector.load %arg6[%c3_92, %c0_93] : memref<6x128xf32, #tpu.memory_space<vmem>>, vector<1x128xf32>
    %145 = vector.broadcast %144 : vector<1x128xf32> to vector<32x128xf32>
    %146 = arith.addf %143, %145 : vector<32x128xf32>
    %147 = arith.addf %146, %134 : vector<32x128xf32>
    %cst_94 = arith.constant dense<0.000000e+00> : vector<32xf32>
    %148 = vector.multi_reduction <add>, %147, %cst_94 [1] : vector<32x128xf32> to vector<32xf32>
    %149 = vector.shape_cast %148 : vector<32xf32> to vector<32x1xf32>
    %cst_95 = arith.constant 1.280000e+02 : f32
    %150 = vector.broadcast %cst_95 : f32 to vector<32x1xf32>
    %151 = arith.divf %149, %150 : vector<32x1xf32>
    %152 = vector.broadcast %151 : vector<32x1xf32> to vector<32x128xf32>
    %153 = arith.subf %147, %152 : vector<32x128xf32>
    %154 = arith.mulf %153, %153 : vector<32x128xf32>
    %cst_96 = arith.constant dense<0.000000e+00> : vector<32xf32>
    %155 = vector.multi_reduction <add>, %154, %cst_96 [1] : vector<32x128xf32> to vector<32xf32>
    %156 = vector.shape_cast %155 : vector<32xf32> to vector<32x1xf32>
    %cst_97 = arith.constant 1.280000e+02 : f32
    %157 = vector.broadcast %cst_97 : f32 to vector<32x1xf32>
    %158 = arith.divf %156, %157 : vector<32x1xf32>
    %159 = vector.broadcast %151 : vector<32x1xf32> to vector<32x128xf32>
    %160 = arith.subf %147, %159 : vector<32x128xf32>
    %cst_98 = arith.constant 9.99999974E-6 : f32
    %161 = vector.broadcast %cst_98 : f32 to vector<32x1xf32>
    %162 = arith.addf %158, %161 : vector<32x1xf32>
    %163 = math.rsqrt %162 : vector<32x1xf32>
    %164 = vector.broadcast %163 : vector<32x1xf32> to vector<32x128xf32>
    %165 = arith.mulf %160, %164 : vector<32x128xf32>
    %c4_99 = arith.constant 4 : index
    %c0_100 = arith.constant 0 : index
    %166 = vector.load %arg6[%c4_99, %c0_100] : memref<6x128xf32, #tpu.memory_space<vmem>>, vector<1x128xf32>
    %167 = vector.broadcast %166 : vector<1x128xf32> to vector<32x128xf32>
    %168 = arith.mulf %165, %167 : vector<32x128xf32>
    %c5_101 = arith.constant 5 : index
    %c0_102 = arith.constant 0 : index
    %169 = vector.load %arg6[%c5_101, %c0_102] : memref<6x128xf32, #tpu.memory_space<vmem>>, vector<1x128xf32>
    %170 = vector.broadcast %169 : vector<1x128xf32> to vector<32x128xf32>
    %171 = arith.addf %168, %170 : vector<32x128xf32>
    %c0_103 = arith.constant 0 : index
    %c0_104 = arith.constant 0 : index
    %172 = vector.load %arg9[%c0_103, %c0_104] : memref<32x128xf32, #tpu.memory_space<vmem>>, vector<32x128xf32>
    tpu.vector_store %arg9[%c0_103, %c0_104], %171 {strides = array<i32>} : memref<32x128xf32, #tpu.memory_space<vmem>>, vector<32x128xf32>,
    return
  }
  func.func @transform_0(%arg0: i32) -> (i32, i32) {
    %c0_i32 = arith.constant 0 : i32
    %c0_i32_0 = arith.constant 0 : i32
    return %arg0, %c0_i32 : i32, i32
  }
  func.func @transform_1(%arg0: i32) -> (i32, i32, i32) {
    %c0_i32 = arith.constant 0 : i32
    %c0_i32_0 = arith.constant 0 : i32
    %c0_i32_1 = arith.constant 0 : i32
    %c0_i32_2 = arith.constant 0 : i32
    return %c0_i32, %c0_i32_0, %c0_i32_1 : i32, i32, i32
  }
  func.func @transform_2(%arg0: i32) -> (i32, i32, i32) {
    %c0_i32 = arith.constant 0 : i32
    %c0_i32_0 = arith.constant 0 : i32
    %c0_i32_1 = arith.constant 0 : i32
    %c0_i32_2 = arith.constant 0 : i32
    return %c0_i32, %c0_i32_0, %c0_i32_1 : i32, i32, i32
  }
  func.func @transform_3(%arg0: i32) -> (i32, i32) {
    %c0_i32 = arith.constant 0 : i32
    %c0_i32_0 = arith.constant 0 : i32
    %c0_i32_1 = arith.constant 0 : i32
    return %c0_i32, %c0_i32_0 : i32, i32
  }
  func.func @transform_4(%arg0: i32) -> (i32, i32) {
    %c0_i32 = arith.constant 0 : i32
    %c0_i32_0 = arith.constant 0 : i32
    %c0_i32_1 = arith.constant 0 : i32
    return %c0_i32, %c0_i32_0 : i32, i32
  }
  func.func @transform_5(%arg0: i32) -> (i32, i32) {
    %c0_i32 = arith.constant 0 : i32
    %c0_i32_0 = arith.constant 0 : i32
    %c0_i32_1 = arith.constant 0 : i32
    return %c0_i32, %c0_i32_0 : i32, i32
  }
  func.func @transform_6(%arg0: i32) -> (i32, i32) {
    %c0_i32 = arith.constant 0 : i32
    %c0_i32_0 = arith.constant 0 : i32
    %c0_i32_1 = arith.constant 0 : i32
    return %c0_i32, %c0_i32_0 : i32, i32
  }
  func.func @transform_7(%arg0: i32) -> (i32, i32) {
    %c0_i32 = arith.constant 0 : i32
    %c0_i32_0 = arith.constant 0 : i32
    %c0_i32_1 = arith.constant 0 : i32
    return %c0_i32, %c0_i32_0 : i32, i32
  }
  func.func @transform_8(%arg0: i32) -> (i32, i32) {
    %c0_i32 = arith.constant 0 : i32
    %c0_i32_0 = arith.constant 0 : i32
    return %arg0, %c0_i32 : i32, i32
  }
}

</mosaic_0001>

<bundles_post_ra>
// kernel: tpu_custom_call.1
= control target key start
LH: loop header
LB: loop body
LE: loop exit
PB: predicated region body
PF: predicated region fallthrough
CT: control target
= control target key end

     0   :  { %13 = vsyncpa [#allocation3], 0  ;;  %s6051_s0 = inlined_call_operand.hbm [shape: f32[32,128], index: 0, kind: input, shape index: {}]   ;;  %s6052_s1 = inlined_call_operand.hbm [shape: f32[12,128,32], index: 1, kind: input, shape index: {}]   ;;  %s6053_s2 = inlined_call_operand.hbm [shape: f32[4,32,128], index: 2, kind: input, shape index: {}]   ;;  %s6054_s3 = inlined_call_operand.hbm [shape: f32[128,512], index: 3, kind: input, shape index: {}]   ;;  %s6055_s4 = inlined_call_operand.hbm [shape: f32[512,128], index: 4, kind: input, shape index: {}]   ;;  %s6056_s5 = inlined_call_operand.hbm [shape: f32[6,128], index: 5, kind: input, shape index: {}]   ;;  %s6057_s6 = inlined_call_operand.hbm [shape: f32[1,512], index: 6, kind: input, shape index: {}]   ;;  %s6058_s7 = inlined_call_operand.hbm [shape: f32[32,32], index: 7, kind: input, shape index: {}]   ;;  %s6059_s8 = inlined_call_operand.hbm [shape: f32[32,128], index: 8, kind: output, shape index: {}]  }
   0x1   :  { %14 = vsyncpa [#allocation6], 0 }
   0x2   :  { %15 = vsyncpa [#allocation9], 0 }
   0x3   :  { %16 = vsyncpa [#allocation12], 0 }
   0x4   :  { %17 = vsyncpa [#allocation15], 0 }
   0x5   :  { %18 = vsyncpa [#allocation4], 0  ;;  %s5534_s27 = smov [#allocation5]   ;;  %s5535_s29 = smov [#allocation8]  }
   0x6   :  { %s36_s28 = sshll.u32 %s5534_s27, 4  ;;  %s60_s30 = sshll.u32 %s5535_s29, 4  ;;  %s37_s28 = int_to_ptr.vmem [resolvable:$true] %s36_s28  ;;  %s5593_s30 = int_to_ptr.vmem [resolvable:$true] %s60_s30 }
   0x7   :  { %s5324_s11 = scalar_lea.hbm %s6052_s1, 24576 }
   0x8   :  { %p5325_p0 = scmp.ne.s32.totalorder %s6052_s1, %s5324_s11  ;;  %p5328_p1 = scmp.lt.u32.totalorder %s5324_s11, %s6052_s1 }
   0xa   :  { %p5330_p2 = pnand %p5328_p1, %p5325_p0 }
   0xc   :  { %5333 = shalt.err (!%p5330_p2)
}
   0xd   :  { %s5334_s16 = scalar_lea.vmem %s37_s28, 24576  ;;  %p5339_p4 = scmp.lt.s32.totalorder %s37_s28, %s37_s28 }
   0xe   :  { %p5335_p3 = scmp.ne.s32.totalorder %s37_s28, %s5334_s16  ;;  %p5340_p5 = scmp.lt.s32.totalorder %s5334_s16, %s5334_s16 }
  0x10   :  { %p5341_p6 = por %p5340_p5, %p5339_p4 }
  0x12   :  { %p5342_p7 = pnand %p5341_p6, %p5335_p3 }
  0x14   :  { %5345 = shalt.err (!%p5342_p7)
}
  0x15   :  { %s5536_s17 = smov 128   ;;  %s5537_s18 = smov 8  }
  0x16   :  { %42 = dma.hbm_to_vmem [thread:$0]  %s6052_s1, 24576, %s37_s28, [#allocation6], %s5536_s17, %s5536_s17, %s5537_s18  }
  0x17   :  { %s5346_s23 = scalar_lea.hbm %s6054_s3, 8192 }
  0x18   :  { %p5347_p8 = scmp.ne.s32.totalorder %s6054_s3, %s5346_s23  ;;  %p5350_p9 = scmp.lt.u32.totalorder %s5346_s23, %s6054_s3 }
  0x1a   :  { %p5352_p10 = pnand %p5350_p9, %p5347_p8 }
  0x1c   :  { %5355 = shalt.err (!%p5352_p10)
}
  0x1d   :  { %s5356_s29 = scalar_lea.vmem %s5593_s30, 8192  ;;  %p5361_p12 = scmp.lt.s32.totalorder %s5593_s30, %s5593_s30 }
  0x1e   :  { %p5357_p11 = scmp.ne.s32.totalorder %s5593_s30, %s5356_s29  ;;  %p5362_p13 = scmp.lt.s32.totalorder %s5356_s29, %s5356_s29 }
  0x20   :  { %p5363_p0 = por %p5362_p13, %p5361_p12 }
  0x22   :  { %p5364_p1 = pnand %p5363_p0, %p5357_p11 }
  0x24   :  { %5367 = shalt.err (!%p5364_p1)
}
  0x25   :  { %s5538_s1 = smov 512   ;;  %s5539_s28 = smov 32  }
  0x26   :  { %66 = dma.hbm_to_vmem [thread:$0]  %s6054_s3, 8192, %s5593_s30, [#allocation9], %s5538_s1, %s5538_s1, %s5539_s28  }
  0x27   :  { %s5540_s11 = smov [#allocation11]   ;;  %s5541_s13 = smov [#allocation2]  }
  0x28   :  { %s85_s12 = sshll.u32 %s5540_s11, 4  ;;  %s24_s14 = sshll.u32 %s5541_s13, 4  ;;  %s86_s12 = int_to_ptr.vmem [resolvable:$true] %s85_s12  ;;  %s5627_s14 = int_to_ptr.vmem [resolvable:$true] %s24_s14 }
  0x29   :  { %s5368_s19 = scalar_lea.hbm %s6056_s5, 128 }
  0x2a   :  { %p5369_p2 = scmp.ne.s32.totalorder %s6056_s5, %s5368_s19  ;;  %p5372_p3 = scmp.lt.u32.totalorder %s5368_s19, %s6056_s5 }
  0x2c   :  { %p5374_p4 = pnand %p5372_p3, %p5369_p2 }
  0x2e   :  { %5377 = shalt.err (!%p5374_p4)
}
  0x2f   :  { %s5378_s3 = scalar_lea.vmem %s86_s12, 128  ;;  %p5383_p6 = scmp.lt.s32.totalorder %s86_s12, %s86_s12 }
  0x30   :  { %p5379_p5 = scmp.ne.s32.totalorder %s86_s12, %s5378_s3  ;;  %p5384_p7 = scmp.lt.s32.totalorder %s5378_s3, %s5378_s3 }
  0x32   :  { %p5385_p8 = por %p5384_p7, %p5383_p6 }
  0x34   :  { %p5386_p9 = pnand %p5385_p8, %p5379_p5 }
  0x36   :  { %5389 = shalt.err (!%p5386_p9)
}
  0x37   :  { %88 = dma.hbm_to_vmem [thread:$0]  %s6056_s5, 128, %s86_s12, [#allocation12]  }
  0x38   :  { %s5390_s27 = scalar_lea.hbm %s6051_s0, 512 }
  0x39   :  { %p5391_p10 = scmp.ne.s32.totalorder %s6051_s0, %s5390_s27  ;;  %p5394_p11 = scmp.lt.u32.totalorder %s5390_s27, %s6051_s0 }
  0x3b   :  { %p5396_p12 = pnand %p5394_p11, %p5391_p10 }
  0x3d   :  { %5399 = shalt.err (!%p5396_p12)
}
  0x3e   :  { %s5400_s10 = scalar_lea.vmem %s5627_s14, 512  ;;  %p5405_p0 = scmp.lt.s32.totalorder %s5627_s14, %s5627_s14 }
  0x3f   :  { %p5401_p13 = scmp.ne.s32.totalorder %s5627_s14, %s5400_s10  ;;  %p5406_p1 = scmp.lt.s32.totalorder %s5400_s10, %s5400_s10 }
  0x41   :  { %p5407_p2 = por %p5406_p1, %p5405_p0 }
  0x43   :  { %p5408_p3 = pnand %p5407_p2, %p5401_p13 }
  0x45   :  { %5411 = shalt.err (!%p5408_p3)
}
  0x46   :  { %30 = dma.hbm_to_vmem [thread:$0]  %s6051_s0, 512, %s5627_s14, [#allocation3], %s5536_s17, %s5536_s17, %s5537_s18  }
  0x47   :  { %s5542_s12 = smov [#allocation7]   ;;  %s5543_s15 = smov [#allocation10]  }
  0x48   :  { %s48_s13 = sshll.u32 %s5542_s12, 4  ;;  %s72_s16 = sshll.u32 %s5543_s15, 4  ;;  %s49_s13 = int_to_ptr.vmem [resolvable:$true] %s48_s13  ;;  %s5661_s16 = int_to_ptr.vmem [resolvable:$true] %s72_s16 }
  0x49   :  { %s5412_s21 = scalar_lea.hbm %s6053_s2, 2048 }
  0x4a   :  { %p5413_p4 = scmp.ne.s32.totalorder %s6053_s2, %s5412_s21  ;;  %p5416_p5 = scmp.lt.u32.totalorder %s5412_s21, %s6053_s2 }
  0x4c   :  { %p5418_p6 = pnand %p5416_p5, %p5413_p4 }
  0x4e   :  { %5421 = shalt.err (!%p5418_p6)
}
  0x4f   :  { %s5422_s0 = scalar_lea.vmem %s49_s13, 2048  ;;  %p5427_p8 = scmp.lt.s32.totalorder %s49_s13, %s49_s13 }
  0x50   :  { %p5423_p7 = scmp.ne.s32.totalorder %s49_s13, %s5422_s0  ;;  %p5428_p9 = scmp.lt.s32.totalorder %s5422_s0, %s5422_s0 }
  0x52   :  { %p5429_p10 = por %p5428_p9, %p5427_p8 }
  0x54   :  { %p5430_p11 = pnand %p5429_p10, %p5423_p7 }
  0x56   :  { %5433 = shalt.err (!%p5430_p11)
}
  0x57   :  { %54 = dma.hbm_to_vmem [thread:$0]  %s6053_s2, 2048, %s49_s13, [#allocation6], %s5536_s17, %s5536_s17, %s5537_s18  }
  0x58   :  { %s5434_s27 = scalar_lea.hbm %s6055_s4, 8192 }
  0x59   :  { %p5435_p12 = scmp.ne.s32.totalorder %s6055_s4, %s5434_s27  ;;  %p5438_p13 = scmp.lt.u32.totalorder %s5434_s27, %s6055_s4 }
  0x5b   :  { %p5440_p0 = pnand %p5438_p13, %p5435_p12 }
  0x5d   :  { %5443 = shalt.err (!%p5440_p0)
}
  0x5e   :  { %s5444_s10 = scalar_lea.vmem %s5661_s16, 8192  ;;  %p5449_p2 = scmp.lt.s32.totalorder %s5661_s16, %s5661_s16 }
  0x5f   :  { %p5445_p1 = scmp.ne.s32.totalorder %s5661_s16, %s5444_s10  ;;  %p5450_p3 = scmp.lt.s32.totalorder %s5444_s10, %s5444_s10 }
  0x61   :  { %p5451_p4 = por %p5450_p3, %p5449_p2 }
  0x63   :  { %p5452_p5 = pnand %p5451_p4, %p5445_p1 }
  0x65   :  { %5455 = shalt.err (!%p5452_p5)
}
  0x66   :  { %78 = dma.hbm_to_vmem [thread:$0]  %s6055_s4, 8192, %s5661_s16, [#allocation9], %s5536_s17, %s5536_s17, %s5537_s18  }
  0x67   :  { %s5544_s11 = smov [#allocation13]   ;;  %s5545_s13 = smov [#allocation14]  }
  0x68   :  { %s95_s12 = sshll.u32 %s5544_s11, 4  ;;  %s104_s15 = sshll.u32 %s5545_s13, 4  ;;  %s96_s12 = int_to_ptr.vmem [resolvable:$true] %s95_s12  ;;  %s5698_s15 = int_to_ptr.vmem [resolvable:$true] %s104_s15 }
  0x69   :  { %s5456_s21 = scalar_lea.hbm %s6057_s6, 64 }
  0x6a   :  { %p5457_p6 = scmp.ne.s32.totalorder %s6057_s6, %s5456_s21  ;;  %p5460_p7 = scmp.lt.u32.totalorder %s5456_s21, %s6057_s6 }
  0x6c   :  { %p5462_p8 = pnand %p5460_p7, %p5457_p6 }
  0x6e   :  { %5465 = shalt.err (!%p5462_p8)
}
  0x6f   :  { %s5466_s4 = scalar_lea.vmem %s96_s12, 64  ;;  %p5471_p10 = scmp.lt.s32.totalorder %s96_s12, %s96_s12 }
  0x70   :  { %p5467_p9 = scmp.ne.s32.totalorder %s96_s12, %s5466_s4  ;;  %p5472_p11 = scmp.lt.s32.totalorder %s5466_s4, %s5466_s4 }
  0x72   :  { %p5473_p12 = por %p5472_p11, %p5471_p10 }
  0x74   :  { %p5474_p13 = pnand %p5473_p12, %p5467_p9 }
  0x76   :  { %5477 = shalt.err (!%p5474_p13)
}
  0x77   :  { %98 = dma.hbm_to_vmem [thread:$0]  %s6057_s6, 64, %s96_s12, [#allocation12]  }
  0x78   :  { %s5478_s25 = scalar_lea.hbm %s6058_s7, 512 }
  0x79   :  { %p5479_p0 = scmp.ne.s32.totalorder %s6058_s7, %s5478_s25  ;;  %p5482_p1 = scmp.lt.u32.totalorder %s5478_s25, %s6058_s7 }
  0x7b   :  { %p5484_p2 = pnand %p5482_p1, %p5479_p0 }
  0x7d   :  { %5487 = shalt.err (!%p5484_p2)
}
  0x7e   :  { %s5488_s28 = scalar_lea.vmem %s5698_s15, 512  ;;  %p5493_p4 = scmp.lt.s32.totalorder %s5698_s15, %s5698_s15 }
  0x7f   :  { %p5489_p3 = scmp.ne.s32.totalorder %s5698_s15, %s5488_s28  ;;  %p5494_p5 = scmp.lt.s32.totalorder %s5488_s28, %s5488_s28 }
  0x81   :  { %p5495_p6 = por %p5494_p5, %p5493_p4 }
  0x83   :  { %p5496_p7 = pnand %p5495_p6, %p5489_p3 }
  0x85   :  { %5499 = shalt.err (!%p5496_p7)
}
  0x86   :  { %110 = dma.hbm_to_vmem [thread:$0]  %s6058_s7, 512, %s5698_s15, [#allocation15], %s5536_s17, %s5536_s17, %s5537_s18  }
  0x87   :  { %5522 = dma.done.wait [#allocation3], 512  }
  0x88   :  { %5523 = vsyncadd [#allocation3], 4294966784 }
  0x89   :  { %5524 = dma.done.wait [#allocation6], 26624  }
  0x8a   :  { %5525 = vsyncadd [#allocation6], 4294940672 }
  0x8b   :  { %5526 = dma.done.wait [#allocation9], 16384  }
  0x8c   :  { %5527 = vsyncadd [#allocation9], 4294950912 }
  0x8d   :  { %5528 = dma.done.wait [#allocation12], 192  }
  0x8e   :  { %5529 = vsyncadd [#allocation12], 4294967104 }
  0x8f   :  { %5530 = dma.done.wait [#allocation15], 512  }
  0x90   :  { %5531 = vsyncadd [#allocation15], 4294966784  ;;  %v245_v0 = vld [vmem:[#allocation5 + $0x80] sm:$0xff]  ;;  %v246_v1 = vld [vmem:[#allocation5 + $0x88] sm:$0xff]  ;;  %vm448_vm0 = vcmask 261120   ;;  %s5547_s7 = smov [#allocation16]  }
  0x91   :  { %v247_v2 = vld [vmem:[#allocation5 + $0x90] sm:$0xff]  ;;  %v4618_v3 = vpack.c.bf16 %v246_v1, %v245_v0  ;;  %v248_v4 = vld [vmem:[#allocation5 + $0x98] sm:$0xff]  ;;  %v249_v6 = vld [vmem:[#allocation5 + $0xa0] sm:$0xff]  ;;  %s3452_s10 = sshll.u32 %s5547_s7, 4  ;;  %s3453_s10 = int_to_ptr.vmem [resolvable:$true] %s3452_s10 }
  0x92   :  { %v4622_v5 = vpack.c.bf16 %v248_v4, %v247_v2  ;;  %v250_v7 = vld [vmem:[#allocation5 + $0xa8] sm:$0xff]  ;;  %v143_v8 = vld [vmem:[#allocation5] sm:$0xff]  ;;  %v145_v11 = vld [vmem:[#allocation5 + $0x10] sm:$0xff]  ;;  %s5500_s2 = scalar_lea.vmem %s3453_s10, 512  ;;  %p5505_p9 = scmp.lt.s32.totalorder %s3453_s10, %s3453_s10 }
  0x93   :  { %4619 = vmatprep.subr.bf16.mxu1 %v4618_v3  ;;  %v144_v9 = vld [vmem:[#allocation5 + $0x8] sm:$0xff]  ;;  %v146_v12 = vld [vmem:[#allocation5 + $0x18] sm:$0xff]  ;;  %v4626_v13 = vpack.c.bf16 %v250_v7, %v249_v6  ;;  %v147_v15 = vld [vmem:[#allocation5 + $0x20] sm:$0xff]  ;;  %p5501_p8 = scmp.ne.s32.totalorder %s3453_s10, %s5500_s2  ;;  %p5506_p10 = scmp.lt.s32.totalorder %s5500_s2, %s5500_s2 }
  0x94   :  { %4621 = vmatpush3.bf16.msra.mxu1 %v4618_v3  ;;  %v4586_v10 = vpack.c.bf16 %v144_v9, %v143_v8  ;;  %v4590_v14 = vpack.c.bf16 %v146_v12, %v145_v11  ;;  %v148_v16 = vld [vmem:[#allocation5 + $0x28] sm:$0xff]  ;;  %v251_v17 = vld [vmem:[#allocation5 + $0xb0] sm:$0xff]  ;;  %v252_v18 = vld [vmem:[#allocation5 + $0xb8] sm:$0xff] }
  0x95   :  { %4623 = vmatprep.subr.bf16.mxu1 %v4622_v5  ;;  %v4594_v19 = vpack.c.bf16 %v148_v16, %v147_v15  ;;  %v5732_v20 = vld [vmem:[#allocation2] sm:$0xff]  ;;  %v4630_v21 = vpack.c.bf16 %v252_v18, %v251_v17  ;;  %v149_v22 = vld [vmem:[#allocation5 + $0x30] sm:$0xff]  ;;  %v150_v23 = vld [vmem:[#allocation5 + $0x38] sm:$0xff]  ;;  %p5507_p11 = por %p5506_p10, %p5505_p9 }
  0x96   :  { %4587 = vmatprep.subr.bf16.mxu0 %v4586_v10  ;;  %4032 = vmatprep.mubr.f32.mxu1 %v5732_v20  ;;  %v253_v24 = vld [vmem:[#allocation5 + $0xc0] sm:$0xff]  ;;  %v254_v25 = vld [vmem:[#allocation5 + $0xc8] sm:$0xff]  ;;  %v4598_v26 = vpack.c.bf16 %v150_v23, %v149_v22  ;;  %v255_v30 = vld [vmem:[#allocation5 + $0xd0] sm:$0xff] }
  0x97   :  { %4589 = vmatpush3.bf16.msra.mxu0 %v4586_v10  ;;  %3994 = vmatprep.mubr.f32.mxu0 %v5732_v20  ;;  %v4634_v27 = vpack.c.bf16 %v254_v25, %v253_v24  ;;  %v151_v28 = vld [vmem:[#allocation5 + $0x40] sm:$0xff]  ;;  %v152_v29 = vld [vmem:[#allocation5 + $0x48] sm:$0xff]  ;;  %v256_v31 = vld [vmem:[#allocation5 + $0xd8] sm:$0xff]  ;;  %p5508_p12 = pnand %p5507_p11, %p5501_p8 }
  0x98   :  { %4625 = vmatpush3.bf16.msra.mxu1 %v4622_v5  ;;  %4591 = vmatprep.subr.bf16.mxu0 %v4590_v14  ;;  %v4602_v32 = vpack.c.bf16 %v152_v29, %v151_v28  ;;  %v4638_v33 = vpack.c.bf16 %v256_v31, %v255_v30  ;;  %v153_v34 = vld [vmem:[#allocation5 + $0x50] sm:$0xff]  ;;  %v154_v35 = vld [vmem:[#allocation5 + $0x58] sm:$0xff]  ;;  %v257_v36 = vld [vmem:[#allocation5 + $0xe0] sm:$0xff] }
  0x99   :  { %4627 = vmatprep.subr.bf16.mxu1 %v4626_v13  ;;  %v258_v37 = vld [vmem:[#allocation5 + $0xe8] sm:$0xff]  ;;  %v4606_v38 = vpack.c.bf16 %v154_v35, %v153_v34  ;;  %v155_v40 = vld [vmem:[#allocation5 + $0x60] sm:$0xff]  ;;  %v259_v42 = vld [vmem:[#allocation5 + $0xf0] sm:$0xff] }
  0x9a   :  { %v4642_v39 = vpack.c.bf16 %v258_v37, %v257_v36  ;;  %v156_v41 = vld [vmem:[#allocation5 + $0x68] sm:$0xff]  ;;  %v260_v43 = vld [vmem:[#allocation5 + $0xf8] sm:$0xff]  ;;  %v157_v46 = vld [vmem:[#allocation5 + $0x70] sm:$0xff] }
  0x9b   :  { %4593 = vmatpush3.bf16.msra.mxu0 %v4590_v14  ;;  %v4610_v44 = vpack.c.bf16 %v156_v41, %v155_v40  ;;  %v4646_v45 = vpack.c.bf16 %v260_v43, %v259_v42  ;;  %v158_v47 = vld [vmem:[#allocation5 + $0x78] sm:$0xff]  ;;  %v5736_v49 = vld [vmem:[#allocation2 + $0x8] sm:$0xff]  ;;  %v5738_v50 = vld [vmem:[#allocation2 + $0x10] sm:$0xff] }
  0x9c   :  { %4629 = vmatpush3.bf16.msra.mxu1 %v4626_v13  ;;  %4595 = vmatprep.subr.bf16.mxu0 %v4594_v19  ;;  %v4614_v48 = vpack.c.bf16 %v158_v47, %v157_v46  ;;  %v5742_v51 = vld [vmem:[#allocation2 + $0x18] sm:$0xff]  ;;  %vm5751_vm1 = vmpackc.low %vm448_vm0, %vm448_vm0  ;;  %v347_v63 = vld [vmem:[#allocation5 + $0x100] sm:$0xff] }
  0x9d   :  { %4631 = vmatprep.subr.bf16.mxu1 %v4630_v21  ;;  %v348_v0 = vld [vmem:[#allocation5 + $0x108] sm:$0xff]  ;;  %v349_v1 = vld [vmem:[#allocation5 + $0x110] sm:$0xff]  ;;  %v350_v3 = vld [vmem:[#allocation5 + $0x118] sm:$0xff] }
  0x9e   :  { %v4650_v2 = vpack.c.bf16 %v348_v0, %v347_v63  ;;  %v4654_v4 = vpack.c.bf16 %v350_v3, %v349_v1  ;;  %v351_v5 = vld [vmem:[#allocation5 + $0x120] sm:$0xff]  ;;  %v352_v6 = vld [vmem:[#allocation5 + $0x128] sm:$0xff]  ;;  %v353_v8 = vld [vmem:[#allocation5 + $0x130] sm:$0xff] }
  0x9f   :  { %4597 = vmatpush3.bf16.msra.mxu0 %v4594_v19  ;;  %v4658_v7 = vpack.c.bf16 %v352_v6, %v351_v5  ;;  %v354_v9 = vld [vmem:[#allocation5 + $0x138] sm:$0xff]  ;;  %v355_v11 = vld [vmem:[#allocation5 + $0x140] sm:$0xff]  ;;  %v356_v12 = vld [vmem:[#allocation5 + $0x148] sm:$0xff] }
  0xa0   :  { %4633 = vmatpush3.bf16.msra.mxu1 %v4630_v21  ;;  %4599 = vmatprep.subr.bf16.mxu0 %v4598_v26  ;;  %v4662_v10 = vpack.c.bf16 %v354_v9, %v353_v8  ;;  %v4666_v13 = vpack.c.bf16 %v356_v12, %v355_v11  ;;  %v357_v14 = vld [vmem:[#allocation5 + $0x150] sm:$0xff]  ;;  %v358_v15 = vld [vmem:[#allocation5 + $0x158] sm:$0xff]  ;;  %v359_v17 = vld [vmem:[#allocation5 + $0x160] sm:$0xff] }
  0xa1   :  { %4635 = vmatprep.subr.bf16.mxu1 %v4634_v27  ;;  %v4670_v16 = vpack.c.bf16 %v358_v15, %v357_v14  ;;  %v360_v18 = vld [vmem:[#allocation5 + $0x168] sm:$0xff]  ;;  %v361_v21 = vld [vmem:[#allocation5 + $0x170] sm:$0xff]  ;;  %v362_v22 = vld [vmem:[#allocation5 + $0x178] sm:$0xff] }
  0xa2   :  { %v4674_v19 = vpack.c.bf16 %v360_v18, %v359_v17  ;;  %v4678_v23 = vpack.c.bf16 %v362_v22, %v361_v21  ;;  %v5771_v24 = vld [vmem:[#allocation14] sm:$0xff]  ;;  %v5776_v29 = vld [vmem:[#allocation14 + $0x18] sm:$0xff]  ;;  %v5778_v30 = vld [vmem:[#allocation14 + $0x10] sm:$0xff] }
  0xa3   :  { %4601 = vmatpush3.bf16.msra.mxu0 %v4598_v26  ;;  %v5773_v26 = vld [vmem:[#allocation14 + $0x8] sm:$0xff]  ;;  %v806_v40 = vld [vmem:[#allocation5 + $0x200] sm:$0xff]  ;;  %v807_v41 = vld [vmem:[#allocation5 + $0x208] sm:$0xff] }
  0xa4   :  { %4637 = vmatpush3.bf16.msra.mxu1 %v4634_v27  ;;  %4603 = vmatprep.subr.bf16.mxu0 %v4602_v32  ;;  %v4734_v42 = vpack.c.bf16 %v807_v41, %v806_v40  ;;  %v808_v3 = vld [vmem:[#allocation5 + $0x210] sm:$0xff]  ;;  %v811_v8 = vld [vmem:[#allocation5 + $0x228] sm:$0xff]  ;;  %v813_v14 = vld [vmem:[#allocation5 + $0x238] sm:$0xff] }
  0xa5   :  { %4639 = vmatprep.subr.bf16.mxu1 %v4638_v33  ;;  %v814_v18 = vld [vmem:[#allocation5 + $0x240] sm:$0xff]  ;;  %v2331_v54 = vld [vmem:[#allocation5 + $0x5b0] sm:$0xff] }
  0xa6   :  { %v704_v22 = vld [vmem:[#allocation5 + $0x180] sm:$0xff] }
  0xa7   :  { %4605 = vmatpush3.bf16.msra.mxu0 %v4602_v32 }
  0xa8   :  { %4641 = vmatpush3.bf16.msra.mxu1 %v4638_v33  ;;  %4607 = vmatprep.subr.bf16.mxu0 %v4606_v38 }
  0xa9   :  { %4643 = vmatprep.subr.bf16.mxu1 %v4642_v39 }
  0xab   :  { %4609 = vmatpush3.bf16.msra.mxu0 %v4606_v38 }
  0xac   :  { %4645 = vmatpush3.bf16.msra.mxu1 %v4642_v39  ;;  %4611 = vmatprep.subr.bf16.mxu0 %v4610_v44 }
  0xad   :  { %4647 = vmatprep.subr.bf16.mxu1 %v4646_v45 }
  0xaf   :  { %4613 = vmatpush3.bf16.msra.mxu0 %v4610_v44 }
  0xb0   :  { %4649 = vmatpush3.bf16.msra.mxu1 %v4646_v45  ;;  %4615 = vmatprep.subr.bf16.mxu0 %v4614_v48 }
  0xb3   :  { %4033 = vmatmul.mubr.f32.vlgmr.msra.gmra.mrb[0].mxu1 %v5736_v49  ;;  %4617 = vmatpush3.bf16.msra.mxu0 %v4614_v48 }
  0xb4   :  { %4035 = vmatprep.mubr.f32.mxu1 %v5738_v50  ;;  %4651 = vmatprep.subr.bf16.mxu0 %v4650_v2 }
  0xb6   :  { %3995 = vmatmul.mubr.f32.vlgmr.msra.gmra.mrb[0].mxu0 %v5736_v49 }
  0xb7   :  { %4036 = vmatmul.mubr.f32.gmra.mrb[2].mxu1 %v5742_v51  ;;  %3997 = vmatprep.mubr.f32.mxu0 %v5738_v50 }
  0xb8   :  { %4653 = vmatpush3.bf16.msra.mxu0 %v4650_v2 }
  0xb9   :  { %4655 = vmatprep.subr.bf16.mxu0 %v4654_v4 }
  0xba   :  { %3998 = vmatmul.mubr.f32.gmra.mrb[2].mxu0 %v5742_v51 }
  0xbb   :  { %4070 = vmatprep.mubr.f32.mxu0 %v5732_v20 }
  0xbc   :  { %4657 = vmatpush3.bf16.msra.mxu0 %v4654_v4  ;;  %v809_v4 = vld [vmem:[#allocation5 + $0x218] sm:$0xff] }
  0xbd   :  { %4659 = vmatprep.subr.bf16.mxu0 %v4658_v7  ;;  %v4738_v5 = vpack.c.bf16 %v809_v4, %v808_v3  ;;  %v714_v3 = vld [vmem:[#allocation5 + $0x1d0] sm:$0xff]  ;;  %v715_v4 = vld [vmem:[#allocation5 + $0x1d8] sm:$0xff] }
  0xc0   :  { %4661 = vmatpush3.bf16.msra.mxu0 %v4658_v7  ;;  %v810_v7 = vld [vmem:[#allocation5 + $0x220] sm:$0xff] }
  0xc1   :  { %4663 = vmatprep.subr.bf16.mxu0 %v4662_v10 }
  0xc4   :  { %4665 = vmatpush3.bf16.msra.mxu0 %v4662_v10  ;;  %v4742_v10 = vpack.c.bf16 %v811_v8, %v810_v7  ;;  %v718_v8 = vld [vmem:[#allocation5 + $0x1f0] sm:$0xff] }
  0xc5   :  { %4667 = vmatprep.subr.bf16.mxu0 %v4666_v13 }
  0xc8   :  { %4669 = vmatpush3.bf16.msra.mxu0 %v4666_v13  ;;  %v812_v13 = vld [vmem:[#allocation5 + $0x230] sm:$0xff] }
  0xc9   :  { %4671 = vmatprep.subr.bf16.mxu0 %v4670_v16 }
  0xcc   :  { %4673 = vmatpush3.bf16.msra.mxu0 %v4670_v16  ;;  %v4746_v16 = vpack.c.bf16 %v813_v14, %v812_v13 }
  0xcd   :  { %4675 = vmatprep.subr.bf16.mxu0 %v4674_v19 }
  0xd0   :  { %4677 = vmatpush3.bf16.msra.mxu0 %v4674_v19  ;;  %v815_v19 = vld [vmem:[#allocation5 + $0x248] sm:$0xff] }
  0xd1   :  { %4679 = vmatprep.subr.bf16.mxu0 %v4678_v23  ;;  %v4750_v21 = vpack.c.bf16 %v815_v19, %v814_v18 }
  0xd4   :  { %4681 = vmatpush3.bf16.msra.mxu0 %v4678_v23  ;;  %v705_v23 = vld [vmem:[#allocation5 + $0x188] sm:$0xff] }
  0xd5   :  { %4735 = vmatprep.subr.bf16.mxu0 %v4734_v42 }
  0xd7   :  { %4071 = vmatmul.mubr.f32.vlgmr.msra.gmra.mrb[4].mxu0 %v5736_v49 }
  0xd8   :  { %4073 = vmatprep.mubr.f32.mxu0 %v5738_v50  ;;  %4737 = vmatpush3.bf16.msra.mxu0 %v4734_v42 }
  0xd9   :  { %4739 = vmatprep.subr.bf16.mxu0 %v4738_v5 }
  0xdb   :  { %4074 = vmatmul.mubr.f32.gmra.mrb[6].mxu0 %v5742_v51 }
  0xdc   :  { %4174 = vmatprep.mubr.f32.mxu0 %v5732_v20  ;;  %4741 = vmatpush3.bf16.msra.mxu0 %v4738_v5  ;;  %v716_v5 = vld [vmem:[#allocation5 + $0x1e0] sm:$0xff] }
  0xdd   :  { %4743 = vmatprep.subr.bf16.mxu0 %v4742_v10 }
  0xe0   :  { %4745 = vmatpush3.bf16.msra.mxu0 %v4742_v10 }
  0xe1   :  { %4747 = vmatprep.subr.bf16.mxu0 %v4746_v16 }
  0xe4   :  { %4749 = vmatpush3.bf16.msra.mxu0 %v4746_v16 }
  0xe5   :  { %4751 = vmatprep.subr.bf16.mxu0 %v4750_v21 }
  0xe8   :  { %4753 = vmatpush3.bf16.msra.mxu0 %v4750_v21 }
 0x186   :  { %v4034_v52 = vpop.f32.mrb[0].mxu1 }
 0x187   :  { %v327_v53 = vpop.f32.mrb[1].mxu1 }
 0x188   :  { %v4682_v55 = vpack.c.bf16 %v4034_v52, %v327_v53 }
 0x189   :  { %v3996_v56 = vpop.f32.mrb[0].mxu0 }
 0x18a   :  { %4684 = vmatprep.subr.msk.bf16.mxu1 %vm5751_vm1, %v4682_v55  ;;  %v4037_v57 = vpop.f32.mrb[2].mxu1  ;;  %v225_v58 = vpop.f32.mrb[1].mxu0 }
 0x18b   :  { %4687 = vmatpush3.bf16.xpose.msk.msra.mxu1 %vm5751_vm1, %v4682_v55  ;;  %v337_v59 = vpop.f32.mrb[3].mxu1  ;;  %4084 = vmatprep.mubr.msk.f32.mxu1 %vm448_vm0, %v225_v58 }
 0x18c   :  { %v4688_v60 = vpack.c.bf16 %v4037_v57, %v337_v59 }
 0x18d   :  { %v3999_v61 = vpop.f32.mrb[2].mxu0 }
 0x18e   :  { %4690 = vmatprep.subr.msk.bf16.mxu1 %vm5751_vm1, %v4688_v60  ;;  %v235_v62 = vpop.f32.mrb[3].mxu0 }
 0x193   :  { %4693 = vmatpush3.bf16.xpose.msk.msra.mxu1 %vm5751_vm1, %v4688_v60 }
 0x19a   :  { %4085 = vmatmul.mubr.msk.f32.vlgmr.msra.gmra.mrb[4].mxu1 %vm448_vm0, %v3996_v56 }
 0x19b   :  { %4087 = vmatprep.mubr.msk.f32.mxu1 %vm448_vm0, %v235_v62 }
 0x19e   :  { %4088 = vmatmul.mubr.msk.f32.gmra.mrb[6].mxu1 %vm448_vm0, %v3999_v61 }
 0x1aa   :  { %v4072_v6 = vpop.f32.mrb[4].mxu0 }
 0x1ab   :  { %v429_v9 = vpop.f32.mrb[5].mxu0 }
 0x1ac   :  { %v4694_v11 = vpack.c.bf16 %v4072_v6, %v429_v9  ;;  %v717_v6 = vld [vmem:[#allocation5 + $0x1e8] sm:$0xff]  ;;  %v719_v9 = vld [vmem:[#allocation5 + $0x1f8] sm:$0xff] }
 0x1ad   :  { %v4726_v7 = vpack.c.bf16 %v717_v6, %v716_v5  ;;  %v4730_v10 = vpack.c.bf16 %v719_v9, %v718_v8 }
 0x1ae   :  { %v4075_v12 = vpop.f32.mrb[6].mxu0  ;;  %4695 = vmatprep.subr.bf16.mxu1 %v4694_v11 }
 0x1af   :  { %v439_v15 = vpop.f32.mrb[7].mxu0  ;;  %4697 = vmatpush3.bf16.msra.mxu1 %v4694_v11 }
 0x1b0   :  { %v4698_v17 = vpack.c.bf16 %v4075_v12, %v439_v15 }
 0x1b2   :  { %4699 = vmatprep.subr.bf16.mxu1 %v4698_v17 }
 0x1b3   :  { %4701 = vmatpush3.bf16.msra.mxu1 %v4698_v17 }
 0x26d   :  { %v4086_v25 = vpop.f32.mrb[4].mxu1 }
 0x26e   :  { %v539_v27 = vpop.f32.mrb[5].mxu1  ;;  %v545_v31 = vadd.f32 %v4086_v25, %v5773_v26  ;;  %v4702_v25 = vpack.c.bf16 %v705_v23, %v704_v22 }
 0x26f   :  { %v540_v28 = vadd.f32 %v539_v27, %v5771_v24  ;;  %v816_v27 = vld [vmem:[#allocation5 + $0x250] sm:$0xff] }
 0x270   :  { %v561_v37 = vsel %vm448_vm0, %v545_v31, -inf  ;;  %4703 = vmatprep.subr.bf16.mxu1 %v4702_v25 }
 0x271   :  { %v4089_v32 = vpop.f32.mrb[6].mxu1  ;;  %v558_v33 = vsel %vm448_vm0, %v540_v28, -inf }
 0x272   :  { %559 = vmax.xlane.f32.xlu0 %v558_v33  ;;  %v549_v34 = vpop.f32.mrb[7].mxu1  ;;  %v555_v35 = vadd.f32 %v4089_v32, %v5776_v29  ;;  %v818_v32 = vld [vmem:[#allocation5 + $0x260] sm:$0xff]  ;;  %v819_v33 = vld [vmem:[#allocation5 + $0x268] sm:$0xff] }
 0x273   :  { %v550_v36 = vadd.f32 %v549_v34, %v5778_v30  ;;  %v4758_v34 = vpack.c.bf16 %v819_v33, %v818_v32  ;;  %v910_v32 = vld [vmem:[#allocation5 + $0x290] sm:$0xff] }
 0x274   :  { %v567_v39 = vsel %vm448_vm0, %v555_v35, -inf }
 0x275   :  { %v564_v38 = vsel %vm448_vm0, %v550_v36, -inf }
 0x276   :  { %562 = vmax.xlane.f32.xlu0 %v561_v37  ;;  %565 = vmax.xlane.f32.xlu1 %v564_v38 }
 0x27a   :  { %568 = vmax.xlane.f32.xlu1 %v567_v39 }
 0x2ff   :  { %v560_v43 = vpop.xlane.xlu0 %559 }
 0x300   :  { %v570_v44 = vsub.f32 %v540_v28, %v560_v43  ;;  %v817_v28 = vld [vmem:[#allocation5 + $0x258] sm:$0xff] }
 0x302   :  { %v574_v45 = vmul.f32 1.442695, %v570_v44  ;;  %v706_v44 = vld [vmem:[#allocation5 + $0x190] sm:$0xff] }
 0x303   :  { %v563_v46 = vpop.xlane.xlu0 %562  ;;  %v566_v47 = vpop.xlane.xlu1 %565 }
 0x304   :  { %5236 = vpow2.f32 %v574_v45  ;;  %v571_v48 = vsub.f32 %v545_v31, %v563_v46  ;;  %v572_v52 = vsub.f32 %v550_v36, %v566_v47  ;;  %v4754_v31 = vpack.c.bf16 %v817_v28, %v816_v27  ;;  %v821_v36 = vld [vmem:[#allocation5 + $0x278] sm:$0xff]  ;;  %v908_v28 = vld [vmem:[#allocation5 + $0x280] sm:$0xff] }
 0x305   :  { %v707_v45 = vld [vmem:[#allocation5 + $0x198] sm:$0xff] }
 0x306   :  { %v576_v53 = vmul.f32 1.442695, %v571_v48  ;;  %v578_v55 = vmul.f32 1.442695, %v572_v52  ;;  %4755 = vmatprep.subr.bf16.mxu0 %v4754_v31  ;;  %v4706_v52 = vpack.c.bf16 %v707_v45, %v706_v44  ;;  %v918_v45 = vld [vmem:[#allocation5 + $0x2d0] sm:$0xff] }
 0x307   :  { %v569_v56 = vpop.xlane.xlu1 %568  ;;  %4757 = vmatpush3.bf16.msra.mxu0 %v4754_v31  ;;  %v909_v31 = vld [vmem:[#allocation5 + $0x288] sm:$0xff] }
 0x308   :  { %5238 = vpow2.f32 %v576_v53  ;;  %v573_v57 = vsub.f32 %v555_v35, %v569_v56  ;;  %4759 = vmatprep.subr.bf16.mxu0 %v4758_v34  ;;  %v820_v35 = vld [vmem:[#allocation5 + $0x270] sm:$0xff]  ;;  %v709_v56 = vld [vmem:[#allocation5 + $0x1a8] sm:$0xff]  ;;  %v4766_v33 = vpack.c.bf16 %v909_v31, %v908_v28 }
 0x309   :  { %5240 = vpow2.f32 %v578_v55  ;;  %v4762_v37 = vpack.c.bf16 %v821_v36, %v820_v35  ;;  %v708_v55 = vld [vmem:[#allocation5 + $0x1a0] sm:$0xff] }
 0x30a   :  { %v580_v58 = vmul.f32 1.442695, %v573_v57  ;;  %v912_v36 = vld [vmem:[#allocation5 + $0x2a0] sm:$0xff] }
 0x30b   :  { %4761 = vmatpush3.bf16.msra.mxu0 %v4758_v34  ;;  %v911_v34 = vld [vmem:[#allocation5 + $0x298] sm:$0xff] }
 0x30c   :  { %5242 = vpow2.f32 %v580_v58  ;;  %4763 = vmatprep.subr.bf16.mxu0 %v4762_v37  ;;  %v4770_v35 = vpack.c.bf16 %v911_v34, %v910_v32 }
 0x30e   :  { %v5787_v59 = vpop.eup %5236 }
 0x30f   :  { %v582_v60 = vsel %vm448_vm0, %v5787_v59, 0.0  ;;  %4765 = vmatpush3.bf16.msra.mxu0 %v4762_v37  ;;  %v913_v37 = vld [vmem:[#allocation5 + $0x2a8] sm:$0xff] }
 0x310   :  { %583 = vadd.xlane.f32.xlu0 %v582_v60  ;;  %v710_v60 = vld [vmem:[#allocation5 + $0x1b0] sm:$0xff] }
 0x312   :  { %v5791_v61 = vpop.eup %5238  ;;  %4175 = vmatmul.mubr.f32.vlgmr.msra.gmra.mrb[8].mxu0 %v5736_v49 }
 0x313   :  { %v5793_v62 = vpop.eup %5240  ;;  %v585_v63 = vsel %vm448_vm0, %v5791_v61, 0.0  ;;  %4177 = vmatprep.mubr.f32.mxu0 %v5738_v50 }
 0x314   :  { %586 = vadd.xlane.f32.xlu1 %v585_v63  ;;  %v588_v0 = vsel %vm448_vm0, %v5793_v62, 0.0  ;;  %v711_v63 = vld [vmem:[#allocation5 + $0x1b8] sm:$0xff] }
 0x315   :  { %589 = vadd.xlane.f32.xlu0 %v588_v0  ;;  %v713_v0 = vld [vmem:[#allocation5 + $0x1c8] sm:$0xff] }
 0x316   :  { %v5799_v1 = vpop.eup %5242  ;;  %4178 = vmatmul.mubr.f32.gmra.mrb[10].mxu0 %v5742_v51 }
 0x317   :  { %v591_v2 = vsel %vm448_vm0, %v5799_v1, 0.0 }
 0x318   :  { %592 = vadd.xlane.f32.xlu1 %v591_v2 }
 0x39d   :  { %v584_v38 = vpop.xlane.xlu0 %583 }
 0x39e   :  { %5244 = vrcp.f32 %v584_v38  ;;  %v4774_v38 = vpack.c.bf16 %v913_v37, %v912_v36 }
 0x3a1   :  { %v587_v39 = vpop.xlane.xlu1 %586 }
 0x3a2   :  { %v590_v40 = vpop.xlane.xlu0 %589  ;;  %5246 = vrcp.f32 %v587_v39  ;;  %v914_v39 = vld [vmem:[#allocation5 + $0x2b0] sm:$0xff] }
 0x3a3   :  { %5248 = vrcp.f32 %v590_v40  ;;  %v915_v40 = vld [vmem:[#allocation5 + $0x2b8] sm:$0xff] }
 0x3a5   :  { %v593_v41 = vpop.xlane.xlu1 %592 }
 0x3a6   :  { %5250 = vrcp.f32 %v593_v41  ;;  %v4778_v41 = vpack.c.bf16 %v915_v40, %v914_v39 }
 0x3a8   :  { %v5245_v42 = vpop.eup %5244 }
 0x3a9   :  { %v598_v43 = vmul.f32 %v5245_v42, %v5787_v59  ;;  %v4710_v59 = vpack.c.bf16 %v709_v56, %v708_v55  ;;  %v916_v42 = vld [vmem:[#allocation5 + $0x2c0] sm:$0xff]  ;;  %v922_v55 = vld [vmem:[#allocation5 + $0x2f0] sm:$0xff]  ;;  %v923_v56 = vld [vmem:[#allocation5 + $0x2f8] sm:$0xff] }
 0x3ab   :  { %4098 = vmatprep.mubr.msk.f32.mxu1 %vm448_vm0, %v598_v43  ;;  %v917_v43 = vld [vmem:[#allocation5 + $0x2c8] sm:$0xff] }
 0x3ac   :  { %v5247_v46 = vpop.eup %5246  ;;  %v4782_v44 = vpack.c.bf16 %v917_v43, %v916_v42  ;;  %v1261_v42 = vld [vmem:[#allocation7 + $0x28] sm:$0xff]  ;;  %v1262_v43 = vld [vmem:[#allocation7 + $0x30] sm:$0xff] }
 0x3ad   :  { %v5249_v47 = vpop.eup %5248  ;;  %v599_v48 = vmul.f32 %v5247_v46, %v5791_v61  ;;  %v4714_v61 = vpack.c.bf16 %v711_v63, %v710_v60  ;;  %v919_v46 = vld [vmem:[#allocation5 + $0x2d8] sm:$0xff] }
 0x3ae   :  { %v600_v53 = vmul.f32 %v5249_v47, %v5793_v62  ;;  %v712_v62 = vld [vmem:[#allocation5 + $0x1c0] sm:$0xff]  ;;  %v4786_v47 = vpack.c.bf16 %v919_v46, %v918_v45  ;;  %v1263_v45 = vld [vmem:[#allocation7 + $0x38] sm:$0xff] }
 0x3af   :  { %4099 = vmatmul.mubr.msk.f32.vlgmr.msra.gmra.mrb[8].mxu1 %vm448_vm0, %v599_v48  ;;  %v4718_v2 = vpack.c.bf16 %v713_v0, %v712_v62  ;;  %v920_v48 = vld [vmem:[#allocation5 + $0x2e0] sm:$0xff]  ;;  %v4822_v46 = vpack.c.bf16 %v1263_v45, %v1262_v43  ;;  %v1563_v45 = vld [vmem:[#allocation5 + $0x390] sm:$0xff] }
 0x3b0   :  { %v5251_v57 = vpop.eup %5250  ;;  %4705 = vmatpush3.bf16.msra.mxu1 %v4702_v25  ;;  %4101 = vmatprep.mubr.msk.f32.mxu1 %vm448_vm0, %v600_v53 }
 0x3b1   :  { %4707 = vmatprep.subr.bf16.mxu1 %v4706_v52  ;;  %v601_v58 = vmul.f32 %v5251_v57, %v5799_v1  ;;  %v4722_v1 = vpack.c.bf16 %v715_v4, %v714_v3  ;;  %v4794_v57 = vpack.c.bf16 %v923_v56, %v922_v55 }
 0x3b3   :  { %4102 = vmatmul.mubr.msk.f32.gmra.mrb[10].mxu1 %vm448_vm0, %v601_v58 }
 0x3b4   :  { %4709 = vmatpush3.bf16.msra.mxu1 %v4706_v52  ;;  %4136 = vmatprep.mubr.f32.mxu1 %v5732_v20  ;;  %v921_v52 = vld [vmem:[#allocation5 + $0x2e8] sm:$0xff] }
 0x3b5   :  { %4711 = vmatprep.subr.bf16.mxu1 %v4710_v59  ;;  %v4790_v53 = vpack.c.bf16 %v921_v52, %v920_v48 }
 0x3b8   :  { %4713 = vmatpush3.bf16.msra.mxu1 %v4710_v59 }
 0x3b9   :  { %4715 = vmatprep.subr.bf16.mxu1 %v4714_v61 }
 0x3bc   :  { %4717 = vmatpush3.bf16.msra.mxu1 %v4714_v61 }
 0x3bd   :  { %4719 = vmatprep.subr.bf16.mxu1 %v4718_v2 }
 0x3c0   :  { %4721 = vmatpush3.bf16.msra.mxu1 %v4718_v2 }
 0x3c1   :  { %4723 = vmatprep.subr.bf16.mxu1 %v4722_v1 }
 0x3c4   :  { %4725 = vmatpush3.bf16.msra.mxu1 %v4722_v1 }
 0x3c5   :  { %4727 = vmatprep.subr.bf16.mxu1 %v4726_v7 }
 0x3c8   :  { %4729 = vmatpush3.bf16.msra.mxu1 %v4726_v7 }
 0x3c9   :  { %4731 = vmatprep.subr.bf16.mxu1 %v4730_v10 }
 0x3cc   :  { %4733 = vmatpush3.bf16.msra.mxu1 %v4730_v10 }
 0x3cd   :  { %4767 = vmatprep.subr.bf16.mxu1 %v4766_v33 }
 0x3cf   :  { %4137 = vmatmul.mubr.f32.vlgmr.msra.gmra.mrb[12].mxu1 %v5736_v49 }
 0x3d0   :  { %4139 = vmatprep.mubr.f32.mxu1 %v5738_v50  ;;  %4769 = vmatpush3.bf16.msra.mxu1 %v4766_v33 }
 0x3d1   :  { %4771 = vmatprep.subr.bf16.mxu1 %v4770_v35 }
 0x3d3   :  { %4140 = vmatmul.mubr.f32.gmra.mrb[14].mxu1 %v5742_v51 }
 0x3d4   :  { %4212 = vmatprep.mubr.f32.mxu1 %v5732_v20  ;;  %4773 = vmatpush3.bf16.msra.mxu1 %v4770_v35 }
 0x3d5   :  { %4775 = vmatprep.subr.bf16.mxu1 %v4774_v38 }
 0x3d8   :  { %4777 = vmatpush3.bf16.msra.mxu1 %v4774_v38 }
 0x3d9   :  { %4779 = vmatprep.subr.bf16.mxu1 %v4778_v41 }
 0x3dc   :  { %4781 = vmatpush3.bf16.msra.mxu1 %v4778_v41  ;;  %v1260_v41 = vld [vmem:[#allocation7 + $0x20] sm:$0xff] }
 0x3dd   :  { %4783 = vmatprep.subr.bf16.mxu1 %v4782_v44 }
 0x3e0   :  { %4785 = vmatpush3.bf16.msra.mxu1 %v4782_v44  ;;  %v4818_v44 = vpack.c.bf16 %v1261_v42, %v1260_v41  ;;  %v1562_v41 = vld [vmem:[#allocation5 + $0x388] sm:$0xff] }
 0x3e1   :  { %4787 = vmatprep.subr.bf16.mxu1 %v4786_v47 }
 0x3e4   :  { %4789 = vmatpush3.bf16.msra.mxu1 %v4786_v47 }
 0x3e5   :  { %v4176_v11 = vpop.f32.mrb[8].mxu0  ;;  %4791 = vmatprep.subr.bf16.mxu1 %v4790_v53 }
 0x3e6   :  { %v888_v12 = vpop.f32.mrb[9].mxu0 }
 0x3e7   :  { %v4798_v13 = vpack.c.bf16 %v4176_v11, %v888_v12 }
 0x3e8   :  { %4793 = vmatpush3.bf16.msra.mxu1 %v4790_v53 }
 0x3e9   :  { %4800 = vmatprep.subr.msk.bf16.mxu0 %vm5751_vm1, %v4798_v13  ;;  %v4179_v14 = vpop.f32.mrb[10].mxu0  ;;  %4795 = vmatprep.subr.bf16.mxu1 %v4794_v57 }
 0x3ea   :  { %4803 = vmatpush3.bf16.xpose.msk.msra.mxu0 %vm5751_vm1, %v4798_v13  ;;  %v898_v15 = vpop.f32.mrb[11].mxu0 }
 0x3eb   :  { %v4804_v16 = vpack.c.bf16 %v4179_v14, %v898_v15 }
 0x3ec   :  { %4797 = vmatpush3.bf16.msra.mxu1 %v4794_v57 }
 0x3ed   :  { %4806 = vmatprep.subr.msk.bf16.mxu0 %vm5751_vm1, %v4804_v16 }
 0x3ef   :  { %4213 = vmatmul.mubr.f32.vlgmr.msra.gmra.mrb[16].mxu1 %v5736_v49 }
 0x3f0   :  { %4215 = vmatprep.mubr.f32.mxu1 %v5738_v50 }
 0x3f2   :  { %4809 = vmatpush3.bf16.xpose.msk.msra.mxu0 %vm5751_vm1, %v4804_v16 }
 0x3f3   :  { %4216 = vmatmul.mubr.f32.gmra.mrb[18].mxu1 %v5742_v51  ;;  %4819 = vmatprep.subr.bf16.mxu0 %v4818_v44 }
 0x482   :  { %v5827_v17 = vpop.f32.mrb[8].mxu1 }
 0x483   :  { %v5829_v18 = vpop.f32.mrb[9].mxu1 }
 0x486   :  { %v5831_v19 = vpop.f32.mrb[10].mxu1 }
 0x487   :  { %v5833_v21 = vpop.f32.mrb[11].mxu1 }
 0x4a2   :  { %v4138_v22 = vpop.f32.mrb[12].mxu1 }
 0x4a3   :  { %v786_v23 = vpop.f32.mrb[13].mxu1 }
 0x4a4   :  { %4226 = vmatprep.mubr.msk.f32.mxu0 %vm448_vm0, %v786_v23 }
 0x4a5   :  { %4227 = vmatmul.mubr.msk.f32.vlgmr.msra.gmra.mrb[12].mxu0 %vm448_vm0, %v4138_v22 }
 0x4a6   :  { %v4141_v25 = vpop.f32.mrb[14].mxu1  ;;  %4821 = vmatpush3.bf16.msra.mxu0 %v4818_v44 }
 0x4a7   :  { %v796_v27 = vpop.f32.mrb[15].mxu1  ;;  %4823 = vmatprep.subr.bf16.mxu0 %v4822_v46 }
 0x4a8   :  { %4229 = vmatprep.mubr.msk.f32.mxu0 %vm448_vm0, %v796_v27 }
 0x4a9   :  { %4230 = vmatmul.mubr.msk.f32.gmra.mrb[14].mxu0 %vm448_vm0, %v4141_v25 }
 0x4aa   :  { %4825 = vmatpush3.bf16.msra.mxu0 %v4822_v46 }
 0x4c2   :  { %v4214_v35 = vpop.f32.mrb[16].mxu1 }
 0x4c3   :  { %v990_v36 = vpop.f32.mrb[17].mxu1 }
 0x4c4   :  { %v4810_v37 = vpack.c.bf16 %v4214_v35, %v990_v36  ;;  %v701_v35 = vld [vmem:[#allocation7 + $0x10] sm:$0xff]  ;;  %v702_v36 = vld [vmem:[#allocation7 + $0x18] sm:$0xff] }
 0x4c6   :  { %v4217_v38 = vpop.f32.mrb[18].mxu1  ;;  %4811 = vmatprep.subr.bf16.mxu1 %v4810_v37 }
 0x4c7   :  { %v1000_v39 = vpop.f32.mrb[19].mxu1  ;;  %4813 = vmatpush3.bf16.msra.mxu1 %v4810_v37 }
 0x4c8   :  { %v4814_v40 = vpack.c.bf16 %v4217_v38, %v1000_v39  ;;  %v4830_v39 = vpack.c.bf16 %v702_v36, %v701_v35  ;;  %v1675_v36 = vld [vmem:[#allocation5 + $0x460] sm:$0xff] }
 0x4ca   :  { %4815 = vmatprep.subr.bf16.mxu1 %v4814_v40 }
 0x4cb   :  { %4817 = vmatpush3.bf16.msra.mxu1 %v4814_v40  ;;  %v1561_v40 = vld [vmem:[#allocation5 + $0x380] sm:$0xff] }
 0x4cc   :  { %v4866_v44 = vpack.c.bf16 %v1562_v41, %v1561_v40  ;;  %v1678_v40 = vld [vmem:[#allocation5 + $0x478] sm:$0xff] }
 0x578   :  { %v4228_v58 = vpop.f32.mrb[12].mxu0 }
 0x579   :  { %v1105_v59 = vadd.f32 %v4228_v58, %v5773_v26  ;;  %v1099_v60 = vpop.f32.mrb[13].mxu0 }
 0x57a   :  { %v1100_v63 = vadd.f32 %v1099_v60, %v5771_v24 }
 0x57b   :  { %v1121_v61 = vsel %vm448_vm0, %v1105_v59, -inf }
 0x57c   :  { %1122 = vmax.xlane.f32.xlu1 %v1121_v61  ;;  %v4231_v62 = vpop.f32.mrb[14].mxu0  ;;  %v1118_v0 = vsel %vm448_vm0, %v1100_v63, -inf }
 0x57d   :  { %v1115_v2 = vadd.f32 %v4231_v62, %v5776_v29  ;;  %1119 = vmax.xlane.f32.xlu0 %v1118_v0  ;;  %v1109_v3 = vpop.f32.mrb[15].mxu0  ;;  %v699_v62 = vld [vmem:[#allocation7] sm:$0xff]  ;;  %v700_v0 = vld [vmem:[#allocation7 + $0x8] sm:$0xff] }
 0x57e   :  { %v1110_v4 = vadd.f32 %v1109_v3, %v5778_v30  ;;  %v1459_v3 = vld [vmem:[#allocation5 + $0x300] sm:$0xff] }
 0x57f   :  { %v1127_v1 = vsel %vm448_vm0, %v1115_v2, -inf }
 0x580   :  { %1128 = vmax.xlane.f32.xlu1 %v1127_v1  ;;  %v1124_v5 = vsel %vm448_vm0, %v1110_v4, -inf }
 0x581   :  { %1125 = vmax.xlane.f32.xlu0 %v1124_v5  ;;  %v1461_v5 = vld [vmem:[#allocation5 + $0x310] sm:$0xff] }
 0x609   :  { %v1123_v6 = vpop.xlane.xlu1 %1122 }
 0x60a   :  { %v1131_v7 = vsub.f32 %v1105_v59, %v1123_v6  ;;  %v1120_v8 = vpop.xlane.xlu0 %1119  ;;  %v1462_v6 = vld [vmem:[#allocation5 + $0x318] sm:$0xff] }
 0x60b   :  { %v1130_v9 = vsub.f32 %v1100_v63, %v1120_v8  ;;  %v1463_v8 = vld [vmem:[#allocation5 + $0x320] sm:$0xff] }
 0x60c   :  { %v1136_v10 = vmul.f32 1.442695, %v1131_v7  ;;  %v4838_v7 = vpack.c.bf16 %v1462_v6, %v1461_v5 }
 0x60d   :  { %v1134_v11 = vmul.f32 1.442695, %v1130_v9  ;;  %v1129_v12 = vpop.xlane.xlu1 %1128  ;;  %v1464_v9 = vld [vmem:[#allocation5 + $0x328] sm:$0xff] }
 0x60e   :  { %5252 = vpow2.f32 %v1136_v10  ;;  %v1133_v13 = vsub.f32 %v1115_v2, %v1129_v12  ;;  %v1126_v14 = vpop.xlane.xlu0 %1125  ;;  %v4826_v2 = vpack.c.bf16 %v700_v0, %v699_v62  ;;  %v4842_v10 = vpack.c.bf16 %v1464_v9, %v1463_v8  ;;  %v1466_v12 = vld [vmem:[#allocation5 + $0x338] sm:$0xff]  ;;  %v1575_v62 = vld [vmem:[#allocation5 + $0x3f0] sm:$0xff] }
 0x60f   :  { %5254 = vpow2.f32 %v1134_v11  ;;  %v1132_v15 = vsub.f32 %v1110_v4, %v1126_v14  ;;  %v1460_v4 = vld [vmem:[#allocation5 + $0x308] sm:$0xff]  ;;  %v1465_v11 = vld [vmem:[#allocation5 + $0x330] sm:$0xff]  ;;  %v1467_v14 = vld [vmem:[#allocation5 + $0x340] sm:$0xff] }
 0x610   :  { %v1140_v16 = vmul.f32 1.442695, %v1133_v13  ;;  %4827 = vmatprep.subr.bf16.mxu0 %v4826_v2  ;;  %v4834_v1 = vpack.c.bf16 %v1460_v4, %v1459_v3  ;;  %v4846_v13 = vpack.c.bf16 %v1466_v12, %v1465_v11  ;;  %v1576_v0 = vld [vmem:[#allocation5 + $0x3f8] sm:$0xff]  ;;  %v1665_v11 = vld [vmem:[#allocation5 + $0x410] sm:$0xff] }
 0x611   :  { %v1138_v22 = vmul.f32 1.442695, %v1132_v15  ;;  %v1468_v15 = vld [vmem:[#allocation5 + $0x348] sm:$0xff] }
 0x612   :  { %5256 = vpow2.f32 %v1140_v16  ;;  %4835 = vmatprep.subr.bf16.mxu1 %v4834_v1  ;;  %v4850_v16 = vpack.c.bf16 %v1468_v15, %v1467_v14  ;;  %v1667_v15 = vld [vmem:[#allocation5 + $0x420] sm:$0xff] }
 0x613   :  { %5258 = vpow2.f32 %v1138_v22  ;;  %v1469_v22 = vld [vmem:[#allocation5 + $0x350] sm:$0xff] }
 0x618   :  { %v5253_v23 = vpop.eup %5252 }
 0x619   :  { %v5255_v25 = vpop.eup %5254  ;;  %v1145_v27 = vsel %vm448_vm0, %v5253_v23, 0.0 }
 0x61a   :  { %1146 = vadd.xlane.f32.xlu1 %v1145_v27  ;;  %v1142_v28 = vsel %vm448_vm0, %v5255_v25, 0.0  ;;  %v1471_v27 = vld [vmem:[#allocation5 + $0x360] sm:$0xff] }
 0x61b   :  { %1143 = vadd.xlane.f32.xlu0 %v1142_v28  ;;  %v1472_v28 = vld [vmem:[#allocation5 + $0x368] sm:$0xff] }
 0x61c   :  { %v5257_v31 = vpop.eup %5256 }
 0x61d   :  { %v5259_v32 = vpop.eup %5258  ;;  %v1151_v33 = vsel %vm448_vm0, %v5257_v31, 0.0 }
 0x61e   :  { %1152 = vadd.xlane.f32.xlu1 %v1151_v33  ;;  %v1148_v34 = vsel %vm448_vm0, %v5259_v32, 0.0  ;;  %v1474_v33 = vld [vmem:[#allocation5 + $0x378] sm:$0xff] }
 0x61f   :  { %1149 = vadd.xlane.f32.xlu0 %v1148_v34 }
 0x6a7   :  { %v1147_v47 = vpop.xlane.xlu1 %1146 }
 0x6a8   :  { %5260 = vrcp.f32 %v1147_v47  ;;  %v1144_v48 = vpop.xlane.xlu0 %1143  ;;  %v1565_v47 = vld [vmem:[#allocation5 + $0x3a0] sm:$0xff] }
 0x6a9   :  { %5262 = vrcp.f32 %v1144_v48  ;;  %v1566_v48 = vld [vmem:[#allocation5 + $0x3a8] sm:$0xff] }
 0x6ab   :  { %v1153_v52 = vpop.xlane.xlu1 %1152 }
 0x6ac   :  { %5264 = vrcp.f32 %v1153_v52  ;;  %v1150_v53 = vpop.xlane.xlu0 %1149  ;;  %v4874_v52 = vpack.c.bf16 %v1566_v48, %v1565_v47 }
 0x6ad   :  { %5266 = vrcp.f32 %v1150_v53  ;;  %v1567_v53 = vld [vmem:[#allocation5 + $0x3b0] sm:$0xff] }
 0x6b2   :  { %v5261_v55 = vpop.eup %5260 }
 0x6b3   :  { %v5263_v56 = vpop.eup %5262  ;;  %v1159_v58 = vmul.f32 %v5261_v55, %v5253_v23  ;;  %v1470_v23 = vld [vmem:[#allocation5 + $0x358] sm:$0xff] }
 0x6b4   :  { %v1158_v57 = vmul.f32 %v5263_v56, %v5255_v25  ;;  %v4854_v25 = vpack.c.bf16 %v1470_v23, %v1469_v22  ;;  %v1568_v55 = vld [vmem:[#allocation5 + $0x3b8] sm:$0xff]  ;;  %v1669_v23 = vld [vmem:[#allocation5 + $0x430] sm:$0xff] }
 0x6b5   :  { %v4878_v56 = vpack.c.bf16 %v1568_v55, %v1567_v53 }
 0x6b6   :  { %v5265_v59 = vpop.eup %5264  ;;  %4240 = vmatprep.mubr.msk.f32.mxu1 %vm448_vm0, %v1158_v57  ;;  %v1569_v57 = vld [vmem:[#allocation5 + $0x3c0] sm:$0xff] }
 0x6b7   :  { %v5267_v60 = vpop.eup %5266  ;;  %4241 = vmatmul.mubr.msk.f32.vlgmr.msra.gmra.mrb[20].mxu1 %vm448_vm0, %v1159_v58  ;;  %v1161_v61 = vmul.f32 %v5265_v59, %v5257_v31  ;;  %v1473_v31 = vld [vmem:[#allocation5 + $0x370] sm:$0xff]  ;;  %v1572_v59 = vld [vmem:[#allocation5 + $0x3d8] sm:$0xff] }
 0x6b8   :  { %v1160_v63 = vmul.f32 %v5267_v60, %v5259_v32  ;;  %4837 = vmatpush3.bf16.msra.mxu1 %v4834_v1  ;;  %v4858_v32 = vpack.c.bf16 %v1472_v28, %v1471_v27  ;;  %v4862_v34 = vpack.c.bf16 %v1474_v33, %v1473_v31  ;;  %v1671_v28 = vld [vmem:[#allocation5 + $0x440] sm:$0xff]  ;;  %v1672_v31 = vld [vmem:[#allocation5 + $0x448] sm:$0xff]  ;;  %v1673_v33 = vld [vmem:[#allocation5 + $0x450] sm:$0xff] }
 0x6b9   :  { %4839 = vmatprep.subr.bf16.mxu1 %v4838_v7 }
 0x6ba   :  { %4243 = vmatprep.mubr.msk.f32.mxu1 %vm448_vm0, %v1160_v63  ;;  %v1573_v63 = vld [vmem:[#allocation5 + $0x3e0] sm:$0xff] }
 0x6bb   :  { %4244 = vmatmul.mubr.msk.f32.gmra.mrb[22].mxu1 %vm448_vm0, %v1161_v61  ;;  %v1574_v61 = vld [vmem:[#allocation5 + $0x3e8] sm:$0xff] }
 0x6bc   :  { %4306 = vmatprep.mubr.f32.mxu1 %v5732_v20  ;;  %4841 = vmatpush3.bf16.msra.mxu1 %v4838_v7 }
 0x6bd   :  { %4843 = vmatprep.subr.bf16.mxu1 %v4842_v10 }
 0x6c0   :  { %4845 = vmatpush3.bf16.msra.mxu1 %v4842_v10  ;;  %v1664_v10 = vld [vmem:[#allocation5 + $0x408] sm:$0xff] }
 0x6c1   :  { %4847 = vmatprep.subr.bf16.mxu1 %v4846_v13 }
 0x6c4   :  { %4849 = vmatpush3.bf16.msra.mxu1 %v4846_v13  ;;  %v1666_v13 = vld [vmem:[#allocation5 + $0x418] sm:$0xff] }
 0x6c5   :  { %4851 = vmatprep.subr.bf16.mxu1 %v4850_v16  ;;  %v4902_v14 = vpack.c.bf16 %v1666_v13, %v1665_v11  ;;  %v2016_v13 = vld [vmem:[#allocation7 + $0x48] sm:$0xff] }
 0x6c8   :  { %4853 = vmatpush3.bf16.msra.mxu1 %v4850_v16  ;;  %v1668_v16 = vld [vmem:[#allocation5 + $0x428] sm:$0xff] }
 0x6c9   :  { %4855 = vmatprep.subr.bf16.mxu1 %v4854_v25  ;;  %v4906_v22 = vpack.c.bf16 %v1668_v16, %v1667_v15 }
 0x6cc   :  { %4857 = vmatpush3.bf16.msra.mxu1 %v4854_v25  ;;  %v1670_v25 = vld [vmem:[#allocation5 + $0x438] sm:$0xff] }
 0x6cd   :  { %4859 = vmatprep.subr.bf16.mxu1 %v4858_v32  ;;  %v4910_v27 = vpack.c.bf16 %v1670_v25, %v1669_v23 }
 0x6d0   :  { %4861 = vmatpush3.bf16.msra.mxu1 %v4858_v32  ;;  %v4914_v32 = vpack.c.bf16 %v1672_v31, %v1671_v28  ;;  %v2018_v28 = vld [vmem:[#allocation7 + $0x58] sm:$0xff] }
 0x6d1   :  { %4863 = vmatprep.subr.bf16.mxu1 %v4862_v34 }
 0x6d4   :  { %4865 = vmatpush3.bf16.msra.mxu1 %v4862_v34  ;;  %v1674_v34 = vld [vmem:[#allocation5 + $0x458] sm:$0xff] }
 0x6d5   :  { %v4918_v35 = vpack.c.bf16 %v1674_v34, %v1673_v33 }
 0x6d7   :  { %4307 = vmatmul.mubr.f32.vlgmr.msra.gmra.mrb[24].mxu1 %v5736_v49 }
 0x6d8   :  { %4309 = vmatprep.mubr.f32.mxu1 %v5738_v50 }
 0x6db   :  { %4310 = vmatmul.mubr.f32.gmra.mrb[26].mxu1 %v5742_v51 }
 0x6dc   :  { %4382 = vmatprep.mubr.f32.mxu1 %v5732_v20  ;;  %v1564_v20 = vld [vmem:[#allocation5 + $0x398] sm:$0xff] }
 0x6dd   :  { %v4870_v46 = vpack.c.bf16 %v1564_v20, %v1563_v45 }
 0x78a   :  { %v4242_v37 = vpop.f32.mrb[20].mxu1 }
 0x78b   :  { %v1240_v38 = vpop.f32.mrb[21].mxu1 }
 0x78c   :  { %4254 = vmatprep.mubr.msk.f32.mxu0 %vm448_vm0, %v1240_v38 }
 0x78d   :  { %4255 = vmatmul.mubr.msk.f32.vlgmr.msra.gmra.mrb[16].mxu0 %vm448_vm0, %v4242_v37  ;;  %v1676_v37 = vld [vmem:[#allocation5 + $0x468] sm:$0xff] }
 0x78e   :  { %4829 = vmatpush3.bf16.msra.mxu0 %v4826_v2  ;;  %v4245_v42 = vpop.f32.mrb[22].mxu1  ;;  %v4894_v2 = vpack.c.bf16 %v1576_v0, %v1575_v62  ;;  %v4922_v38 = vpack.c.bf16 %v1676_v37, %v1675_v36 }
 0x78f   :  { %v1250_v43 = vpop.f32.mrb[23].mxu1  ;;  %4831 = vmatprep.subr.bf16.mxu0 %v4830_v39 }
 0x790   :  { %4257 = vmatprep.mubr.msk.f32.mxu0 %vm448_vm0, %v1250_v43  ;;  %v5896_v43 = vld [vmem:[#allocation2 + $0x10] sm:$0xff] }
 0x791   :  { %4258 = vmatmul.mubr.msk.f32.gmra.mrb[18].mxu0 %vm448_vm0, %v4245_v42  ;;  %v5893_v42 = vld [vmem:[#allocation2 + $0x8] sm:$0xff] }
 0x792   :  { %4833 = vmatpush3.bf16.msra.mxu0 %v4830_v39  ;;  %4268 = vmatprep.mubr.msk.f32.mxu0 %vm448_vm0, %v5829_v18  ;;  %v5875_v18 = vld [vmem:[#allocation2] sm:$0xff]  ;;  %v1677_v39 = vld [vmem:[#allocation5 + $0x470] sm:$0xff] }
 0x793   :  { %4867 = vmatprep.subr.bf16.mxu0 %v4866_v44  ;;  %v4926_v41 = vpack.c.bf16 %v1678_v40, %v1677_v39  ;;  %v2223_v39 = vld [vmem:[#allocation5 + $0x500] sm:$0xff]  ;;  %v2224_v40 = vld [vmem:[#allocation5 + $0x508] sm:$0xff] }
 0x795   :  { %4269 = vmatmul.mubr.msk.f32.vlgmr.msra.gmra.mrb[16].mxu0 %vm448_vm0, %v5827_v17  ;;  %v1570_v17 = vld [vmem:[#allocation5 + $0x3c8] sm:$0xff] }
 0x796   :  { %4869 = vmatpush3.bf16.msra.mxu0 %v4866_v44  ;;  %4271 = vmatprep.mubr.msk.f32.mxu0 %vm448_vm0, %v5833_v21  ;;  %v4882_v58 = vpack.c.bf16 %v1570_v17, %v1569_v57  ;;  %v1571_v21 = vld [vmem:[#allocation5 + $0x3d0] sm:$0xff]  ;;  %v5899_v44 = vld [vmem:[#allocation2 + $0x18] sm:$0xff] }
 0x797   :  { %4871 = vmatprep.subr.bf16.mxu0 %v4870_v46  ;;  %v4886_v60 = vpack.c.bf16 %v1572_v59, %v1571_v21 }
 0x799   :  { %4272 = vmatmul.mubr.msk.f32.gmra.mrb[18].mxu0 %vm448_vm0, %v5831_v19  ;;  %v4890_v19 = vpack.c.bf16 %v1574_v61, %v1573_v63 }
 0x79a   :  { %4873 = vmatpush3.bf16.msra.mxu0 %v4870_v46  ;;  %4344 = vmatprep.mubr.f32.mxu0 %v5875_v18 }
 0x79b   :  { %4875 = vmatprep.subr.bf16.mxu0 %v4874_v52 }
 0x79e   :  { %4877 = vmatpush3.bf16.msra.mxu0 %v4874_v52 }
 0x79f   :  { %4879 = vmatprep.subr.bf16.mxu0 %v4878_v56 }
 0x7a2   :  { %4881 = vmatpush3.bf16.msra.mxu0 %v4878_v56 }
 0x7a3   :  { %4883 = vmatprep.subr.bf16.mxu0 %v4882_v58 }
 0x7a6   :  { %4885 = vmatpush3.bf16.msra.mxu0 %v4882_v58 }
 0x7a7   :  { %4887 = vmatprep.subr.bf16.mxu0 %v4886_v60 }
 0x7aa   :  { %4889 = vmatpush3.bf16.msra.mxu0 %v4886_v60  ;;  %v4308_v3 = vpop.f32.mrb[24].mxu1 }
 0x7ab   :  { %4891 = vmatprep.subr.bf16.mxu0 %v4890_v19  ;;  %v1541_v4 = vpop.f32.mrb[25].mxu1 }
 0x7ae   :  { %4893 = vmatpush3.bf16.msra.mxu0 %v4890_v19  ;;  %v4311_v1 = vpop.f32.mrb[26].mxu1 }
 0x7af   :  { %4895 = vmatprep.subr.bf16.mxu0 %v4894_v2  ;;  %v1551_v5 = vpop.f32.mrb[27].mxu1 }
 0x7b2   :  { %4897 = vmatpush3.bf16.msra.mxu0 %v4894_v2 }
 0x7b5   :  { %4345 = vmatmul.mubr.f32.vlgmr.msra.gmra.mrb[20].mxu0 %v5736_v49 }
 0x7b6   :  { %4347 = vmatprep.mubr.f32.mxu0 %v5738_v50 }
 0x7b9   :  { %4348 = vmatmul.mubr.f32.gmra.mrb[22].mxu0 %v5742_v51  ;;  %v1663_v51 = vld [vmem:[#allocation5 + $0x400] sm:$0xff] }
 0x7ba   :  { %4396 = vmatprep.mubr.msk.f32.mxu0 %vm448_vm0, %v1541_v4  ;;  %v4898_v12 = vpack.c.bf16 %v1664_v10, %v1663_v51 }
 0x7bc   :  { %4899 = vmatprep.subr.bf16.mxu1 %v4898_v12 }
 0x7bd   :  { %4901 = vmatpush3.bf16.msra.mxu1 %v4898_v12  ;;  %v2015_v12 = vld [vmem:[#allocation7 + $0x40] sm:$0xff] }
 0x7be   :  { %4903 = vmatprep.subr.bf16.mxu1 %v4902_v14 }
 0x7c1   :  { %4905 = vmatpush3.bf16.msra.mxu1 %v4902_v14  ;;  %v4950_v14 = vpack.c.bf16 %v2016_v13, %v2015_v12  ;;  %v2232_v12 = vld [vmem:[#allocation5 + $0x548] sm:$0xff] }
 0x7c2   :  { %4907 = vmatprep.subr.bf16.mxu1 %v4906_v22 }
 0x7c5   :  { %4909 = vmatpush3.bf16.msra.mxu1 %v4906_v22 }
 0x7c6   :  { %4911 = vmatprep.subr.bf16.mxu1 %v4910_v27 }
 0x7c9   :  { %4913 = vmatpush3.bf16.msra.mxu1 %v4910_v27  ;;  %v2017_v27 = vld [vmem:[#allocation7 + $0x50] sm:$0xff] }
 0x7ca   :  { %4915 = vmatprep.subr.bf16.mxu1 %v4914_v32  ;;  %v4954_v34 = vpack.c.bf16 %v2018_v28, %v2017_v27  ;;  %v2237_v27 = vld [vmem:[#allocation5 + $0x570] sm:$0xff]  ;;  %v2238_v28 = vld [vmem:[#allocation5 + $0x578] sm:$0xff] }
 0x7cd   :  { %4917 = vmatpush3.bf16.msra.mxu1 %v4914_v32 }
 0x7ce   :  { %4919 = vmatprep.subr.bf16.mxu1 %v4918_v35 }
 0x7d1   :  { %4921 = vmatpush3.bf16.msra.mxu1 %v4918_v35 }
 0x7d2   :  { %4923 = vmatprep.subr.bf16.mxu1 %v4922_v38 }
 0x7d5   :  { %4925 = vmatpush3.bf16.msra.mxu1 %v4922_v38 }
 0x7d6   :  { %4927 = vmatprep.subr.bf16.mxu1 %v4926_v41 }
 0x7d9   :  { %4929 = vmatpush3.bf16.msra.mxu1 %v4926_v41  ;;  %v4990_v41 = vpack.c.bf16 %v2224_v40, %v2223_v39 }
 0x7dc   :  { %4383 = vmatmul.mubr.f32.vlgmr.msra.gmra.mrb[28].mxu1 %v5893_v42 }
 0x7dd   :  { %4385 = vmatprep.mubr.f32.mxu1 %v5896_v43 }
 0x7e0   :  { %4386 = vmatmul.mubr.f32.gmra.mrb[30].mxu1 %v5899_v44 }
 0x7e1   :  { %4462 = vmatprep.mubr.f32.mxu1 %v5875_v18 }
 0x888   :  { %v4346_v6 = vpop.f32.mrb[20].mxu0 }
 0x889   :  { %v1643_v7 = vpop.f32.mrb[21].mxu0 }
 0x88a   :  { %v4930_v8 = vpack.c.bf16 %v4346_v6, %v1643_v7 }
 0x88c   :  { %4932 = vmatprep.subr.msk.bf16.mxu0 %vm5751_vm1, %v4930_v8  ;;  %v4349_v9 = vpop.f32.mrb[22].mxu0 }
 0x88d   :  { %4935 = vmatpush3.bf16.xpose.msk.msra.mxu0 %vm5751_vm1, %v4930_v8  ;;  %v1653_v49 = vpop.f32.mrb[23].mxu0 }
 0x88e   :  { %v4936_v50 = vpack.c.bf16 %v4349_v9, %v1653_v49 }
 0x890   :  { %4938 = vmatprep.subr.msk.bf16.mxu0 %vm5751_vm1, %v4936_v50 }
 0x895   :  { %4941 = vmatpush3.bf16.xpose.msk.msra.mxu0 %vm5751_vm1, %v4936_v50 }
 0x89c   :  { %4397 = vmatmul.mubr.msk.f32.vlgmr.msra.gmra.mrb[24].mxu0 %vm448_vm0, %v4308_v3 }
 0x89d   :  { %4399 = vmatprep.mubr.msk.f32.mxu0 %vm448_vm0, %v1551_v5 }
 0x8a0   :  { %4400 = vmatmul.mubr.msk.f32.gmra.mrb[26].mxu0 %vm448_vm0, %v4311_v1 }
 0x8af   :  { %v4384_v9 = vpop.f32.mrb[28].mxu1 }
 0x8b0   :  { %v1745_v49 = vpop.f32.mrb[29].mxu1 }
 0x8b1   :  { %v4942_v50 = vpack.c.bf16 %v4384_v9, %v1745_v49 }
 0x8b3   :  { %v4387_v51 = vpop.f32.mrb[30].mxu1  ;;  %4943 = vmatprep.subr.bf16.mxu0 %v4942_v50 }
 0x8b4   :  { %v1755_v10 = vpop.f32.mrb[31].mxu1  ;;  %4945 = vmatpush3.bf16.msra.mxu0 %v4942_v50  ;;  %v2229_v50 = vld [vmem:[#allocation5 + $0x530] sm:$0xff] }
 0x8b5   :  { %v4946_v11 = vpack.c.bf16 %v4387_v51, %v1755_v10  ;;  %v2230_v51 = vld [vmem:[#allocation5 + $0x538] sm:$0xff] }
 0x8b6   :  { %v5002_v10 = vpack.c.bf16 %v2230_v51, %v2229_v50  ;;  %v5323_v51 = vld [vmem:[#allocation14 + $0x10] sm:$0xff] }
 0x8b7   :  { %4947 = vmatprep.subr.bf16.mxu0 %v4946_v11 }
 0x8b8   :  { %4949 = vmatpush3.bf16.msra.mxu0 %v4946_v11  ;;  %v2231_v11 = vld [vmem:[#allocation5 + $0x540] sm:$0xff] }
 0x8b9   :  { %4951 = vmatprep.subr.bf16.mxu0 %v4950_v14  ;;  %v5006_v13 = vpack.c.bf16 %v2232_v12, %v2231_v11 }
 0x96f   :  { %v4398_v45 = vpop.f32.mrb[24].mxu0 }
 0x970   :  { %v1860_v20 = vadd.f32 %v4398_v45, %v5773_v26  ;;  %v1854_v46 = vpop.f32.mrb[25].mxu0  ;;  %v2121_v45 = vld [vmem:[#allocation5 + $0x480] sm:$0xff] }
 0x971   :  { %v1855_v47 = vadd.f32 %v1854_v46, %v5771_v24 }
 0x972   :  { %v1876_v48 = vsel %vm448_vm0, %v1860_v20, -inf }
 0x973   :  { %1877 = vmax.xlane.f32.xlu1 %v1876_v48  ;;  %v4401_v52 = vpop.f32.mrb[26].mxu0  ;;  %v1873_v53 = vsel %vm448_vm0, %v1855_v47, -inf  ;;  %v2124_v48 = vld [vmem:[#allocation5 + $0x498] sm:$0xff] }
 0x974   :  { %v1870_v55 = vadd.f32 %v4401_v52, %v5776_v29  ;;  %v1864_v56 = vpop.f32.mrb[27].mxu0  ;;  %1874 = vmax.xlane.f32.xlu0 %v1873_v53  ;;  %v2125_v53 = vld [vmem:[#allocation5 + $0x4a0] sm:$0xff] }
 0x975   :  { %v1865_v57 = vadd.f32 %v1864_v56, %v5778_v30 }
 0x976   :  { %v1882_v17 = vsel %vm448_vm0, %v1870_v55, -inf }
 0x977   :  { %1883 = vmax.xlane.f32.xlu1 %v1882_v17  ;;  %v1879_v26 = vsel %vm448_vm0, %v1865_v57, -inf  ;;  %v2128_v17 = vld [vmem:[#allocation5 + $0x4b8] sm:$0xff] }
 0x978   :  { %1880 = vmax.xlane.f32.xlu0 %v1879_v26 }
 0xa00   :  { %v1878_v58 = vpop.xlane.xlu1 %1877 }
 0xa01   :  { %v1886_v24 = vsub.f32 %v1860_v20, %v1878_v58  ;;  %v1875_v21 = vpop.xlane.xlu0 %1874  ;;  %v2122_v20 = vld [vmem:[#allocation5 + $0x488] sm:$0xff]  ;;  %v2129_v58 = vld [vmem:[#allocation5 + $0x4c0] sm:$0xff] }
 0xa02   :  { %v1885_v59 = vsub.f32 %v1855_v47, %v1875_v21  ;;  %v4958_v46 = vpack.c.bf16 %v2122_v20, %v2121_v45  ;;  %v2123_v47 = vld [vmem:[#allocation5 + $0x490] sm:$0xff]  ;;  %v2325_v45 = vld [vmem:[#allocation5 + $0x580] sm:$0xff]  ;;  %v2326_v20 = vld [vmem:[#allocation5 + $0x588] sm:$0xff] }
 0xa03   :  { %v1891_v60 = vmul.f32 1.442695, %v1886_v24  ;;  %v4962_v52 = vpack.c.bf16 %v2124_v48, %v2123_v47  ;;  %v2130_v24 = vld [vmem:[#allocation5 + $0x4c8] sm:$0xff]  ;;  %v5022_v47 = vpack.c.bf16 %v2326_v20, %v2325_v45  ;;  %v2328_v48 = vld [vmem:[#allocation5 + $0x598] sm:$0xff] }
 0xa04   :  { %v1889_v63 = vmul.f32 1.442695, %v1885_v59  ;;  %v1884_v61 = vpop.xlane.xlu1 %1883  ;;  %4959 = vmatprep.subr.bf16.mxu1 %v4958_v46  ;;  %v4974_v21 = vpack.c.bf16 %v2130_v24, %v2129_v58  ;;  %v2131_v59 = vld [vmem:[#allocation5 + $0x4d0] sm:$0xff]  ;;  %v2334_v58 = vld [vmem:[#allocation5 + $0x5c8] sm:$0xff] }
 0xa05   :  { %5268 = vpow2.f32 %v1891_v60  ;;  %v1888_v19 = vsub.f32 %v1870_v55, %v1884_v61  ;;  %v1881_v29 = vpop.xlane.xlu0 %1880  ;;  %4961 = vmatpush3.bf16.msra.mxu1 %v4958_v46  ;;  %v2126_v55 = vld [vmem:[#allocation5 + $0x4a8] sm:$0xff]  ;;  %v2132_v60 = vld [vmem:[#allocation5 + $0x4d8] sm:$0xff]  ;;  %v2133_v61 = vld [vmem:[#allocation5 + $0x4e0] sm:$0xff] }
 0xa06   :  { %5270 = vpow2.f32 %v1889_v63  ;;  %v1887_v62 = vsub.f32 %v1865_v57, %v1881_v29  ;;  %4963 = vmatprep.subr.bf16.mxu1 %v4962_v52  ;;  %v4966_v56 = vpack.c.bf16 %v2126_v55, %v2125_v53  ;;  %v2127_v57 = vld [vmem:[#allocation5 + $0x4b0] sm:$0xff]  ;;  %v4978_v63 = vpack.c.bf16 %v2132_v60, %v2131_v59  ;;  %v2329_v53 = vld [vmem:[#allocation5 + $0x5a0] sm:$0xff]  ;;  %v2330_v55 = vld [vmem:[#allocation5 + $0x5a8] sm:$0xff] }
 0xa07   :  { %v1895_v0 = vmul.f32 1.442695, %v1888_v19  ;;  %v4970_v26 = vpack.c.bf16 %v2128_v17, %v2127_v57  ;;  %v2134_v19 = vld [vmem:[#allocation5 + $0x4e8] sm:$0xff]  ;;  %v2135_v29 = vld [vmem:[#allocation5 + $0x4f0] sm:$0xff]  ;;  %v2332_v57 = vld [vmem:[#allocation5 + $0x5b8] sm:$0xff] }
 0xa08   :  { %v1893_v30 = vmul.f32 1.442695, %v1887_v62  ;;  %v4982_v62 = vpack.c.bf16 %v2134_v19, %v2133_v61  ;;  %v2327_v46 = vld [vmem:[#allocation5 + $0x590] sm:$0xff]  ;;  %v5034_v17 = vpack.c.bf16 %v2332_v57, %v2331_v54  ;;  %v2336_v59 = vld [vmem:[#allocation5 + $0x5d8] sm:$0xff]  ;;  %v2338_v61 = vld [vmem:[#allocation5 + $0x5e8] sm:$0xff] }
 0xa09   :  { %5272 = vpow2.f32 %v1895_v0  ;;  %4965 = vmatpush3.bf16.msra.mxu1 %v4962_v52  ;;  %v2136_v0 = vld [vmem:[#allocation5 + $0x4f8] sm:$0xff]  ;;  %v5026_v52 = vpack.c.bf16 %v2328_v48, %v2327_v46 }
 0xa0a   :  { %5274 = vpow2.f32 %v1893_v30  ;;  %4967 = vmatprep.subr.bf16.mxu1 %v4966_v56  ;;  %v4986_v30 = vpack.c.bf16 %v2136_v0, %v2135_v29  ;;  %v2339_v29 = vld [vmem:[#allocation5 + $0x5f0] sm:$0xff] }
 0xa0d   :  { %4969 = vmatpush3.bf16.msra.mxu1 %v4966_v56  ;;  %v5030_v56 = vpack.c.bf16 %v2330_v55, %v2329_v53  ;;  %v2677_v53 = vld [vmem:[#allocation7 + $0x60] sm:$0xff]  ;;  %v2678_v55 = vld [vmem:[#allocation7 + $0x68] sm:$0xff] }
 0xa0e   :  { %4971 = vmatprep.subr.bf16.mxu1 %v4970_v26 }
 0xa0f   :  { %v5269_v2 = vpop.eup %5268 }
 0xa10   :  { %v5271_v3 = vpop.eup %5270  ;;  %v1900_v4 = vsel %vm448_vm0, %v5269_v2, 0.0 }
 0xa11   :  { %1901 = vadd.xlane.f32.xlu1 %v1900_v4  ;;  %v1897_v1 = vsel %vm448_vm0, %v5271_v3, 0.0  ;;  %4973 = vmatpush3.bf16.msra.mxu1 %v4970_v26  ;;  %v2333_v26 = vld [vmem:[#allocation5 + $0x5c0] sm:$0xff] }
 0xa12   :  { %1898 = vadd.xlane.f32.xlu0 %v1897_v1  ;;  %4975 = vmatprep.subr.bf16.mxu1 %v4974_v21  ;;  %v5038_v24 = vpack.c.bf16 %v2334_v58, %v2333_v26 }
 0xa13   :  { %v5273_v5 = vpop.eup %5272 }
 0xa14   :  { %v5275_v6 = vpop.eup %5274  ;;  %v1906_v7 = vsel %vm448_vm0, %v5273_v5, 0.0 }
 0xa15   :  { %1907 = vadd.xlane.f32.xlu1 %v1906_v7  ;;  %v1903_v8 = vsel %vm448_vm0, %v5275_v6, 0.0  ;;  %4977 = vmatpush3.bf16.msra.mxu1 %v4974_v21  ;;  %v2228_v7 = vld [vmem:[#allocation5 + $0x528] sm:$0xff]  ;;  %v2335_v21 = vld [vmem:[#allocation5 + $0x5d0] sm:$0xff] }
 0xa16   :  { %1904 = vadd.xlane.f32.xlu0 %v1903_v8  ;;  %4979 = vmatprep.subr.bf16.mxu1 %v4978_v63  ;;  %v5042_v60 = vpack.c.bf16 %v2336_v59, %v2335_v21  ;;  %v2680_v21 = vld [vmem:[#allocation7 + $0x78] sm:$0xff] }
 0xa19   :  { %4981 = vmatpush3.bf16.msra.mxu1 %v4978_v63  ;;  %v2337_v63 = vld [vmem:[#allocation5 + $0x5e0] sm:$0xff] }
 0xa1a   :  { %4983 = vmatprep.subr.bf16.mxu1 %v4982_v62  ;;  %v5046_v19 = vpack.c.bf16 %v2338_v61, %v2337_v63 }
 0xa1d   :  { %4985 = vmatpush3.bf16.msra.mxu1 %v4982_v62  ;;  %v2340_v62 = vld [vmem:[#allocation5 + $0x5f8] sm:$0xff] }
 0xa1e   :  { %4987 = vmatprep.subr.bf16.mxu1 %v4986_v30  ;;  %v5050_v0 = vpack.c.bf16 %v2340_v62, %v2339_v29 }
 0xa21   :  { %4989 = vmatpush3.bf16.msra.mxu1 %v4986_v30 }
 0xa22   :  { %5023 = vmatprep.subr.bf16.mxu1 %v5022_v47 }
 0xa24   :  { %4463 = vmatmul.mubr.f32.vlgmr.msra.gmra.mrb[32].mxu1 %v5893_v42 }
 0xa25   :  { %4465 = vmatprep.mubr.f32.mxu1 %v5896_v43  ;;  %5025 = vmatpush3.bf16.msra.mxu1 %v5022_v47 }
 0xa26   :  { %5027 = vmatprep.subr.bf16.mxu1 %v5026_v52 }
 0xa28   :  { %4466 = vmatmul.mubr.f32.gmra.mrb[34].mxu1 %v5899_v44 }
 0xa29   :  { %4538 = vmatprep.mubr.f32.mxu1 %v5875_v18  ;;  %5029 = vmatpush3.bf16.msra.mxu1 %v5026_v52 }
 0xa2a   :  { %5031 = vmatprep.subr.bf16.mxu1 %v5030_v56 }
 0xa2d   :  { %5033 = vmatpush3.bf16.msra.mxu1 %v5030_v56  ;;  %v5074_v56 = vpack.c.bf16 %v2678_v55, %v2677_v53  ;;  %v2874_v53 = vld [vmem:[#allocation8 + $0x80] sm:$0xff] }
 0xa2e   :  { %5035 = vmatprep.subr.bf16.mxu1 %v5034_v17 }
 0xa31   :  { %5037 = vmatpush3.bf16.msra.mxu1 %v5034_v17 }
 0xa32   :  { %5039 = vmatprep.subr.bf16.mxu1 %v5038_v24 }
 0xa35   :  { %5041 = vmatpush3.bf16.msra.mxu1 %v5038_v24  ;;  %v2679_v24 = vld [vmem:[#allocation7 + $0x70] sm:$0xff] }
 0xa36   :  { %5043 = vmatprep.subr.bf16.mxu1 %v5042_v60  ;;  %v5078_v61 = vpack.c.bf16 %v2680_v21, %v2679_v24 }
 0xa39   :  { %5045 = vmatpush3.bf16.msra.mxu1 %v5042_v60 }
 0xa3a   :  { %5047 = vmatprep.subr.bf16.mxu1 %v5046_v19 }
 0xa3d   :  { %5049 = vmatpush3.bf16.msra.mxu1 %v5046_v19 }
 0xa3e   :  { %5051 = vmatprep.subr.bf16.mxu1 %v5050_v0 }
 0xa41   :  { %5053 = vmatpush3.bf16.msra.mxu1 %v5050_v0 }
 0xa44   :  { %4539 = vmatmul.mubr.f32.vlgmr.msra.gmra.mrb[36].mxu1 %v5893_v42 }
 0xa45   :  { %4541 = vmatprep.mubr.f32.mxu1 %v5896_v43 }
 0xa48   :  { %4542 = vmatmul.mubr.f32.gmra.mrb[38].mxu1 %v5899_v44 }
 0xa9e   :  { %v1902_v15 = vpop.xlane.xlu1 %1901 }
 0xa9f   :  { %5276 = vrcp.f32 %v1902_v15  ;;  %v1899_v16 = vpop.xlane.xlu0 %1898  ;;  %v2234_v15 = vld [vmem:[#allocation5 + $0x558] sm:$0xff] }
 0xaa0   :  { %5278 = vrcp.f32 %v1899_v16 }
 0xaa2   :  { %v1908_v22 = vpop.xlane.xlu1 %1907 }
 0xaa3   :  { %5280 = vrcp.f32 %v1908_v22  ;;  %v1905_v23 = vpop.xlane.xlu0 %1904  ;;  %v2235_v22 = vld [vmem:[#allocation5 + $0x560] sm:$0xff] }
 0xaa4   :  { %5282 = vrcp.f32 %v1905_v23  ;;  %v2236_v23 = vld [vmem:[#allocation5 + $0x568] sm:$0xff] }
 0xaa9   :  { %v5277_v25 = vpop.eup %5276 }
 0xaaa   :  { %v5279_v31 = vpop.eup %5278  ;;  %v1914_v33 = vmul.f32 %v5277_v25, %v5269_v2  ;;  %v2225_v2 = vld [vmem:[#allocation5 + $0x510] sm:$0xff]  ;;  %v5014_v25 = vpack.c.bf16 %v2236_v23, %v2235_v22 }
 0xaab   :  { %v1913_v32 = vmul.f32 %v5279_v31, %v5271_v3  ;;  %v2226_v3 = vld [vmem:[#allocation5 + $0x518] sm:$0xff]  ;;  %v5018_v31 = vpack.c.bf16 %v2238_v28, %v2237_v27 }
 0xaad   :  { %v5281_v35 = vpop.eup %5280  ;;  %4410 = vmatprep.mubr.msk.f32.mxu0 %vm448_vm0, %v1913_v32 }
 0xaae   :  { %v5283_v36 = vpop.eup %5282  ;;  %4411 = vmatmul.mubr.msk.f32.vlgmr.msra.gmra.mrb[28].mxu0 %vm448_vm0, %v1914_v33  ;;  %v1916_v38 = vmul.f32 %v5281_v35, %v5273_v5  ;;  %v4994_v5 = vpack.c.bf16 %v2226_v3, %v2225_v2  ;;  %v5320_v2 = vld [vmem:[#allocation14 + $0x8] sm:$0xff] }
 0xaaf   :  { %v1915_v37 = vmul.f32 %v5283_v36, %v5275_v6  ;;  %4953 = vmatpush3.bf16.msra.mxu0 %v4950_v14  ;;  %v2227_v6 = vld [vmem:[#allocation5 + $0x520] sm:$0xff]  ;;  %v2233_v14 = vld [vmem:[#allocation5 + $0x550] sm:$0xff] }
 0xab0   :  { %4955 = vmatprep.subr.bf16.mxu0 %v4954_v34  ;;  %v4998_v49 = vpack.c.bf16 %v2228_v7, %v2227_v6  ;;  %v5010_v16 = vpack.c.bf16 %v2234_v15, %v2233_v14 }
 0xab1   :  { %4413 = vmatprep.mubr.msk.f32.mxu0 %vm448_vm0, %v1915_v37 }
 0xab2   :  { %4414 = vmatmul.mubr.msk.f32.gmra.mrb[30].mxu0 %vm448_vm0, %v1916_v38 }
 0xab3   :  { %4957 = vmatpush3.bf16.msra.mxu0 %v4954_v34 }
 0xab4   :  { %4991 = vmatprep.subr.bf16.mxu0 %v4990_v41 }
 0xaf7   :  { %v4464_v32 = vpop.f32.mrb[32].mxu1 }
 0xaf8   :  { %v2203_v33 = vpop.f32.mrb[33].mxu1 }
 0xafb   :  { %v4467_v34 = vpop.f32.mrb[34].mxu1 }
 0xafc   :  { %v2213_v35 = vpop.f32.mrb[35].mxu1 }
 0xb17   :  { %v4540_v45 = vpop.f32.mrb[36].mxu1 }
 0xb18   :  { %v2407_v20 = vpop.f32.mrb[37].mxu1 }
 0xb19   :  { %v5066_v46 = vpack.c.bf16 %v4540_v45, %v2407_v20  ;;  %v2875_v45 = vld [vmem:[#allocation8 + $0x88] sm:$0xff] }
 0xb1a   :  { %v2879_v20 = vld [vmem:[#allocation8 + $0xa8] sm:$0xff] }
 0xb1b   :  { %v4543_v47 = vpop.f32.mrb[38].mxu1 }
 0xb1c   :  { %v2417_v48 = vpop.f32.mrb[39].mxu1 }
 0xb1d   :  { %v5070_v52 = vpack.c.bf16 %v4543_v47, %v2417_v48  ;;  %v5090_v47 = vpack.c.bf16 %v2879_v20, %v2875_v45  ;;  %v2877_v48 = vld [vmem:[#allocation8 + $0x98] sm:$0xff]  ;;  %v2907_v20 = vld [vmem:[#allocation8 + $0x188] sm:$0xff] }
 0xb81   :  { %v4412_v4 = vpop.f32.mrb[28].mxu0 }
 0xb82   :  { %v1995_v1 = vpop.f32.mrb[29].mxu0 }
 0xb83   :  { %4424 = vmatprep.mubr.msk.f32.mxu0 %vm448_vm0, %v1995_v1  ;;  %v5321_v1 = vld [vmem:[#allocation14] sm:$0xff] }
 0xb84   :  { %4425 = vmatmul.mubr.msk.f32.vlgmr.msra.gmra.mrb[16].mxu0 %vm448_vm0, %v4412_v4 }
 0xb85   :  { %4993 = vmatpush3.bf16.msra.mxu0 %v4990_v41  ;;  %v4415_v8 = vpop.f32.mrb[30].mxu0 }
 0xb86   :  { %v2005_v9 = vpop.f32.mrb[31].mxu0  ;;  %4995 = vmatprep.subr.bf16.mxu0 %v4994_v5 }
 0xb87   :  { %4427 = vmatprep.mubr.msk.f32.mxu0 %vm448_vm0, %v2005_v9  ;;  %v5322_v9 = vld [vmem:[#allocation14 + $0x18] sm:$0xff] }
 0xb88   :  { %4428 = vmatmul.mubr.msk.f32.gmra.mrb[18].mxu0 %vm448_vm0, %v4415_v8 }
 0xb89   :  { %4997 = vmatpush3.bf16.msra.mxu0 %v4994_v5  ;;  %4500 = vmatprep.mubr.f32.mxu0 %v5875_v18 }
 0xb8a   :  { %4999 = vmatprep.subr.bf16.mxu0 %v4998_v49 }
 0xb8d   :  { %5001 = vmatpush3.bf16.msra.mxu0 %v4998_v49 }
 0xb8e   :  { %5003 = vmatprep.subr.bf16.mxu0 %v5002_v10 }
 0xb91   :  { %5005 = vmatpush3.bf16.msra.mxu0 %v5002_v10 }
 0xb92   :  { %5007 = vmatprep.subr.bf16.mxu0 %v5006_v13 }
 0xb95   :  { %5009 = vmatpush3.bf16.msra.mxu0 %v5006_v13 }
 0xb96   :  { %5011 = vmatprep.subr.bf16.mxu0 %v5010_v16 }
 0xb99   :  { %5013 = vmatpush3.bf16.msra.mxu0 %v5010_v16 }
 0xb9a   :  { %5015 = vmatprep.subr.bf16.mxu0 %v5014_v25 }
 0xb9d   :  { %5017 = vmatpush3.bf16.msra.mxu0 %v5014_v25 }
 0xb9e   :  { %5019 = vmatprep.subr.bf16.mxu0 %v5018_v31 }
 0xba1   :  { %5021 = vmatpush3.bf16.msra.mxu0 %v5018_v31 }
 0xba4   :  { %4501 = vmatmul.mubr.f32.vlgmr.msra.gmra.mrb[32].mxu0 %v5893_v42 }
 0xba5   :  { %4503 = vmatprep.mubr.f32.mxu0 %v5896_v43 }
 0xba8   :  { %4504 = vmatmul.mubr.f32.gmra.mrb[34].mxu0 %v5899_v44 }
 0xba9   :  { %4552 = vmatprep.mubr.msk.f32.mxu0 %vm448_vm0, %v2203_v33 }
 0xc77   :  { %v4502_v36 = vpop.f32.mrb[32].mxu0 }
 0xc78   :  { %v2305_v37 = vpop.f32.mrb[33].mxu0 }
 0xc79   :  { %v5054_v38 = vpack.c.bf16 %v4502_v36, %v2305_v37 }
 0xc7b   :  { %5056 = vmatprep.subr.msk.bf16.mxu0 %vm5751_vm1, %v5054_v38  ;;  %v4505_v39 = vpop.f32.mrb[34].mxu0 }
 0xc7c   :  { %5059 = vmatpush3.bf16.xpose.msk.msra.mxu0 %vm5751_vm1, %v5054_v38  ;;  %v2315_v40 = vpop.f32.mrb[35].mxu0 }
 0xc7d   :  { %v5060_v41 = vpack.c.bf16 %v4505_v39, %v2315_v40 }
 0xc7f   :  { %5062 = vmatprep.subr.msk.bf16.mxu0 %vm5751_vm1, %v5060_v41 }
 0xc84   :  { %5065 = vmatpush3.bf16.xpose.msk.msra.mxu0 %vm5751_vm1, %v5060_v41 }
 0xc85   :  { %5067 = vmatprep.subr.bf16.mxu0 %v5066_v46 }
 0xc8b   :  { %4553 = vmatmul.mubr.msk.f32.vlgmr.msra.gmra.mrb[36].mxu0 %vm448_vm0, %v4464_v32 }
 0xc8c   :  { %4555 = vmatprep.mubr.msk.f32.mxu0 %vm448_vm0, %v2213_v35  ;;  %5069 = vmatpush3.bf16.msra.mxu0 %v5066_v46 }
 0xc8d   :  { %5071 = vmatprep.subr.bf16.mxu0 %v5070_v52 }
 0xc8f   :  { %4556 = vmatmul.mubr.msk.f32.gmra.mrb[38].mxu0 %vm448_vm0, %v4467_v34 }
 0xc90   :  { %5073 = vmatpush3.bf16.msra.mxu0 %v5070_v52  ;;  %v2881_v52 = vld [vmem:[#allocation8 + $0xb8] sm:$0xff] }
 0xc91   :  { %5075 = vmatprep.subr.bf16.mxu0 %v5074_v56  ;;  %v5122_v55 = vpack.c.bf16 %v2881_v52, %v2877_v48  ;;  %v2913_v52 = vld [vmem:[#allocation8 + $0x1b8] sm:$0xff] }
 0xd5e   :  { %v4554_v30 = vpop.f32.mrb[36].mxu0 }
 0xd5f   :  { %v2522_v3 = vadd.f32 %v5320_v2, %v4554_v30  ;;  %v2516_v4 = vpop.f32.mrb[37].mxu0 }
 0xd60   :  { %v2517_v5 = vadd.f32 %v5321_v1, %v2516_v4  ;;  %v3532_v1 = vld [vmem:[#allocation11] ss:$0 sm:$0xff] }
 0xd61   :  { %v2538_v6 = vsel %vm448_vm0, %v2522_v3, -inf }
 0xd62   :  { %2539 = vmax.xlane.f32.xlu1 %v2538_v6  ;;  %v4557_v7 = vpop.f32.mrb[38].mxu0  ;;  %v2535_v8 = vsel %vm448_vm0, %v2517_v5, -inf }
 0xd63   :  { %v2532_v49 = vadd.f32 %v5322_v9, %v4557_v7  ;;  %v2526_v50 = vpop.f32.mrb[39].mxu0  ;;  %2536 = vmax.xlane.f32.xlu0 %v2535_v8 }
 0xd64   :  { %v2527_v10 = vadd.f32 %v5323_v51, %v2526_v50 }
 0xd65   :  { %v2544_v11 = vsel %vm448_vm0, %v2532_v49, -inf }
 0xd66   :  { %2545 = vmax.xlane.f32.xlu1 %v2544_v11  ;;  %v2541_v12 = vsel %vm448_vm0, %v2527_v10, -inf }
 0xd67   :  { %2542 = vmax.xlane.f32.xlu0 %v2541_v12 }
 0xdef   :  { %v2540_v13 = vpop.xlane.xlu1 %2539 }
 0xdf0   :  { %v2548_v14 = vsub.f32 %v2522_v3, %v2540_v13  ;;  %v2537_v15 = vpop.xlane.xlu0 %2536 }
 0xdf1   :  { %v2547_v16 = vsub.f32 %v2517_v5, %v2537_v15 }
 0xdf2   :  { %v2553_v22 = vmul.f32 1.442695, %v2548_v14  ;;  %v2861_v14 = vld [vmem:[#allocation8 + $0x18] sm:$0xff] }
 0xdf3   :  { %v2551_v23 = vmul.f32 1.442695, %v2547_v16  ;;  %v2546_v25 = vpop.xlane.xlu1 %2545  ;;  %v2865_v16 = vld [vmem:[#allocation8 + $0x38] sm:$0xff] }
 0xdf4   :  { %5284 = vpow2.f32 %v2553_v22  ;;  %v2550_v27 = vsub.f32 %v2532_v49, %v2546_v25  ;;  %v2543_v28 = vpop.xlane.xlu0 %2542  ;;  %v2858_v22 = vld [vmem:[#allocation8] sm:$0xff]  ;;  %v5114_v25 = vpack.c.bf16 %v2865_v16, %v2861_v14  ;;  %v2893_v14 = vld [vmem:[#allocation8 + $0x118] sm:$0xff] }
 0xdf5   :  { %5286 = vpow2.f32 %v2551_v23  ;;  %v2549_v31 = vsub.f32 %v2527_v10, %v2543_v28  ;;  %v2862_v23 = vld [vmem:[#allocation8 + $0x20] sm:$0xff]  ;;  %v2860_v28 = vld [vmem:[#allocation8 + $0x10] sm:$0xff]  ;;  %v2897_v16 = vld [vmem:[#allocation8 + $0x138] sm:$0xff] }
 0xdf6   :  { %v2557_v32 = vmul.f32 1.442695, %v2550_v27  ;;  %v5084_v27 = vpack.c.bf16 %v2862_v23, %v2858_v22  ;;  %v2890_v22 = vld [vmem:[#allocation8 + $0x100] sm:$0xff] }
 0xdf7   :  { %v2555_v33 = vmul.f32 1.442695, %v2549_v31  ;;  %v2864_v31 = vld [vmem:[#allocation8 + $0x30] sm:$0xff]  ;;  %v2894_v23 = vld [vmem:[#allocation8 + $0x120] sm:$0xff] }
 0xdf8   :  { %5288 = vpow2.f32 %v2557_v32  ;;  %v5116_v32 = vpack.c.bf16 %v2864_v31, %v2860_v28  ;;  %v2892_v28 = vld [vmem:[#allocation8 + $0x110] sm:$0xff] }
 0xdf9   :  { %5290 = vpow2.f32 %v2555_v33  ;;  %v2869_v33 = vld [vmem:[#allocation8 + $0x58] sm:$0xff]  ;;  %v2896_v31 = vld [vmem:[#allocation8 + $0x130] sm:$0xff] }
 0xdfe   :  { %v5285_v34 = vpop.eup %5284 }
 0xdff   :  { %v5287_v35 = vpop.eup %5286  ;;  %v2562_v36 = vsel %vm448_vm0, %v5285_v34, 0.0 }
 0xe00   :  { %2563 = vadd.xlane.f32.xlu1 %v2562_v36  ;;  %v2559_v37 = vsel %vm448_vm0, %v5287_v35, 0.0 }
 0xe01   :  { %2560 = vadd.xlane.f32.xlu0 %v2559_v37  ;;  %v2866_v37 = vld [vmem:[#allocation8 + $0x40] sm:$0xff] }
 0xe02   :  { %v5289_v38 = vpop.eup %5288 }
 0xe03   :  { %v5291_v39 = vpop.eup %5290  ;;  %v2568_v40 = vsel %vm448_vm0, %v5289_v38, 0.0 }
 0xe04   :  { %2569 = vadd.xlane.f32.xlu1 %v2568_v40  ;;  %v2565_v41 = vsel %vm448_vm0, %v5291_v39, 0.0 }
 0xe05   :  { %2566 = vadd.xlane.f32.xlu0 %v2565_v41  ;;  %v2872_v41 = vld [vmem:[#allocation8 + $0x70] sm:$0xff] }
 0xe8d   :  { %v2564_v54 = vpop.xlane.xlu1 %2563 }
 0xe8e   :  { %5292 = vrcp.f32 %v2564_v54  ;;  %v2561_v57 = vpop.xlane.xlu0 %2560  ;;  %v2876_v54 = vld [vmem:[#allocation8 + $0x90] sm:$0xff] }
 0xe8f   :  { %5294 = vrcp.f32 %v2561_v57  ;;  %v2880_v57 = vld [vmem:[#allocation8 + $0xb0] sm:$0xff] }
 0xe91   :  { %v2570_v17 = vpop.xlane.xlu1 %2569 }
 0xe92   :  { %5296 = vrcp.f32 %v2570_v17  ;;  %v2567_v26 = vpop.xlane.xlu0 %2566 }
 0xe93   :  { %5298 = vrcp.f32 %v2567_v26  ;;  %v5124_v26 = vpack.c.bf16 %v2880_v57, %v2876_v54  ;;  %v2908_v57 = vld [vmem:[#allocation8 + $0x190] sm:$0xff] }
 0xe98   :  { %v5293_v58 = vpop.eup %5292 }
 0xe99   :  { %v5295_v59 = vpop.eup %5294  ;;  %v2576_v63 = vmul.f32 %v5293_v58, %v5285_v34  ;;  %v2873_v34 = vld [vmem:[#allocation8 + $0x78] sm:$0xff] }
 0xe9a   :  { %v2575_v60 = vmul.f32 %v5295_v59, %v5287_v35  ;;  %v5118_v36 = vpack.c.bf16 %v2873_v34, %v2869_v33  ;;  %v2901_v33 = vld [vmem:[#allocation8 + $0x158] sm:$0xff] }
 0xe9c   :  { %v5297_v19 = vpop.eup %5296  ;;  %4566 = vmatprep.mubr.msk.f32.mxu0 %vm448_vm0, %v2575_v60 }
 0xe9d   :  { %v5299_v29 = vpop.eup %5298  ;;  %4567 = vmatmul.mubr.msk.f32.vlgmr.msra.gmra.mrb[40].mxu0 %vm448_vm0, %v2576_v63  ;;  %v2578_v0 = vmul.f32 %v5297_v19, %v5289_v38  ;;  %v2870_v38 = vld [vmem:[#allocation8 + $0x60] sm:$0xff] }
 0xe9e   :  { %v2577_v62 = vmul.f32 %v5299_v29, %v5291_v39  ;;  %5077 = vmatpush3.bf16.msra.mxu0 %v5074_v56  ;;  %v2868_v39 = vld [vmem:[#allocation8 + $0x50] sm:$0xff]  ;;  %v5088_v40 = vpack.c.bf16 %v2870_v38, %v2866_v37  ;;  %v2878_v56 = vld [vmem:[#allocation8 + $0xa0] sm:$0xff] }
 0xe9f   :  { %5079 = vmatprep.subr.bf16.mxu0 %v5078_v61  ;;  %v5120_v46 = vpack.c.bf16 %v2872_v41, %v2868_v39  ;;  %v5092_v17 = vpack.c.bf16 %v2878_v56, %v2874_v53  ;;  %v2902_v37 = vld [vmem:[#allocation8 + $0x160] sm:$0xff]  ;;  %v2904_v41 = vld [vmem:[#allocation8 + $0x170] sm:$0xff] }
 0xea0   :  { %4569 = vmatprep.mubr.msk.f32.mxu0 %vm448_vm0, %v2577_v62  ;;  %v2906_v53 = vld [vmem:[#allocation8 + $0x180] sm:$0xff] }
 0xea1   :  { %4570 = vmatmul.mubr.msk.f32.gmra.mrb[42].mxu0 %vm448_vm0, %v2578_v0 }
 0xea2   :  { %5081 = vmatpush3.bf16.msra.mxu0 %v5078_v61 }
 0xea3   :  { %5115 = vmatprep.subr.bf16.mxu0 %v5114_v25  ;;  %v5130_v25 = vpack.c.bf16 %v2897_v16, %v2893_v14 }
 0xf70   :  { %v4568_v30 = vpop.f32.mrb[40].mxu0 }
 0xf71   :  { %v2657_v2 = vpop.f32.mrb[41].mxu0 }
 0xf72   :  { %4580 = vmatprep.mubr.msk.f32.mxu0 %vm448_vm0, %v2657_v2 }
 0xf73   :  { %4581 = vmatmul.mubr.msk.f32.vlgmr.msra.gmra.mrb[16].mxu0 %vm448_vm0, %v4568_v30 }
 0xf74   :  { %v4571_v3 = vpop.f32.mrb[42].mxu0  ;;  %5117 = vmatpush1.bf16.msra.mxu0 %v5116_v32  ;;  %v2899_v32 = vld [vmem:[#allocation8 + $0x148] sm:$0xff] }
 0xf75   :  { %v2667_v4 = vpop.f32.mrb[43].mxu0  ;;  %5119 = vmatprep.subr.bf16.mxu0 %v5118_v36  ;;  %v2898_v36 = vld [vmem:[#allocation8 + $0x140] sm:$0xff] }
 0xf76   :  { %4583 = vmatprep.mubr.msk.f32.mxu0 %vm448_vm0, %v2667_v4  ;;  %v5104_v39 = vpack.c.bf16 %v2902_v37, %v2898_v36  ;;  %v3156_v36 = vld [vmem:[#allocation10 + $0x90] sm:$0xff] }
 0xf77   :  { %4584 = vmatmul.mubr.msk.f32.gmra.mrb[18].mxu0 %vm448_vm0, %v4571_v3 }
 0xf78   :  { %5121 = vmatpush1.bf16.msra.mxu0 %v5120_v46  ;;  %v2911_v46 = vld [vmem:[#allocation8 + $0x1a8] sm:$0xff] }
 0xf79   :  { %5123 = vmatprep.subr.bf16.mxu0 %v5122_v55  ;;  %v5106_v48 = vpack.c.bf16 %v2911_v46, %v2907_v20  ;;  %v2910_v55 = vld [vmem:[#allocation8 + $0x1a0] sm:$0xff]  ;;  %v3140_v20 = vld [vmem:[#allocation10 + $0x10] sm:$0xff] }
 0xf7a   :  { %v5108_v54 = vpack.c.bf16 %v2910_v55, %v2906_v53  ;;  %v3173_v53 = vld [vmem:[#allocation10 + $0x118] sm:$0xff] }
 0xf7c   :  { %5125 = vmatpush1.bf16.msra.mxu0 %v5124_v26 }
0x1046   :  { %v4582_v5 = vpop.f32.mrb[16].mxu0 }
0x1047   :  { %v2788_v6 = vadd.f32 %v4582_v5, %v3532_v1  ;;  %v2759_v7 = vpop.f32.mrb[17].mxu0  ;;  %v2883_v5 = vld [vmem:[#allocation8 + $0xc8] sm:$0xff] }
0x1048   :  { %v2787_v8 = vadd.f32 %v3532_v1, %v2759_v7  ;;  %v2885_v7 = vld [vmem:[#allocation8 + $0xd8] sm:$0xff] }
0x1049   :  { %v5963_v9 = vadd.f32 %v5893_v42, %v2788_v6  ;;  %v2859_v42 = vld [vmem:[#allocation8 + $0x8] sm:$0xff] }
0x104a   :  { %v4585_v49 = vpop.f32.mrb[18].mxu0  ;;  %v5966_v50 = vadd.f32 %v5875_v18, %v2787_v8  ;;  %v2863_v18 = vld [vmem:[#allocation8 + $0x28] sm:$0xff] }
0x104b   :  { %v2790_v51 = vadd.f32 %v4585_v49, %v3532_v1  ;;  %2797 = vadd.xlane.f32.xlu1 %v5963_v9  ;;  %v2769_v10 = vpop.f32.mrb[19].mxu0  ;;  %v5082_v15 = vpack.c.bf16 %v2863_v18, %v2859_v42  ;;  %v2887_v6 = vld [vmem:[#allocation8 + $0xe8] sm:$0xff]  ;;  %v2882_v49 = vld [vmem:[#allocation8 + $0xc0] sm:$0xff] }
0x104c   :  { %v2789_v11 = vadd.f32 %v3532_v1, %v2769_v10  ;;  %2795 = vadd.xlane.f32.xlu0 %v5966_v50  ;;  %v5094_v8 = vpack.c.bf16 %v2887_v6, %v2883_v5  ;;  %v2891_v42 = vld [vmem:[#allocation8 + $0x108] sm:$0xff]  ;;  %v3154_v6 = vld [vmem:[#allocation10 + $0x80] sm:$0xff] }
0x104d   :  { %v5971_v12 = vadd.f32 %v5899_v44, %v2790_v51  ;;  %v2867_v44 = vld [vmem:[#allocation8 + $0x48] sm:$0xff]  ;;  %5083 = vmatprep.subr.bf16.mxu1 %v5082_v15 }
0x104e   :  { %v5974_v13 = vadd.f32 %v5896_v43, %v2789_v11  ;;  %v2871_v43 = vld [vmem:[#allocation8 + $0x68] sm:$0xff]  ;;  %5085 = vmatpush1.bf16.msra.mxu1 %v5084_v27  ;;  %v2884_v11 = vld [vmem:[#allocation8 + $0xd0] sm:$0xff]  ;;  %v5100_v27 = vpack.c.bf16 %v2894_v23, %v2890_v22 }
0x104f   :  { %2801 = vadd.xlane.f32.xlu1 %v5971_v12  ;;  %v5086_v35 = vpack.c.bf16 %v2871_v43, %v2867_v44  ;;  %v2895_v18 = vld [vmem:[#allocation8 + $0x128] sm:$0xff]  ;;  %v5132_v44 = vpack.c.bf16 %v2896_v31, %v2892_v28  ;;  %v3533_v28 = vld [vmem:[#allocation11 + $0x1] ss:$0 sm:$0xff] }
0x1050   :  { %2799 = vadd.xlane.f32.xlu0 %v5974_v13  ;;  %v5098_v15 = vpack.c.bf16 %v2895_v18, %v2891_v42  ;;  %v2903_v43 = vld [vmem:[#allocation8 + $0x168] sm:$0xff] }
0x1051   :  { %5087 = vmatprep.subr.bf16.mxu1 %v5086_v35  ;;  %v5102_v34 = vpack.c.bf16 %v2903_v43, %v2899_v32  ;;  %v2905_v35 = vld [vmem:[#allocation8 + $0x178] sm:$0xff]  ;;  %v3138_v43 = vld [vmem:[#allocation10] sm:$0xff] }
0x1052   :  { %5089 = vmatpush1.bf16.msra.mxu1 %v5088_v40  ;;  %v5134_v38 = vpack.c.bf16 %v2905_v35, %v2901_v33  ;;  %v2900_v40 = vld [vmem:[#allocation8 + $0x150] sm:$0xff]  ;;  %v3139_v33 = vld [vmem:[#allocation10 + $0x8] sm:$0xff] }
0x1053   :  { %5091 = vmatprep.subr.bf16.mxu1 %v5090_v47  ;;  %v5136_v45 = vpack.c.bf16 %v2904_v41, %v2900_v40  ;;  %v2909_v47 = vld [vmem:[#allocation8 + $0x198] sm:$0xff]  ;;  %v3171_v35 = vld [vmem:[#allocation10 + $0x108] sm:$0xff] }
0x1054   :  { %v5138_v56 = vpack.c.bf16 %v2913_v52, %v2909_v47  ;;  %v3189_v40 = vld [vmem:[#allocation10 + $0x198] sm:$0xff]  ;;  %v3172_v52 = vld [vmem:[#allocation10 + $0x110] sm:$0xff] }
0x1056   :  { %5093 = vmatpush1.bf16.msra.mxu1 %v5092_v17  ;;  %v2912_v17 = vld [vmem:[#allocation8 + $0x1b0] sm:$0xff] }
0x1057   :  { %5095 = vmatprep.subr.bf16.mxu1 %v5094_v8  ;;  %v5140_v26 = vpack.c.bf16 %v2912_v17, %v2908_v57  ;;  %v3186_v8 = vld [vmem:[#allocation10 + $0x180] sm:$0xff]  ;;  %v3159_v17 = vld [vmem:[#allocation10 + $0xa8] sm:$0xff] }
0x1058   :  { %v3158_v57 = vld [vmem:[#allocation10 + $0xa0] sm:$0xff] }
0x10d8   :  { %v2798_v58 = vpop.xlane.xlu1 %2797 }
0x10d9   :  { %v2805_v24 = vmul.f32 0.0078125, %v2798_v58  ;;  %v2796_v21 = vpop.xlane.xlu0 %2795  ;;  %v2915_v58 = vld [vmem:[#allocation8 + $0x1c8] sm:$0xff] }
0x10da   :  { %v2804_v59 = vmul.f32 0.0078125, %v2796_v21  ;;  %v2917_v21 = vld [vmem:[#allocation8 + $0x1d8] sm:$0xff] }
0x10db   :  { %v5979_v60 = vsub.f32 %v5963_v9, %v2805_v24  ;;  %v2889_v9 = vld [vmem:[#allocation8 + $0xf8] sm:$0xff]  ;;  %v2919_v24 = vld [vmem:[#allocation8 + $0x1e8] sm:$0xff] }
0x10dc   :  { %v5982_v63 = vsub.f32 %v5966_v50, %v2804_v59  ;;  %v2802_v61 = vpop.xlane.xlu1 %2801  ;;  %v2886_v50 = vld [vmem:[#allocation8 + $0xe0] sm:$0xff]  ;;  %v5126_v51 = vpack.c.bf16 %v2889_v9, %v2885_v7  ;;  %v5110_v59 = vpack.c.bf16 %v2919_v24, %v2915_v58  ;;  %v3155_v7 = vld [vmem:[#allocation10 + $0x88] sm:$0xff]  ;;  %v5184_v24 = vpack.c.bf16 %v3173_v53, %v3172_v52 }
0x10dd   :  { %v2807_v19 = vmul.f32 0.0078125, %v2802_v61  ;;  %v2800_v29 = vpop.xlane.xlu0 %2799  ;;  %v2813_v62 = vmul.f32 %v5979_v60, %v5979_v60  ;;  %v5096_v10 = vpack.c.bf16 %v2886_v50, %v2882_v49  ;;  %v2921_v61 = vld [vmem:[#allocation8 + $0x1f8] sm:$0xff]  ;;  %v5146_v9 = vpack.c.bf16 %v3155_v7, %v3154_v6  ;;  %v3187_v49 = vld [vmem:[#allocation10 + $0x188] sm:$0xff]  ;;  %v3192_v7 = vld [vmem:[#allocation10 + $0x1b0] sm:$0xff] }
0x10de   :  { %v2806_v0 = vmul.f32 0.0078125, %v2800_v29  ;;  %v2812_v30 = vmul.f32 %v5982_v63, %v5982_v63  ;;  %5127 = vmatprep.subr.bf16.mxu0 %v5126_v51  ;;  %v2918_v29 = vld [vmem:[#allocation8 + $0x1e0] sm:$0xff]  ;;  %v5178_v50 = vpack.c.bf16 %v3187_v49, %v3186_v8  ;;  %v3191_v58 = vld [vmem:[#allocation10 + $0x1a8] sm:$0xff]  ;;  %v3161_v6 = vld [vmem:[#allocation10 + $0xb8] sm:$0xff] }
0x10df   :  { %v5989_v2 = vsub.f32 %v5971_v12, %v2807_v19  ;;  %2818 = vadd.xlane.f32.xlu1 %v2813_v62  ;;  %v2888_v12 = vld [vmem:[#allocation8 + $0xf0] sm:$0xff]  ;;  %5097 = vmatpush1.bf16.msra.mxu1 %v5096_v10  ;;  %v2914_v19 = vld [vmem:[#allocation8 + $0x1c0] sm:$0xff]  ;;  %v5142_v62 = vpack.c.bf16 %v2921_v61, %v2917_v21  ;;  %v3193_v8 = vld [vmem:[#allocation10 + $0x1b8] sm:$0xff] }
0x10e0   :  { %v5992_v3 = vsub.f32 %v5974_v13, %v2806_v0  ;;  %2816 = vadd.xlane.f32.xlu0 %v2812_v30  ;;  %v5128_v13 = vpack.c.bf16 %v2888_v12, %v2884_v11  ;;  %5099 = vmatprep.subr.bf16.mxu1 %v5098_v15  ;;  %v5112_v0 = vpack.c.bf16 %v2918_v29, %v2914_v19  ;;  %v2916_v30 = vld [vmem:[#allocation8 + $0x1d0] sm:$0xff]  ;;  %v3142_v19 = vld [vmem:[#allocation10 + $0x20] sm:$0xff]  ;;  %v3143_v29 = vld [vmem:[#allocation10 + $0x28] sm:$0xff] }
0x10e1   :  { %v2815_v4 = vmul.f32 %v5989_v2, %v5989_v2 }
0x10e2   :  { %v2814_v1 = vmul.f32 %v5992_v3, %v5992_v3  ;;  %5129 = vmatpush1.bf16.msra.mxu0 %v5128_v13 }
0x10e3   :  { %2822 = vadd.xlane.f32.xlu1 %v2815_v4  ;;  %5131 = vmatprep.subr.bf16.mxu0 %v5130_v25  ;;  %v2920_v4 = vld [vmem:[#allocation8 + $0x1f0] sm:$0xff] }
0x10e4   :  { %2820 = vadd.xlane.f32.xlu0 %v2814_v1  ;;  %5101 = vmatpush1.bf16.msra.mxu1 %v5100_v27  ;;  %v5546_v1 = vmov 0.0   ;;  %v5144_v5 = vpack.c.bf16 %v2920_v4, %v2916_v30  ;;  %v3174_v30 = vld [vmem:[#allocation10 + $0x120] sm:$0xff]  ;;  %v3175_v4 = vld [vmem:[#allocation10 + $0x128] sm:$0xff] }
0x10e5   :  { %5103 = vmatprep.subr.bf16.mxu1 %v5102_v34  ;;  %3008 = vmatprep.mubr.f32.mxu1 %v5546_v1  ;;  %v3170_v34 = vld [vmem:[#allocation10 + $0x100] sm:$0xff] }
0x10e6   :  { %5133 = vmatpush1.bf16.msra.mxu0 %v5132_v44  ;;  %3097 = vmatprep.mubr.f32.mxu0 %v5546_v1  ;;  %v6001_v44 = vld [vmem:[#allocation11 + $0x2] ss:$0 sm:$0xff] }
0x10e7   :  { %5135 = vmatprep.subr.bf16.mxu0 %v5134_v38  ;;  %v3157_v38 = vld [vmem:[#allocation10 + $0x98] sm:$0xff] }
0x10e8   :  { %5105 = vmatpush1.bf16.msra.mxu1 %v5104_v39  ;;  %v3188_v39 = vld [vmem:[#allocation10 + $0x190] sm:$0xff] }
0x10e9   :  { %5107 = vmatprep.subr.bf16.mxu1 %v5106_v48  ;;  %v5180_v48 = vpack.c.bf16 %v3171_v35, %v3170_v34  ;;  %v3164_v34 = vld [vmem:[#allocation10 + $0xd0] sm:$0xff]  ;;  %v3197_v35 = vld [vmem:[#allocation10 + $0x1d8] sm:$0xff] }
0x10ea   :  { %5137 = vmatpush1.bf16.msra.mxu0 %v5136_v45  ;;  %v5148_v45 = vpack.c.bf16 %v3139_v33, %v3138_v43  ;;  %v3178_v43 = vld [vmem:[#allocation10 + $0x140] sm:$0xff]  ;;  %v3179_v33 = vld [vmem:[#allocation10 + $0x148] sm:$0xff] }
0x10eb   :  { %5139 = vmatprep.subr.bf16.mxu0 %v5138_v56  ;;  %v5150_v56 = vpack.c.bf16 %v3157_v38, %v3156_v36  ;;  %v3148_v38 = vld [vmem:[#allocation10 + $0x50] sm:$0xff] }
0x10ec   :  { %5109 = vmatpush1.bf16.msra.mxu1 %v5108_v54  ;;  %v5182_v54 = vpack.c.bf16 %v3189_v40, %v3188_v39  ;;  %v3149_v39 = vld [vmem:[#allocation10 + $0x58] sm:$0xff] }
0x10ed   :  { %5111 = vmatprep.subr.bf16.mxu1 %v5110_v59  ;;  %v5168_v52 = vpack.c.bf16 %v3149_v39, %v3148_v38 }
0x10ee   :  { %5141 = vmatpush1.bf16.msra.mxu0 %v5140_v26  ;;  %v3190_v26 = vld [vmem:[#allocation10 + $0x1a0] sm:$0xff] }
0x10ef   :  { %5143 = vmatprep.subr.bf16.mxu0 %v5142_v62  ;;  %v5154_v62 = vpack.c.bf16 %v3159_v17, %v3158_v57  ;;  %v3151_v57 = vld [vmem:[#allocation10 + $0x68] sm:$0xff]  ;;  %v3182_v17 = vld [vmem:[#allocation10 + $0x160] sm:$0xff] }
0x10f0   :  { %5113 = vmatpush1.bf16.msra.mxu1 %v5112_v0  ;;  %v5186_v0 = vpack.c.bf16 %v3191_v58, %v3190_v26  ;;  %v3183_v58 = vld [vmem:[#allocation10 + $0x168] sm:$0xff] }
0x10f1   :  { %5147 = vmatprep.subr.bf16.mxu1 %v5146_v9 }
0x10f2   :  { %5145 = vmatpush1.bf16.msra.mxu0 %v5144_v5  ;;  %v3160_v5 = vld [vmem:[#allocation10 + $0xb0] sm:$0xff] }
0x10f3   :  { %5179 = vmatprep.subr.bf16.mxu0 %v5178_v50  ;;  %v5188_v50 = vpack.c.bf16 %v3175_v4, %v3174_v30 }
0x116c   :  { %v2819_v51 = vpop.xlane.xlu1 %2818 }
0x116d   :  { %v2825_v10 = vmul.f32 0.0078125, %v2819_v51  ;;  %v2817_v11 = vpop.xlane.xlu0 %2816  ;;  %v3144_v51 = vld [vmem:[#allocation10 + $0x30] sm:$0xff] }
0x116e   :  { %v2824_v12 = vmul.f32 0.0078125, %v2817_v11  ;;  %v5158_v11 = vpack.c.bf16 %v3161_v6, %v3160_v5  ;;  %v3184_v5 = vld [vmem:[#allocation10 + $0x170] sm:$0xff]  ;;  %v3185_v6 = vld [vmem:[#allocation10 + $0x178] sm:$0xff] }
0x116f   :  { %v2829_v13 = vadd.f32 1e-05, %v2825_v10  ;;  %v3145_v10 = vld [vmem:[#allocation10 + $0x38] sm:$0xff] }
0x1170   :  { %v2828_v42 = vadd.f32 1e-05, %v2824_v12  ;;  %v2823_v18 = vpop.xlane.xlu1 %2822  ;;  %v5190_v12 = vpack.c.bf16 %v3193_v8, %v3192_v7  ;;  %v5208_v7 = vpack.c.bf16 %v3185_v6, %v3184_v5  ;;  %v2924_v8 = vlaneseq }
0x1171   :  { %5300 = vrsqrt.f32 %v2829_v13  ;;  %v2827_v14 = vmul.f32 0.0078125, %v2823_v18  ;;  %v2821_v15 = vpop.xlane.xlu0 %2820  ;;  %v3176_v13 = vld [vmem:[#allocation10 + $0x130] sm:$0xff]  ;;  %v3162_v18 = vld [vmem:[#allocation10 + $0xc0] sm:$0xff] }
0x1172   :  { %5302 = vrsqrt.f32 %v2828_v42  ;;  %v2826_v16 = vmul.f32 0.0078125, %v2821_v15  ;;  %v3177_v42 = vld [vmem:[#allocation10 + $0x138] sm:$0xff]  ;;  %v3194_v15 = vld [vmem:[#allocation10 + $0x1c0] sm:$0xff] }
0x1173   :  { %v2831_v22 = vadd.f32 1e-05, %v2827_v14  ;;  %v3163_v14 = vld [vmem:[#allocation10 + $0xc8] sm:$0xff] }
0x1174   :  { %v2830_v23 = vadd.f32 1e-05, %v2826_v16  ;;  %v3195_v16 = vld [vmem:[#allocation10 + $0x1c8] sm:$0xff] }
0x1176   :  { %5304 = vrsqrt.f32 %v2830_v23  ;;  %v5160_v23 = vpack.c.bf16 %v3145_v10, %v3144_v51  ;;  %v2922_v51 = vld [vmem:[#allocation13] sm:$0xf] }
0x1177   :  { %5306 = vrsqrt.f32 %v2831_v22 }
0x117b   :  { %v5301_v25 = vpop.eup %5300 }
0x117c   :  { %v5303_v27 = vpop.eup %5302  ;;  %v2837_v32 = vmul.f32 %v5301_v25, %v5979_v60  ;;  %v3141_v60 = vld [vmem:[#allocation10 + $0x18] sm:$0xff]  ;;  %v5192_v25 = vpack.c.bf16 %v3177_v42, %v3176_v13 }
0x117d   :  { %v2836_v31 = vmul.f32 %v5303_v27, %v5982_v63  ;;  %v3146_v27 = vld [vmem:[#allocation10 + $0x40] sm:$0xff] }
0x117e   :  { %v2846_v63 = vmul.f32 %v3533_v28, %v2837_v32  ;;  %v5194_v32 = vpack.c.bf16 %v3195_v16, %v3194_v15 }
0x117f   :  { %v2845_v37 = vmul.f32 %v3533_v28, %v2836_v31  ;;  %v5162_v31 = vpack.c.bf16 %v3163_v14, %v3162_v18 }
0x1180   :  { %v5305_v41 = vpop.eup %5304  ;;  %v6013_v21 = vadd.f32 %v6001_v44, %v2846_v63  ;;  %v3166_v63 = vld [vmem:[#allocation10 + $0xe0] sm:$0xff] }
0x1181   :  { %v6005_v46 = vadd.f32 %v6001_v44, %v2845_v37  ;;  %v2838_v47 = vmul.f32 %v5305_v41, %v5992_v3  ;;  %v5307_v55 = vpop.eup %5306  ;;  %v5152_v3 = vpack.c.bf16 %v3141_v60, %v3140_v20  ;;  %v5196_v37 = vpack.c.bf16 %v3179_v33, %v3178_v43  ;;  %v3181_v20 = vld [vmem:[#allocation10 + $0x158] sm:$0xff]  ;;  %v3199_v60 = vld [vmem:[#allocation10 + $0x1e8] sm:$0xff] }
0x1182   :  { %v2839_v61 = vmul.f32 %v5307_v55, %v5989_v2  ;;  %v5156_v2 = vpack.c.bf16 %v3143_v29, %v3142_v19  ;;  %v3201_v29 = vld [vmem:[#allocation10 + $0x1f8] sm:$0xff] }
0x1183   :  { %3009 = vmatmul.mubr.f32.vlgmr.msra.gmra.mrb[40].mxu1 %v6005_v46  ;;  %3098 = vmatmul.mubr.f32.vlgmr.msra.gmra.mrb[44].mxu0 %v6005_v46  ;;  %v2847_v59 = vmul.f32 %v3533_v28, %v2838_v47  ;;  %v3167_v47 = vld [vmem:[#allocation10 + $0xe8] sm:$0xff] }
0x1184   :  { %3014 = vmatprep.mubr.f32.mxu1 %v5546_v1  ;;  %3103 = vmatprep.mubr.f32.mxu0 %v5546_v1  ;;  %v2848_v49 = vmul.f32 %v3533_v28, %v2839_v61  ;;  %v3147_v28 = vld [vmem:[#allocation10 + $0x48] sm:$0xff]  ;;  %v5170_v55 = vpack.c.bf16 %v3167_v47, %v3166_v63  ;;  %v3200_v61 = vld [vmem:[#allocation10 + $0x1f0] sm:$0xff] }
0x1185   :  { %5149 = vmatpush3.bf16.msra.mxu1 %v5148_v45  ;;  %5181 = vmatpush3.bf16.msra.mxu0 %v5180_v48  ;;  %v6021_v9 = vadd.f32 %v6001_v44, %v2847_v59  ;;  %v5164_v36 = vpack.c.bf16 %v3147_v28, %v3146_v27  ;;  %v3180_v45 = vld [vmem:[#allocation10 + $0x150] sm:$0xff]  ;;  %v3198_v48 = vld [vmem:[#allocation10 + $0x1e0] sm:$0xff]  ;;  %v3169_v59 = vld [vmem:[#allocation10 + $0xf8] sm:$0xff]  ;;  %v5206_v30 = vpack.c.bf16 %v3201_v29, %v3200_v61 }
0x1186   :  { %5151 = vmatprep.subr.bf16.mxu1 %v5150_v56  ;;  %5183 = vmatprep.subr.bf16.mxu0 %v5182_v54  ;;  %v6028_v22 = vadd.f32 %v6001_v44, %v2848_v49  ;;  %v3196_v44 = vld [vmem:[#allocation10 + $0x1d0] sm:$0xff]  ;;  %v5200_v53 = vpack.c.bf16 %v3181_v20, %v3180_v45  ;;  %v5202_v56 = vpack.c.bf16 %v3199_v60, %v3198_v48  ;;  %v3150_v54 = vld [vmem:[#allocation10 + $0x60] sm:$0xff] }
0x1187   :  { %3015 = vmatmul.mubr.f32.gmra.mrb[42].mxu1 %v6013_v21  ;;  %3104 = vmatmul.mubr.f32.gmra.mrb[46].mxu0 %v6013_v21  ;;  %v5198_v41 = vpack.c.bf16 %v3197_v35, %v3196_v44  ;;  %v5172_v26 = vpack.c.bf16 %v3151_v57, %v3150_v54 }
0x1188   :  { %3020 = vmatprep.mubr.f32.mxu1 %v5546_v1  ;;  %3109 = vmatprep.mubr.f32.mxu0 %v5546_v1 }
0x1189   :  { %5153 = vmatpush3.bf16.msra.mxu1 %v5152_v3  ;;  %5185 = vmatpush3.bf16.msra.mxu0 %v5184_v24  ;;  %v5204_v3 = vpack.c.bf16 %v3183_v58, %v3182_v17  ;;  %v3168_v24 = vld [vmem:[#allocation10 + $0xf0] sm:$0xff] }
0x118a   :  { %5155 = vmatprep.subr.bf16.mxu1 %v5154_v62  ;;  %5187 = vmatprep.subr.bf16.mxu0 %v5186_v0  ;;  %v5174_v19 = vpack.c.bf16 %v3169_v59, %v3168_v24  ;;  %v3152_v62 = vld [vmem:[#allocation10 + $0x70] sm:$0xff]  ;;  %v3153_v0 = vld [vmem:[#allocation10 + $0x78] sm:$0xff] }
0x118b   :  { %3021 = vmatmul.mubr.f32.gmra.mrb[44].mxu1 %v6021_v9  ;;  %3110 = vmatmul.mubr.f32.gmra.mrb[48].mxu0 %v6021_v9  ;;  %v5176_v4 = vpack.c.bf16 %v3153_v0, %v3152_v62 }
0x118c   :  { %3026 = vmatprep.mubr.f32.mxu1 %v5546_v1  ;;  %3115 = vmatprep.mubr.f32.mxu0 %v5546_v1  ;;  %v3165_v1 = vld [vmem:[#allocation10 + $0xd8] sm:$0xff] }
0x118d   :  { %5157 = vmatpush3.bf16.msra.mxu1 %v5156_v2  ;;  %5189 = vmatpush3.bf16.msra.mxu0 %v5188_v50  ;;  %v5166_v40 = vpack.c.bf16 %v3165_v1, %v3164_v34  ;;  %v2925_v2 = vshrl.u32 %v2924_v8, 7 }
0x118e   :  { %5159 = vmatprep.subr.bf16.mxu1 %v5158_v11  ;;  %5191 = vmatprep.subr.bf16.mxu0 %v5190_v12 }
0x118f   :  { %3027 = vmatmul.mubr.f32.gmra.mrb[46].mxu1 %v6028_v22  ;;  %3116 = vmatmul.mubr.f32.gmra.mrb[50].mxu0 %v6028_v22  ;;  %v2926_v49 = vsub.s32 0, %v2925_v2  ;;  %v2934_v50 = vsub.s32 2, %v2925_v2  ;;  %v2930_v10 = vsub.s32 1, %v2925_v2  ;;  %v2938_v11 = vsub.s32 3, %v2925_v2  ;;  %v3535_v2 = vld [vmem:[#allocation11 + $0x3] ss:$0 sm:$0xff] }
0x1191   :  { %5161 = vmatpush3.bf16.msra.mxu1 %v5160_v23  ;;  %5193 = vmatpush3.bf16.msra.mxu0 %v5192_v25  ;;  %v2927_v12 = vrot.slane %v2922_v51, %v2926_v49  ;;  %v2935_v13 = vrot.slane %v2922_v51, %v2934_v50  ;;  %v2931_v42 = vrot.slane %v2922_v51, %v2930_v10 }
0x1192   :  { %5163 = vmatprep.subr.bf16.mxu1 %v5162_v31  ;;  %5195 = vmatprep.subr.bf16.mxu0 %v5194_v32  ;;  %v2939_v18 = vrot.slane %v2922_v51, %v2938_v11 }
0x1195   :  { %5165 = vmatpush3.bf16.msra.mxu1 %v5164_v36  ;;  %5197 = vmatpush3.bf16.msra.mxu0 %v5196_v37 }
0x1196   :  { %5167 = vmatprep.subr.bf16.mxu1 %v5166_v40  ;;  %5199 = vmatprep.subr.bf16.mxu0 %v5198_v41 }
0x1199   :  { %5169 = vmatpush3.bf16.msra.mxu1 %v5168_v52  ;;  %5201 = vmatpush3.bf16.msra.mxu0 %v5200_v53 }
0x119a   :  { %5171 = vmatprep.subr.bf16.mxu1 %v5170_v55  ;;  %5203 = vmatprep.subr.bf16.mxu0 %v5202_v56 }
0x119d   :  { %5173 = vmatpush3.bf16.msra.mxu1 %v5172_v26  ;;  %5205 = vmatpush3.bf16.msra.mxu0 %v5204_v3 }
0x119e   :  { %5175 = vmatprep.subr.bf16.mxu1 %v5174_v19  ;;  %5207 = vmatprep.subr.bf16.mxu0 %v5206_v30 }
0x11a1   :  { %5177 = vmatpush3.bf16.msra.mxu1 %v5176_v4  ;;  %5209 = vmatpush3.bf16.msra.mxu0 %v5208_v7 }
0x1256   :  { %v3010_v14 = vpop.f32.mrb[40].mxu1  ;;  %v3099_v15 = vpop.f32.mrb[44].mxu0 }
0x1257   :  { %v3011_v16 = vadd.f32 %v3010_v14, %v2927_v12  ;;  %v3100_v23 = vadd.f32 %v3099_v15, %v2935_v13  ;;  %v3012_v25 = vpop.f32.mrb[41].mxu1  ;;  %v3101_v27 = vpop.f32.mrb[45].mxu0 }
0x1258   :  { %v3013_v28 = vadd.f32 %v3012_v25, %v2931_v42  ;;  %v3102_v31 = vadd.f32 %v3101_v27, %v2939_v18 }
0x1259   :  { %v3122_v1 = vmax.f32 %v3011_v16, 0.0  ;;  %v3124_v44 = vmax.f32 %v3100_v23, 0.0 }
0x125a   :  { %v3123_v32 = vmax.f32 %v3013_v28, 0.0  ;;  %v3125_v43 = vmax.f32 %v3102_v31, 0.0  ;;  %v3016_v33 = vpop.f32.mrb[42].mxu1  ;;  %v3105_v34 = vpop.f32.mrb[46].mxu0 }
0x125b   :  { %v3017_v35 = vadd.f32 %v3016_v33, %v2927_v12  ;;  %v3106_v36 = vadd.f32 %v3105_v34, %v2935_v13  ;;  %v3018_v37 = vpop.f32.mrb[43].mxu1  ;;  %v3107_v38 = vpop.f32.mrb[47].mxu0 }
0x125c   :  { %v3019_v39 = vadd.f32 %v3018_v37, %v2931_v42  ;;  %v3108_v40 = vadd.f32 %v3107_v38, %v2939_v18  ;;  %3271 = vmatprep.mubr.f32.mxu1 %v3123_v32  ;;  %3356 = vmatprep.mubr.f32.mxu0 %v3125_v43 }
0x125d   :  { %3272 = vmatmul.mubr.f32.vlgmr.msra.gmra.mrb[48].mxu1 %v3122_v1  ;;  %3357 = vmatmul.mubr.f32.vlgmr.msra.gmra.mrb[52].mxu0 %v3124_v44  ;;  %v3126_v47 = vmax.f32 %v3017_v35, 0.0  ;;  %v3128_v48 = vmax.f32 %v3106_v36, 0.0 }
0x125e   :  { %v3127_v41 = vmax.f32 %v3019_v39, 0.0  ;;  %v3129_v45 = vmax.f32 %v3108_v40, 0.0  ;;  %v3022_v20 = vpop.f32.mrb[44].mxu1  ;;  %v3111_v63 = vpop.f32.mrb[48].mxu0 }
0x125f   :  { %v3023_v60 = vadd.f32 %v3022_v20, %v2927_v12  ;;  %v3112_v52 = vadd.f32 %v3111_v63, %v2935_v13  ;;  %v3024_v53 = vpop.f32.mrb[45].mxu1  ;;  %v3113_v55 = vpop.f32.mrb[49].mxu0 }
0x1260   :  { %v3025_v56 = vadd.f32 %v3024_v53, %v2931_v42  ;;  %v3114_v54 = vadd.f32 %v3113_v55, %v2939_v18  ;;  %3276 = vmatprep.mubr.f32.mxu1 %v3127_v41  ;;  %3361 = vmatprep.mubr.f32.mxu0 %v3129_v45 }
0x1261   :  { %3277 = vmatmul.mubr.f32.gmra.mrb[50].mxu1 %v3126_v47  ;;  %3362 = vmatmul.mubr.f32.gmra.mrb[54].mxu0 %v3128_v48  ;;  %v3130_v3 = vmax.f32 %v3023_v60, 0.0  ;;  %v3132_v24 = vmax.f32 %v3112_v52, 0.0 }
0x1262   :  { %v3131_v57 = vmax.f32 %v3025_v56, 0.0  ;;  %v3133_v17 = vmax.f32 %v3114_v54, 0.0  ;;  %v3028_v26 = vpop.f32.mrb[46].mxu1  ;;  %v3117_v58 = vpop.f32.mrb[50].mxu0 }
0x1263   :  { %v3029_v59 = vadd.f32 %v3028_v26, %v2927_v12  ;;  %v3118_v61 = vadd.f32 %v3117_v58, %v2935_v13  ;;  %v3030_v19 = vpop.f32.mrb[47].mxu1  ;;  %v3119_v29 = vpop.f32.mrb[51].mxu0 }
0x1264   :  { %v3031_v62 = vadd.f32 %v3030_v19, %v2931_v42  ;;  %v3120_v0 = vadd.f32 %v3119_v29, %v2939_v18  ;;  %3281 = vmatprep.mubr.f32.mxu1 %v3131_v57  ;;  %3366 = vmatprep.mubr.f32.mxu0 %v3133_v17 }
0x1265   :  { %3282 = vmatmul.mubr.f32.gmra.mrb[52].mxu1 %v3130_v3  ;;  %3367 = vmatmul.mubr.f32.gmra.mrb[56].mxu0 %v3132_v24  ;;  %v3134_v5 = vmax.f32 %v3029_v59, 0.0  ;;  %v3136_v6 = vmax.f32 %v3118_v61, 0.0 }
0x1266   :  { %v3135_v30 = vmax.f32 %v3031_v62, 0.0  ;;  %v3137_v4 = vmax.f32 %v3120_v0, 0.0 }
0x1268   :  { %3286 = vmatprep.mubr.f32.mxu1 %v3135_v30  ;;  %3371 = vmatprep.mubr.f32.mxu0 %v3137_v4 }
0x1269   :  { %3287 = vmatmul.mubr.f32.gmra.mrb[54].mxu1 %v3134_v5  ;;  %3372 = vmatmul.mubr.f32.gmra.mrb[58].mxu0 %v3136_v6 }
0x1330   :  { %v3906_v7 = vpop.f32.mrb[48].mxu1  ;;  %v3950_v8 = vpop.f32.mrb[52].mxu0 }
0x1331   :  { %v3907_v49 = vpop.f32.mrb[49].mxu1  ;;  %v3951_v50 = vpop.f32.mrb[53].mxu0 }
0x1332   :  { %v3908_v51 = vadd.f32 %v3907_v49, %v3906_v7  ;;  %v3952_v10 = vadd.f32 %v3951_v50, %v3950_v8  ;;  %v3537_v50 = vld [vmem:[#allocation11 + $0x5] ss:$0 sm:$0xff] }
0x1334   :  { %v3274_v11 = vadd.f32 %v3908_v51, %v3535_v2  ;;  %v3909_v12 = vpop.f32.mrb[50].mxu1  ;;  %v3953_v13 = vpop.f32.mrb[54].mxu0 }
0x1335   :  { %v3910_v42 = vpop.f32.mrb[51].mxu1  ;;  %v3954_v18 = vpop.f32.mrb[55].mxu0 }
0x1336   :  { %v3359_v14 = vadd.f32 %v3952_v10, %v3274_v11  ;;  %v3911_v15 = vadd.f32 %v3910_v42, %v3909_v12  ;;  %v3955_v16 = vadd.f32 %v3954_v18, %v3953_v13 }
0x1338   :  { %v3279_v23 = vadd.f32 %v3911_v15, %v3535_v2  ;;  %v3912_v25 = vpop.f32.mrb[52].mxu1  ;;  %v3956_v27 = vpop.f32.mrb[56].mxu0  ;;  %v3377_v28 = vadd.f32 %v3359_v14, %v6005_v46 }
0x1339   :  { %v3913_v31 = vpop.f32.mrb[53].mxu1  ;;  %v3957_v32 = vpop.f32.mrb[57].mxu0 }
0x133a   :  { %v3364_v43 = vadd.f32 %v3955_v16, %v3279_v23  ;;  %v3914_v33 = vadd.f32 %v3913_v31, %v3912_v25  ;;  %v3958_v34 = vadd.f32 %v3957_v32, %v3956_v27  ;;  %3381 = vadd.xlane.f32.xlu0 %v3377_v28 }
0x133c   :  { %v3284_v1 = vadd.f32 %v3914_v33, %v3535_v2  ;;  %v3915_v44 = vpop.f32.mrb[54].mxu1  ;;  %v3959_v35 = vpop.f32.mrb[58].mxu0  ;;  %v3378_v36 = vadd.f32 %v3364_v43, %v6013_v21 }
0x133d   :  { %v3916_v37 = vpop.f32.mrb[55].mxu1  ;;  %v3960_v38 = vpop.f32.mrb[59].mxu0 }
0x133e   :  { %v3369_v39 = vadd.f32 %v3958_v34, %v3284_v1  ;;  %v3917_v40 = vadd.f32 %v3916_v37, %v3915_v44  ;;  %v3961_v41 = vadd.f32 %v3960_v38, %v3959_v35  ;;  %3383 = vadd.xlane.f32.xlu1 %v3378_v36 }
0x1340   :  { %v3289_v45 = vadd.f32 %v3917_v40, %v3535_v2  ;;  %v3379_v46 = vadd.f32 %v3369_v39, %v6021_v9  ;;  %v3536_v2 = vld [vmem:[#allocation11 + $0x4] ss:$0 sm:$0xff] }
0x1342   :  { %v3374_v20 = vadd.f32 %v3961_v41, %v3289_v45  ;;  %3385 = vadd.xlane.f32.xlu0 %v3379_v46 }
0x1344   :  { %v3380_v63 = vadd.f32 %v3374_v20, %v6028_v22 }
0x1346   :  { %3387 = vadd.xlane.f32.xlu1 %v3380_v63 }
0x13c7   :  { %v3382_v47 = vpop.xlane.xlu0 %3381 }
0x13c8   :  { %v3389_v48 = vmul.f32 0.0078125, %v3382_v47 }
0x13ca   :  { %v3393_v60 = vsub.f32 %v3377_v28, %v3389_v48 }
0x13cb   :  { %v3384_v52 = vpop.xlane.xlu1 %3383 }
0x13cc   :  { %v3390_v53 = vmul.f32 0.0078125, %v3384_v52  ;;  %v3397_v21 = vmul.f32 %v3393_v60, %v3393_v60 }
0x13ce   :  { %v3394_v55 = vsub.f32 %v3378_v36, %v3390_v53  ;;  %3401 = vadd.xlane.f32.xlu0 %v3397_v21 }
0x13cf   :  { %v3386_v56 = vpop.xlane.xlu0 %3385 }
0x13d0   :  { %v3391_v54 = vmul.f32 0.0078125, %v3386_v56  ;;  %v3398_v57 = vmul.f32 %v3394_v55, %v3394_v55 }
0x13d2   :  { %v3395_v17 = vsub.f32 %v3379_v46, %v3391_v54  ;;  %3403 = vadd.xlane.f32.xlu1 %v3398_v57 }
0x13d3   :  { %v3388_v26 = vpop.xlane.xlu1 %3387 }
0x13d4   :  { %v3392_v9 = vmul.f32 0.0078125, %v3388_v26  ;;  %v3399_v58 = vmul.f32 %v3395_v17, %v3395_v17 }
0x13d6   :  { %v3396_v3 = vsub.f32 %v3380_v63, %v3392_v9  ;;  %3405 = vadd.xlane.f32.xlu0 %v3399_v58 }
0x13d8   :  { %v3400_v22 = vmul.f32 %v3396_v3, %v3396_v3 }
0x13da   :  { %3407 = vadd.xlane.f32.xlu1 %v3400_v22 }
0x145b   :  { %v3402_v24 = vpop.xlane.xlu0 %3401 }
0x145c   :  { %v3409_v59 = vmul.f32 0.0078125, %v3402_v24 }
0x145e   :  { %v3413_v61 = vadd.f32 1e-05, %v3409_v59 }
0x145f   :  { %v3404_v19 = vpop.xlane.xlu1 %3403 }
0x1460   :  { %5308 = vrsqrt.f32 %v3413_v61  ;;  %v3410_v29 = vmul.f32 0.0078125, %v3404_v19 }
0x1462   :  { %v3414_v62 = vadd.f32 1e-05, %v3410_v29 }
0x1463   :  { %v3406_v0 = vpop.xlane.xlu0 %3405 }
0x1464   :  { %5310 = vrsqrt.f32 %v3414_v62  ;;  %v3411_v30 = vmul.f32 0.0078125, %v3406_v0 }
0x1466   :  { %v3415_v4 = vadd.f32 1e-05, %v3411_v30 }
0x1467   :  { %v3408_v5 = vpop.xlane.xlu1 %3407 }
0x1468   :  { %5312 = vrsqrt.f32 %v3415_v4  ;;  %v3412_v6 = vmul.f32 0.0078125, %v3408_v5 }
0x146a   :  { %v5309_v7 = vpop.eup %5308  ;;  %v3416_v8 = vadd.f32 1e-05, %v3412_v6 }
0x146b   :  { %v3421_v49 = vmul.f32 %v5309_v7, %v3393_v60 }
0x146c   :  { %5314 = vrsqrt.f32 %v3416_v8 }
0x146d   :  { %v3430_v51 = vmul.f32 %v3536_v2, %v3421_v49 }
0x146e   :  { %v5311_v10 = vpop.eup %5310 }
0x146f   :  { %v3422_v11 = vmul.f32 %v5311_v10, %v3394_v55  ;;  %v3439_v12 = vadd.f32 %v3537_v50, %v3430_v51 }
0x1471   :  { %v3431_v13 = vmul.f32 %v3536_v2, %v3422_v11  ;;  %3443 = vst [vmem:[#allocation16] sm:$0xff] %v3439_v12 }
0x1472   :  { %v5313_v42 = vpop.eup %5312 }
0x1473   :  { %v3423_v18 = vmul.f32 %v5313_v42, %v3395_v17  ;;  %v3440_v14 = vadd.f32 %v3537_v50, %v3431_v13 }
0x1475   :  { %v3432_v15 = vmul.f32 %v3536_v2, %v3423_v18  ;;  %3444 = vst [vmem:[#allocation16 + $0x8] sm:$0xff] %v3440_v14 }
0x1476   :  { %v5315_v16 = vpop.eup %5314 }
0x1477   :  { %v3424_v23 = vmul.f32 %v5315_v16, %v3396_v3  ;;  %v3441_v25 = vadd.f32 %v3537_v50, %v3432_v15 }
0x1479   :  { %v3433_v27 = vmul.f32 %v3536_v2, %v3424_v23  ;;  %3445 = vst [vmem:[#allocation16 + $0x10] sm:$0xff] %v3441_v25 }
0x147b   :  { %v3442_v28 = vadd.f32 %v3537_v50, %v3433_v27 }
0x147d   :  { %3446 = vst [vmem:[#allocation16 + $0x18] sm:$0xff] %v3442_v28 }
0x147e   :  { %5511 = shalt.err (!%p5508_p12)
}
0x147f   :  { %s5512_s12 = scalar_lea.hbm %s6059_s8, 512 }
0x1480   :  { %p5513_p13 = scmp.ne.s32.totalorder %s6059_s8, %s5512_s12  ;;  %p5516_p0 = scmp.lt.u32.totalorder %s5512_s12, %s6059_s8 }
0x1482   :  { %p5518_p1 = pnand %p5516_p0, %p5513_p13 }
0x1484   :  { %5521 = shalt.err (!%p5518_p1)
}
0x1485   :  { %3458 = dma.vmem_to_hbm [thread:$0]  %s3453_s10, 512, %s6059_s8, [#allocation4], %s5536_s17, %s5536_s17, %s5537_s18  }
0x1486   :  { %5532 = dma.done.wait [#allocation4], 512  }
0x1487   :  { %5533 = vsyncadd [#allocation4], 4294966784 }
0x1488   :  { %3462 = vsyncpa [#allocation3], 1 }
0x1489   :  { %3463 = vsyncpa [#allocation6], 1 }
0x148a   :  { %3464 = vsyncpa [#allocation9], 1 }
0x148b   :  { %3465 = vsyncpa [#allocation12], 1 }
0x148c   :  { %3466 = vsyncpa [#allocation15], 1 }
0x148d   :  { %3467 = vsyncpa [#allocation4], 1 }

</bundles_post_ra>
